<compile_context>
chip_gen: v7x
topology: tpu7x:2x2x1
jax: 0.10.0
libtpu: 0.0.40
codegen_flags: <defaults>
</compile_context>

<pallas_src>
import functools

import jax
import jax.numpy as jnp
from jax.experimental import pallas as pl
from jax.experimental.pallas import tpu as pltpu

BN_EPS = 1e-5


# ----------------------------------------------------------------------------
# Fused BasicBlock kernel (single invocation, whole batch resident in VMEM)
# ----------------------------------------------------------------------------
def _fused_block_kernel(*refs, N, H, W, Cin, C, stride, has_proj, eps):
    it = iter(refs)
    x_ref = next(it)                          # (N, H, W, Cin)          NHWC
    w1_ref = next(it)                         # (9*Cin, C)   flattened HWIO
    w2_ref = next(it)                         # (9*C,   C)
    ws_ref = next(it) if has_proj else None   # (Cin, C)     1x1 projection
    bn_ref = next(it)                         # (4|6, C): g1,b1,g2,b2[,gs,bs]
    o_ref = next(it)                          # (N, Ho, Wo, C)          NHWC
    pad1 = next(it)                           # VMEM (N, H+2,  W+2,  Cin)
    pad2 = next(it)                           # VMEM (N, Ho+2, Wo+2, C)
    p1 = next(it)                             # VMEM (rows, 9*Cin) im2col slab
    p2 = next(it)                             # VMEM (rows, 9*C)   im2col slab

    Ho = (H - 1) // stride + 1
    Wo = (W - 1) // stride + 1
    rows = N * Ho * Wo
    f32 = jnp.float32

    # One (1, rows) ones vector reused by all three BN reductions (hoisted:
    # JAX does not CSE broadcast_in_dim).
    ones_row = jnp.ones((1, rows), f32)
    inv_rows = 1.0 / rows

    def pad_into(dst, src_val, hh, ww, cc):
        # Zero only the 1-wide border, then write the interior once.
        dst[:, 0:1, :, :] = jnp.zeros((N, 1, ww + 2, cc), f32)
        dst[:, hh + 1:hh + 2, :, :] = jnp.zeros((N, 1, ww + 2, cc), f32)
        dst[:, 1:hh + 1, 0:1, :] = jnp.zeros((N, hh, 1, cc), f32)
        dst[:, 1:hh + 1, ww + 1:ww + 2, :] = jnp.zeros((N, hh, 1, cc), f32)
        dst[:, 1:hh + 1, 1:ww + 1, :] = src_val

    def conv3x3(pad_ref, slab, w_flat_ref, cin, s):
        # im2col: 9 tap reads (strided when s > 1, i.e. the conv is evaluated
        # ONLY at the strided output positions) written side by side into a
        # (rows, 9*cin) VMEM slab, then ONE MXU matmul with K = 9*cin.
        for kh in range(3):
            for kw in range(3):
                if s == 1:
                    tap = pad_ref[:, kh:kh + Ho, kw:kw + Wo, :]
                else:
                    tap = pad_ref[:, pl.ds(kh, Ho, stride=s),
                                  pl.ds(kw, Wo, stride=s), :]
                t = kh * 3 + kw
                slab[:, t * cin:(t + 1) * cin] = tap.reshape(rows, cin)
        return jnp.dot(slab[...], w_flat_ref[...],
                       preferred_element_type=f32)

    def bnorm(y, g, b):
        # Training-mode BN (biased batch variance).  Both reductions run on
        # the MXU (ones-vector matmuls, two-pass centered form); the
        # normalization is folded to a single scale/shift.
        mean = jnp.dot(ones_row, y, preferred_element_type=f32) * inv_rows
        d = y - mean
        var = jnp.dot(ones_row, d * d, preferred_element_type=f32) * inv_rows
        scale = g * jax.lax.rsqrt(var + eps)
        shift = b - mean * scale
        return y * scale + shift

    # ---- conv1 (3x3, stride, pad=1) -> bn1 -> relu --------------------------
    pad_into(pad1, x_ref[...], H, W, Cin)
    y1 = conv3x3(pad1, p1, w1_ref, Cin, stride)                # (rows, C)
    out1 = jnp.maximum(bnorm(y1, bn_ref[0:1, :], bn_ref[1:2, :]), 0.0)

    # ---- conv2 (3x3, stride 1, pad=1) -> bn2 --------------------------------
    pad_into(pad2, out1.reshape(N, Ho, Wo, C), Ho, Wo, C)
    y2 = conv3x3(pad2, p2, w2_ref, C, 1)                       # (rows, C)
    out2 = bnorm(y2, bn_ref[2:3, :], bn_ref[3:4, :])

    # ---- shortcut: identity, or strided 1x1-conv (matmul) + BN --------------
    if has_proj:
        if stride > 1:
            xs = x_ref[:, pl.ds(0, Ho, stride=stride),
                       pl.ds(0, Wo, stride=stride), :]
        else:
            xs = x_ref[...]
        ys = jnp.dot(xs.reshape(rows, Cin), ws_ref[...],
                     preferred_element_type=f32)
        sc = bnorm(ys, bn_ref[4:5, :], bn_ref[5:6, :])
    else:
        sc = x_ref[...].reshape(rows, C)       # Cin == C, stride == 1

    # ---- residual add + relu ------------------------------------------------
    o_ref[...] = jnp.maximum(out2 + sc, 0.0).reshape(N, Ho, Wo, C)


# ----------------------------------------------------------------------------
# Wrapper: layout plumbing + single pallas_call (no grid, no double-buffering)
# ----------------------------------------------------------------------------
@functools.partial(jax.jit, static_argnums=(2,))
def basic_block_forward(x, params, stride):
    N, H, W, Cin = x.shape
    C = params["w1"].shape[-1]
    Ho = (H - 1) // stride + 1
    Wo = (W - 1) // stride + 1
    rows = N * Ho * Wo
    has_proj = "ws" in params

    # Wrapper-side layout plumbing only (no compute moved out of the kernel):
    # flatten HWIO conv weights to im2col (9*Cin, C) form; pack all BN
    # gamma/beta vectors into one (k, C) operand.
    w1_flat = params["w1"].reshape(9 * Cin, C)
    w2_flat = params["w2"].reshape(9 * C, C)
    bn_rows = [params["g1"], params["b1"], params["g2"], params["b2"]]
    if has_proj:
        bn_rows += [params["gs"], params["bs"]]
    bn = jnp.stack(bn_rows)

    args = [x, w1_flat, w2_flat]
    if has_proj:
        args.append(params["ws"].reshape(Cin, C))
    args.append(bn)

    kern = functools.partial(_fused_block_kernel, N=N, H=H, W=W, Cin=Cin, C=C,
                             stride=stride, has_proj=has_proj, eps=BN_EPS)

    return pl.pallas_call(
        kern,
        out_shape=jax.ShapeDtypeStruct((N, Ho, Wo, C), jnp.float32),
        # No grid: one invocation, every operand whole-array resident in VMEM,
        # no redundant input double-buffering.
        scratch_shapes=[
            pltpu.VMEM((N, H + 2, W + 2, Cin), jnp.float32),   # padded x
            pltpu.VMEM((N, Ho + 2, Wo + 2, C), jnp.float32),   # padded bn1 out
            pltpu.VMEM((rows, 9 * Cin), jnp.float32),          # im2col conv1
            pltpu.VMEM((rows, 9 * C), jnp.float32),            # im2col conv2
        ],
        compiler_params=pltpu.CompilerParams(
            vmem_limit_bytes=32 * 1024 * 1024),
    )(*args)


# ----------------------------------------------------------------------------
# Pure-JAX reference for correctness checking
# ----------------------------------------------------------------------------
def _ref_conv(x, w, stride, pad):
    return jax.lax.conv_general_dilated(
        x, w, (stride, stride), [(pad, pad), (pad, pad)],
        dimension_numbers=("NHWC", "HWIO", "NHWC"))


def _ref_bn(y, g, b, eps=BN_EPS):
    m = jnp.mean(y, axis=(0, 1, 2), keepdims=True)
    v = jnp.mean(jnp.square(y - m), axis=(0, 1, 2), keepdims=True)
    return (y - m) / jnp.sqrt(v + eps) * g.reshape(1, 1, 1, -1) + b.reshape(1, 1, 1, -1)


def ref_forward(x, params, stride):
    out = jax.nn.relu(_ref_bn(_ref_conv(x, params["w1"], stride, 1),
                              params["g1"], params["b1"]))
    out = _ref_bn(_ref_conv(out, params["w2"], 1, 1), params["g2"], params["b2"])
    if "ws" in params:
        sc = _ref_bn(_ref_conv(x, params["ws"], stride, 0), params["gs"], params["bs"])
    else:
        sc = x
    return jax.nn.relu(out + sc)


# ----------------------------------------------------------------------------
# Deterministic parameter init (BN gamma=1, beta=0 as in PyTorch defaults)
# ----------------------------------------------------------------------------
def init_params(key, cin, cout, stride):
    k1, k2, k3 = jax.random.split(key, 3)
    p = {
        "w1": 0.1 * jax.random.normal(k1, (3, 3, cin, cout), jnp.float32),
        "g1": jnp.ones((cout,), jnp.float32),
        "b1": jnp.zeros((cout,), jnp.float32),
        "w2": 0.1 * jax.random.normal(k2, (3, 3, cout, cout), jnp.float32),
        "g2": jnp.ones((cout,), jnp.float32),
        "b2": jnp.zeros((cout,), jnp.float32),
    }
    if stride != 1 or cin != cout:
        p["ws"] = 0.1 * jax.random.normal(k3, (1, 1, cin, cout), jnp.float32)
        p["gs"] = jnp.ones((cout,), jnp.float32)
        p["bs"] = jnp.zeros((cout,), jnp.float32)
    return p


if __name__ == "__main__":
    key = jax.random.PRNGKey(0)
    kx, kp1, kp2 = jax.random.split(key, 3)

    # NHWC (2, 16, 16, 4)  ==  PyTorch NCHW (2, 4, 16, 16).
    x = jax.random.normal(kx, (2, 16, 16, 4), jnp.float32)

    # Case 1: projection shortcut (in=4, out=8, stride=2).
    params = init_params(kp1, 4, 8, 2)
    out = jax.block_until_ready(basic_block_forward(x, params, 2))
    ref = ref_forward(x, params, 2)
    assert out.shape == (2, 8, 8, 8)
    assert bool(jnp.allclose(out, ref, atol=1e-3, rtol=1e-3)), "projection block mismatch"

    # Case 2: identity shortcut (in=out=4, stride=1).
    params2 = init_params(kp2, 4, 4, 1)
    out2 = jax.block_until_ready(basic_block_forward(x, params2, 1))
    ref2 = ref_forward(x, params2, 1)
    assert out2.shape == (2, 16, 16, 4)
    assert bool(jnp.allclose(out2, ref2, atol=1e-3, rtol=1e-3)), "identity block mismatch"

    print("KERNEL_OK")
</pallas_src>

<mosaic_0001>
module attributes {stable_mosaic.version = 11 : i64} {
  func.func @_fused_block_kernel(%arg0: memref<2x16x16x4xf32, #tpu.memory_space<vmem>>, %arg1: memref<36x8xf32, #tpu.memory_space<vmem>>, %arg2: memref<72x8xf32, #tpu.memory_space<vmem>>, %arg3: memref<4x8xf32, #tpu.memory_space<vmem>>, %arg4: memref<6x8xf32, #tpu.memory_space<vmem>>, %arg5: memref<2x8x8x8xf32, #tpu.memory_space<vmem>>, %arg6: memref<2x18x18x4xf32, #tpu.memory_space<vmem>>, %arg7: memref<2x10x10x8xf32, #tpu.memory_space<vmem>>, %arg8: memref<128x36xf32, #tpu.memory_space<vmem>>, %arg9: memref<128x72xf32, #tpu.memory_space<vmem>>) attributes {dimension_semantics = [], scalar_prefetch = 0 : i64, scratch_operands = 4 : i64, tpu.core_type = #tpu.core_type<tc>} {
    %cst = arith.constant 1.000000e+00 : f32
    %0 = vector.broadcast %cst : f32 to vector<1x128xf32>
    %c0 = arith.constant 0 : index
    %c0_0 = arith.constant 0 : index
    %c0_1 = arith.constant 0 : index
    %c0_2 = arith.constant 0 : index
    %1 = vector.load %arg0[%c0, %c0_0, %c0_1, %c0_2] : memref<2x16x16x4xf32, #tpu.memory_space<vmem>>, vector<2x16x16x4xf32>
    %cst_3 = arith.constant 0.000000e+00 : f32
    %2 = vector.broadcast %cst_3 : f32 to vector<2x1x18x4xf32>
    %c0_4 = arith.constant 0 : index
    %c0_5 = arith.constant 0 : index
    %c0_6 = arith.constant 0 : index
    %c0_7 = arith.constant 0 : index
    %3 = vector.load %arg6[%c0_4, %c0_5, %c0_6, %c0_7] : memref<2x18x18x4xf32, #tpu.memory_space<vmem>>, vector<2x1x18x4xf32>
    tpu.vector_store %arg6[%c0_4, %c0_5, %c0_6, %c0_7], %2 {strides = array<i32>} : memref<2x18x18x4xf32, #tpu.memory_space<vmem>>, vector<2x1x18x4xf32>,
    %cst_8 = arith.constant 0.000000e+00 : f32
    %4 = vector.broadcast %cst_8 : f32 to vector<2x1x18x4xf32>
    %c0_9 = arith.constant 0 : index
    %c17 = arith.constant 17 : index
    %c0_10 = arith.constant 0 : index
    %c0_11 = arith.constant 0 : index
    %5 = vector.load %arg6[%c0_9, %c17, %c0_10, %c0_11] : memref<2x18x18x4xf32, #tpu.memory_space<vmem>>, vector<2x1x18x4xf32>
    tpu.vector_store %arg6[%c0_9, %c17, %c0_10, %c0_11], %4 {strides = array<i32>} : memref<2x18x18x4xf32, #tpu.memory_space<vmem>>, vector<2x1x18x4xf32>,
    %cst_12 = arith.constant 0.000000e+00 : f32
    %6 = vector.broadcast %cst_12 : f32 to vector<2x16x1x4xf32>
    %c0_13 = arith.constant 0 : index
    %c1 = arith.constant 1 : index
    %c0_14 = arith.constant 0 : index
    %c0_15 = arith.constant 0 : index
    %7 = vector.load %arg6[%c0_13, %c1, %c0_14, %c0_15] : memref<2x18x18x4xf32, #tpu.memory_space<vmem>>, vector<2x16x1x4xf32>
    tpu.vector_store %arg6[%c0_13, %c1, %c0_14, %c0_15], %6 {strides = array<i32>} : memref<2x18x18x4xf32, #tpu.memory_space<vmem>>, vector<2x16x1x4xf32>,
    %cst_16 = arith.constant 0.000000e+00 : f32
    %8 = vector.broadcast %cst_16 : f32 to vector<2x16x1x4xf32>
    %c0_17 = arith.constant 0 : index
    %c1_18 = arith.constant 1 : index
    %c17_19 = arith.constant 17 : index
    %c0_20 = arith.constant 0 : index
    %9 = vector.load %arg6[%c0_17, %c1_18, %c17_19, %c0_20] : memref<2x18x18x4xf32, #tpu.memory_space<vmem>>, vector<2x16x1x4xf32>
    tpu.vector_store %arg6[%c0_17, %c1_18, %c17_19, %c0_20], %8 {strides = array<i32>} : memref<2x18x18x4xf32, #tpu.memory_space<vmem>>, vector<2x16x1x4xf32>,
    %c0_21 = arith.constant 0 : index
    %c1_22 = arith.constant 1 : index
    %c1_23 = arith.constant 1 : index
    %c0_24 = arith.constant 0 : index
    %10 = vector.load %arg6[%c0_21, %c1_22, %c1_23, %c0_24] : memref<2x18x18x4xf32, #tpu.memory_space<vmem>>, vector<2x16x16x4xf32>
    tpu.vector_store %arg6[%c0_21, %c1_22, %c1_23, %c0_24], %1 {strides = array<i32>} : memref<2x18x18x4xf32, #tpu.memory_space<vmem>>, vector<2x16x16x4xf32>,
    %c0_25 = arith.constant 0 : index
    %c0_26 = arith.constant 0 : index
    %c0_27 = arith.constant 0 : index
    %c0_28 = arith.constant 0 : index
    %11 = tpu.strided_load %arg6[%c0_25, %c0_26, %c0_27, %c0_28] {strides = array<i32: 1, 2, 2, 1>} : memref<2x18x18x4xf32, #tpu.memory_space<vmem>>, vector<2x8x8x4xf32>
    %12 = vector.shape_cast %11 : vector<2x8x8x4xf32> to vector<128x4xf32>
    %c0_29 = arith.constant 0 : index
    %c0_30 = arith.constant 0 : index
    %13 = vector.load %arg8[%c0_29, %c0_30] : memref<128x36xf32, #tpu.memory_space<vmem>>, vector<128x4xf32>
    tpu.vector_store %arg8[%c0_29, %c0_30], %12 {strides = array<i32>} : memref<128x36xf32, #tpu.memory_space<vmem>>, vector<128x4xf32>,
    %c0_31 = arith.constant 0 : index
    %c0_32 = arith.constant 0 : index
    %c1_33 = arith.constant 1 : index
    %c0_34 = arith.constant 0 : index
    %14 = tpu.strided_load %arg6[%c0_31, %c0_32, %c1_33, %c0_34] {strides = array<i32: 1, 2, 2, 1>} : memref<2x18x18x4xf32, #tpu.memory_space<vmem>>, vector<2x8x8x4xf32>
    %15 = vector.shape_cast %14 : vector<2x8x8x4xf32> to vector<128x4xf32>
    %c0_35 = arith.constant 0 : index
    %c4 = arith.constant 4 : index
    %16 = vector.load %arg8[%c0_35, %c4] : memref<128x36xf32, #tpu.memory_space<vmem>>, vector<128x4xf32>
    tpu.vector_store %arg8[%c0_35, %c4], %15 {strides = array<i32>} : memref<128x36xf32, #tpu.memory_space<vmem>>, vector<128x4xf32>,
    %c0_36 = arith.constant 0 : index
    %c0_37 = arith.constant 0 : index
    %c2 = arith.constant 2 : index
    %c0_38 = arith.constant 0 : index
    %17 = tpu.strided_load %arg6[%c0_36, %c0_37, %c2, %c0_38] {strides = array<i32: 1, 2, 2, 1>} : memref<2x18x18x4xf32, #tpu.memory_space<vmem>>, vector<2x8x8x4xf32>
    %18 = vector.shape_cast %17 : vector<2x8x8x4xf32> to vector<128x4xf32>
    %c0_39 = arith.constant 0 : index
    %c8 = arith.constant 8 : index
    %19 = vector.load %arg8[%c0_39, %c8] : memref<128x36xf32, #tpu.memory_space<vmem>>, vector<128x4xf32>
    tpu.vector_store %arg8[%c0_39, %c8], %18 {strides = array<i32>} : memref<128x36xf32, #tpu.memory_space<vmem>>, vector<128x4xf32>,
    %c0_40 = arith.constant 0 : index
    %c1_41 = arith.constant 1 : index
    %c0_42 = arith.constant 0 : index
    %c0_43 = arith.constant 0 : index
    %20 = tpu.strided_load %arg6[%c0_40, %c1_41, %c0_42, %c0_43] {strides = array<i32: 1, 2, 2, 1>} : memref<2x18x18x4xf32, #tpu.memory_space<vmem>>, vector<2x8x8x4xf32>
    %21 = vector.shape_cast %20 : vector<2x8x8x4xf32> to vector<128x4xf32>
    %c0_44 = arith.constant 0 : index
    %c12 = arith.constant 12 : index
    %22 = vector.load %arg8[%c0_44, %c12] : memref<128x36xf32, #tpu.memory_space<vmem>>, vector<128x4xf32>
    tpu.vector_store %arg8[%c0_44, %c12], %21 {strides = array<i32>} : memref<128x36xf32, #tpu.memory_space<vmem>>, vector<128x4xf32>,
    %c0_45 = arith.constant 0 : index
    %c1_46 = arith.constant 1 : index
    %c1_47 = arith.constant 1 : index
    %c0_48 = arith.constant 0 : index
    %23 = tpu.strided_load %arg6[%c0_45, %c1_46, %c1_47, %c0_48] {strides = array<i32: 1, 2, 2, 1>} : memref<2x18x18x4xf32, #tpu.memory_space<vmem>>, vector<2x8x8x4xf32>
    %24 = vector.shape_cast %23 : vector<2x8x8x4xf32> to vector<128x4xf32>
    %c0_49 = arith.constant 0 : index
    %c16 = arith.constant 16 : index
    %25 = vector.load %arg8[%c0_49, %c16] : memref<128x36xf32, #tpu.memory_space<vmem>>, vector<128x4xf32>
    tpu.vector_store %arg8[%c0_49, %c16], %24 {strides = array<i32>} : memref<128x36xf32, #tpu.memory_space<vmem>>, vector<128x4xf32>,
    %c0_50 = arith.constant 0 : index
    %c1_51 = arith.constant 1 : index
    %c2_52 = arith.constant 2 : index
    %c0_53 = arith.constant 0 : index
    %26 = tpu.strided_load %arg6[%c0_50, %c1_51, %c2_52, %c0_53] {strides = array<i32: 1, 2, 2, 1>} : memref<2x18x18x4xf32, #tpu.memory_space<vmem>>, vector<2x8x8x4xf32>
    %27 = vector.shape_cast %26 : vector<2x8x8x4xf32> to vector<128x4xf32>
    %c0_54 = arith.constant 0 : index
    %c20 = arith.constant 20 : index
    %28 = vector.load %arg8[%c0_54, %c20] : memref<128x36xf32, #tpu.memory_space<vmem>>, vector<128x4xf32>
    tpu.vector_store %arg8[%c0_54, %c20], %27 {strides = array<i32>} : memref<128x36xf32, #tpu.memory_space<vmem>>, vector<128x4xf32>,
    %c0_55 = arith.constant 0 : index
    %c2_56 = arith.constant 2 : index
    %c0_57 = arith.constant 0 : index
    %c0_58 = arith.constant 0 : index
    %29 = tpu.strided_load %arg6[%c0_55, %c2_56, %c0_57, %c0_58] {strides = array<i32: 1, 2, 2, 1>} : memref<2x18x18x4xf32, #tpu.memory_space<vmem>>, vector<2x8x8x4xf32>
    %30 = vector.shape_cast %29 : vector<2x8x8x4xf32> to vector<128x4xf32>
    %c0_59 = arith.constant 0 : index
    %c24 = arith.constant 24 : index
    %31 = vector.load %arg8[%c0_59, %c24] : memref<128x36xf32, #tpu.memory_space<vmem>>, vector<128x4xf32>
    tpu.vector_store %arg8[%c0_59, %c24], %30 {strides = array<i32>} : memref<128x36xf32, #tpu.memory_space<vmem>>, vector<128x4xf32>,
    %c0_60 = arith.constant 0 : index
    %c2_61 = arith.constant 2 : index
    %c1_62 = arith.constant 1 : index
    %c0_63 = arith.constant 0 : index
    %32 = tpu.strided_load %arg6[%c0_60, %c2_61, %c1_62, %c0_63] {strides = array<i32: 1, 2, 2, 1>} : memref<2x18x18x4xf32, #tpu.memory_space<vmem>>, vector<2x8x8x4xf32>
    %33 = vector.shape_cast %32 : vector<2x8x8x4xf32> to vector<128x4xf32>
    %c0_64 = arith.constant 0 : index
    %c28 = arith.constant 28 : index
    %34 = vector.load %arg8[%c0_64, %c28] : memref<128x36xf32, #tpu.memory_space<vmem>>, vector<128x4xf32>
    tpu.vector_store %arg8[%c0_64, %c28], %33 {strides = array<i32>} : memref<128x36xf32, #tpu.memory_space<vmem>>, vector<128x4xf32>,
    %c0_65 = arith.constant 0 : index
    %c2_66 = arith.constant 2 : index
    %c2_67 = arith.constant 2 : index
    %c0_68 = arith.constant 0 : index
    %35 = tpu.strided_load %arg6[%c0_65, %c2_66, %c2_67, %c0_68] {strides = array<i32: 1, 2, 2, 1>} : memref<2x18x18x4xf32, #tpu.memory_space<vmem>>, vector<2x8x8x4xf32>
    %36 = vector.shape_cast %35 : vector<2x8x8x4xf32> to vector<128x4xf32>
    %c0_69 = arith.constant 0 : index
    %c32 = arith.constant 32 : index
    %37 = vector.load %arg8[%c0_69, %c32] : memref<128x36xf32, #tpu.memory_space<vmem>>, vector<128x4xf32>
    tpu.vector_store %arg8[%c0_69, %c32], %36 {strides = array<i32>} : memref<128x36xf32, #tpu.memory_space<vmem>>, vector<128x4xf32>,
    %c0_70 = arith.constant 0 : index
    %c0_71 = arith.constant 0 : index
    %38 = vector.load %arg8[%c0_70, %c0_71] : memref<128x36xf32, #tpu.memory_space<vmem>>, vector<128x36xf32>
    %c0_72 = arith.constant 0 : index
    %c0_73 = arith.constant 0 : index
    %39 = vector.load %arg1[%c0_72, %c0_73] : memref<36x8xf32, #tpu.memory_space<vmem>>, vector<36x8xf32>
    %cst_74 = arith.constant dense<0.000000e+00> : vector<128x8xf32>
    %40 = tpu.matmul %38, %39, %cst_74 {dimension_numbers = #tpu.dot_dimension_numbers<[1], [0], [0], [1], [0, 0, 1, 1], [], []>} : vector<128x36xf32>, vector<36x8xf32>, vector<128x8xf32> -> vector<128x8xf32>
    %c0_75 = arith.constant 0 : index
    %c0_76 = arith.constant 0 : index
    %41 = vector.load %arg4[%c0_75, %c0_76] : memref<6x8xf32, #tpu.memory_space<vmem>>, vector<1x8xf32>
    %c1_77 = arith.constant 1 : index
    %c0_78 = arith.constant 0 : index
    %42 = vector.load %arg4[%c1_77, %c0_78] : memref<6x8xf32, #tpu.memory_space<vmem>>, vector<1x8xf32>
    %cst_79 = arith.constant dense<0.000000e+00> : vector<1x8xf32>
    %43 = tpu.matmul %0, %40, %cst_79 {dimension_numbers = #tpu.dot_dimension_numbers<[1], [0], [0], [1], [0, 0, 1, 1], [], []>} : vector<1x128xf32>, vector<128x8xf32>, vector<1x8xf32> -> vector<1x8xf32>
    %cst_80 = arith.constant 7.812500e-03 : f32
    %44 = vector.broadcast %cst_80 : f32 to vector<1x8xf32>
    %45 = arith.mulf %43, %44 : vector<1x8xf32>
    %46 = vector.broadcast %45 : vector<1x8xf32> to vector<128x8xf32>
    %47 = arith.subf %40, %46 : vector<128x8xf32>
    %48 = arith.mulf %47, %47 : vector<128x8xf32>
    %cst_81 = arith.constant dense<0.000000e+00> : vector<1x8xf32>
    %49 = tpu.matmul %0, %48, %cst_81 {dimension_numbers = #tpu.dot_dimension_numbers<[1], [0], [0], [1], [0, 0, 1, 1], [], []>} : vector<1x128xf32>, vector<128x8xf32>, vector<1x8xf32> -> vector<1x8xf32>
    %cst_82 = arith.constant 7.812500e-03 : f32
    %50 = vector.broadcast %cst_82 : f32 to vector<1x8xf32>
    %51 = arith.mulf %49, %50 : vector<1x8xf32>
    %cst_83 = arith.constant 9.99999974E-6 : f32
    %52 = vector.broadcast %cst_83 : f32 to vector<1x8xf32>
    %53 = arith.addf %51, %52 : vector<1x8xf32>
    %54 = math.rsqrt %53 : vector<1x8xf32>
    %55 = arith.mulf %41, %54 : vector<1x8xf32>
    %56 = arith.mulf %45, %55 : vector<1x8xf32>
    %57 = arith.subf %42, %56 : vector<1x8xf32>
    %58 = vector.broadcast %55 : vector<1x8xf32> to vector<128x8xf32>
    %59 = arith.mulf %40, %58 : vector<128x8xf32>
    %60 = vector.broadcast %57 : vector<1x8xf32> to vector<128x8xf32>
    %61 = arith.addf %59, %60 : vector<128x8xf32>
    %cst_84 = arith.constant 0.000000e+00 : f32
    %62 = vector.broadcast %cst_84 : f32 to vector<128x8xf32>
    %63 = arith.maximumf %61, %62 : vector<128x8xf32>
    %64 = vector.shape_cast %63 : vector<128x8xf32> to vector<2x8x8x8xf32>
    %cst_85 = arith.constant 0.000000e+00 : f32
    %65 = vector.broadcast %cst_85 : f32 to vector<2x1x10x8xf32>
    %c0_86 = arith.constant 0 : index
    %c0_87 = arith.constant 0 : index
    %c0_88 = arith.constant 0 : index
    %c0_89 = arith.constant 0 : index
    %66 = vector.load %arg7[%c0_86, %c0_87, %c0_88, %c0_89] : memref<2x10x10x8xf32, #tpu.memory_space<vmem>>, vector<2x1x10x8xf32>
    tpu.vector_store %arg7[%c0_86, %c0_87, %c0_88, %c0_89], %65 {strides = array<i32>} : memref<2x10x10x8xf32, #tpu.memory_space<vmem>>, vector<2x1x10x8xf32>,
    %cst_90 = arith.constant 0.000000e+00 : f32
    %67 = vector.broadcast %cst_90 : f32 to vector<2x1x10x8xf32>
    %c0_91 = arith.constant 0 : index
    %c9 = arith.constant 9 : index
    %c0_92 = arith.constant 0 : index
    %c0_93 = arith.constant 0 : index
    %68 = vector.load %arg7[%c0_91, %c9, %c0_92, %c0_93] : memref<2x10x10x8xf32, #tpu.memory_space<vmem>>, vector<2x1x10x8xf32>
    tpu.vector_store %arg7[%c0_91, %c9, %c0_92, %c0_93], %67 {strides = array<i32>} : memref<2x10x10x8xf32, #tpu.memory_space<vmem>>, vector<2x1x10x8xf32>,
    %cst_94 = arith.constant 0.000000e+00 : f32
    %69 = vector.broadcast %cst_94 : f32 to vector<2x8x1x8xf32>
    %c0_95 = arith.constant 0 : index
    %c1_96 = arith.constant 1 : index
    %c0_97 = arith.constant 0 : index
    %c0_98 = arith.constant 0 : index
    %70 = vector.load %arg7[%c0_95, %c1_96, %c0_97, %c0_98] : memref<2x10x10x8xf32, #tpu.memory_space<vmem>>, vector<2x8x1x8xf32>
    tpu.vector_store %arg7[%c0_95, %c1_96, %c0_97, %c0_98], %69 {strides = array<i32>} : memref<2x10x10x8xf32, #tpu.memory_space<vmem>>, vector<2x8x1x8xf32>,
    %cst_99 = arith.constant 0.000000e+00 : f32
    %71 = vector.broadcast %cst_99 : f32 to vector<2x8x1x8xf32>
    %c0_100 = arith.constant 0 : index
    %c1_101 = arith.constant 1 : index
    %c9_102 = arith.constant 9 : index
    %c0_103 = arith.constant 0 : index
    %72 = vector.load %arg7[%c0_100, %c1_101, %c9_102, %c0_103] : memref<2x10x10x8xf32, #tpu.memory_space<vmem>>, vector<2x8x1x8xf32>
    tpu.vector_store %arg7[%c0_100, %c1_101, %c9_102, %c0_103], %71 {strides = array<i32>} : memref<2x10x10x8xf32, #tpu.memory_space<vmem>>, vector<2x8x1x8xf32>,
    %c0_104 = arith.constant 0 : index
    %c1_105 = arith.constant 1 : index
    %c1_106 = arith.constant 1 : index
    %c0_107 = arith.constant 0 : index
    %73 = vector.load %arg7[%c0_104, %c1_105, %c1_106, %c0_107] : memref<2x10x10x8xf32, #tpu.memory_space<vmem>>, vector<2x8x8x8xf32>
    tpu.vector_store %arg7[%c0_104, %c1_105, %c1_106, %c0_107], %64 {strides = array<i32>} : memref<2x10x10x8xf32, #tpu.memory_space<vmem>>, vector<2x8x8x8xf32>,
    %c0_108 = arith.constant 0 : index
    %c0_109 = arith.constant 0 : index
    %c0_110 = arith.constant 0 : index
    %c0_111 = arith.constant 0 : index
    %74 = vector.load %arg7[%c0_108, %c0_109, %c0_110, %c0_111] : memref<2x10x10x8xf32, #tpu.memory_space<vmem>>, vector<2x8x8x8xf32>
    %75 = vector.shape_cast %74 : vector<2x8x8x8xf32> to vector<128x8xf32>
    %c0_112 = arith.constant 0 : index
    %c0_113 = arith.constant 0 : index
    %76 = vector.load %arg9[%c0_112, %c0_113] : memref<128x72xf32, #tpu.memory_space<vmem>>, vector<128x8xf32>
    tpu.vector_store %arg9[%c0_112, %c0_113], %75 {strides = array<i32>} : memref<128x72xf32, #tpu.memory_space<vmem>>, vector<128x8xf32>,
    %c0_114 = arith.constant 0 : index
    %c0_115 = arith.constant 0 : index
    %c1_116 = arith.constant 1 : index
    %c0_117 = arith.constant 0 : index
    %77 = vector.load %arg7[%c0_114, %c0_115, %c1_116, %c0_117] : memref<2x10x10x8xf32, #tpu.memory_space<vmem>>, vector<2x8x8x8xf32>
    %78 = vector.shape_cast %77 : vector<2x8x8x8xf32> to vector<128x8xf32>
    %c0_118 = arith.constant 0 : index
    %c8_119 = arith.constant 8 : index
    %79 = vector.load %arg9[%c0_118, %c8_119] : memref<128x72xf32, #tpu.memory_space<vmem>>, vector<128x8xf32>
    tpu.vector_store %arg9[%c0_118, %c8_119], %78 {strides = array<i32>} : memref<128x72xf32, #tpu.memory_space<vmem>>, vector<128x8xf32>,
    %c0_120 = arith.constant 0 : index
    %c0_121 = arith.constant 0 : index
    %c2_122 = arith.constant 2 : index
    %c0_123 = arith.constant 0 : index
    %80 = vector.load %arg7[%c0_120, %c0_121, %c2_122, %c0_123] : memref<2x10x10x8xf32, #tpu.memory_space<vmem>>, vector<2x8x8x8xf32>
    %81 = vector.shape_cast %80 : vector<2x8x8x8xf32> to vector<128x8xf32>
    %c0_124 = arith.constant 0 : index
    %c16_125 = arith.constant 16 : index
    %82 = vector.load %arg9[%c0_124, %c16_125] : memref<128x72xf32, #tpu.memory_space<vmem>>, vector<128x8xf32>
    tpu.vector_store %arg9[%c0_124, %c16_125], %81 {strides = array<i32>} : memref<128x72xf32, #tpu.memory_space<vmem>>, vector<128x8xf32>,
    %c0_126 = arith.constant 0 : index
    %c1_127 = arith.constant 1 : index
    %c0_128 = arith.constant 0 : index
    %c0_129 = arith.constant 0 : index
    %83 = vector.load %arg7[%c0_126, %c1_127, %c0_128, %c0_129] : memref<2x10x10x8xf32, #tpu.memory_space<vmem>>, vector<2x8x8x8xf32>
    %84 = vector.shape_cast %83 : vector<2x8x8x8xf32> to vector<128x8xf32>
    %c0_130 = arith.constant 0 : index
    %c24_131 = arith.constant 24 : index
    %85 = vector.load %arg9[%c0_130, %c24_131] : memref<128x72xf32, #tpu.memory_space<vmem>>, vector<128x8xf32>
    tpu.vector_store %arg9[%c0_130, %c24_131], %84 {strides = array<i32>} : memref<128x72xf32, #tpu.memory_space<vmem>>, vector<128x8xf32>,
    %c0_132 = arith.constant 0 : index
    %c1_133 = arith.constant 1 : index
    %c1_134 = arith.constant 1 : index
    %c0_135 = arith.constant 0 : index
    %86 = vector.load %arg7[%c0_132, %c1_133, %c1_134, %c0_135] : memref<2x10x10x8xf32, #tpu.memory_space<vmem>>, vector<2x8x8x8xf32>
    %87 = vector.shape_cast %86 : vector<2x8x8x8xf32> to vector<128x8xf32>
    %c0_136 = arith.constant 0 : index
    %c32_137 = arith.constant 32 : index
    %88 = vector.load %arg9[%c0_136, %c32_137] : memref<128x72xf32, #tpu.memory_space<vmem>>, vector<128x8xf32>
    tpu.vector_store %arg9[%c0_136, %c32_137], %87 {strides = array<i32>} : memref<128x72xf32, #tpu.memory_space<vmem>>, vector<128x8xf32>,
    %c0_138 = arith.constant 0 : index
    %c1_139 = arith.constant 1 : index
    %c2_140 = arith.constant 2 : index
    %c0_141 = arith.constant 0 : index
    %89 = vector.load %arg7[%c0_138, %c1_139, %c2_140, %c0_141] : memref<2x10x10x8xf32, #tpu.memory_space<vmem>>, vector<2x8x8x8xf32>
    %90 = vector.shape_cast %89 : vector<2x8x8x8xf32> to vector<128x8xf32>
    %c0_142 = arith.constant 0 : index
    %c40 = arith.constant 40 : index
    %91 = vector.load %arg9[%c0_142, %c40] : memref<128x72xf32, #tpu.memory_space<vmem>>, vector<128x8xf32>
    tpu.vector_store %arg9[%c0_142, %c40], %90 {strides = array<i32>} : memref<128x72xf32, #tpu.memory_space<vmem>>, vector<128x8xf32>,
    %c0_143 = arith.constant 0 : index
    %c2_144 = arith.constant 2 : index
    %c0_145 = arith.constant 0 : index
    %c0_146 = arith.constant 0 : index
    %92 = vector.load %arg7[%c0_143, %c2_144, %c0_145, %c0_146] : memref<2x10x10x8xf32, #tpu.memory_space<vmem>>, vector<2x8x8x8xf32>
    %93 = vector.shape_cast %92 : vector<2x8x8x8xf32> to vector<128x8xf32>
    %c0_147 = arith.constant 0 : index
    %c48 = arith.constant 48 : index
    %94 = vector.load %arg9[%c0_147, %c48] : memref<128x72xf32, #tpu.memory_space<vmem>>, vector<128x8xf32>
    tpu.vector_store %arg9[%c0_147, %c48], %93 {strides = array<i32>} : memref<128x72xf32, #tpu.memory_space<vmem>>, vector<128x8xf32>,
    %c0_148 = arith.constant 0 : index
    %c2_149 = arith.constant 2 : index
    %c1_150 = arith.constant 1 : index
    %c0_151 = arith.constant 0 : index
    %95 = vector.load %arg7[%c0_148, %c2_149, %c1_150, %c0_151] : memref<2x10x10x8xf32, #tpu.memory_space<vmem>>, vector<2x8x8x8xf32>
    %96 = vector.shape_cast %95 : vector<2x8x8x8xf32> to vector<128x8xf32>
    %c0_152 = arith.constant 0 : index
    %c56 = arith.constant 56 : index
    %97 = vector.load %arg9[%c0_152, %c56] : memref<128x72xf32, #tpu.memory_space<vmem>>, vector<128x8xf32>
    tpu.vector_store %arg9[%c0_152, %c56], %96 {strides = array<i32>} : memref<128x72xf32, #tpu.memory_space<vmem>>, vector<128x8xf32>,
    %c0_153 = arith.constant 0 : index
    %c2_154 = arith.constant 2 : index
    %c2_155 = arith.constant 2 : index
    %c0_156 = arith.constant 0 : index
    %98 = vector.load %arg7[%c0_153, %c2_154, %c2_155, %c0_156] : memref<2x10x10x8xf32, #tpu.memory_space<vmem>>, vector<2x8x8x8xf32>
    %99 = vector.shape_cast %98 : vector<2x8x8x8xf32> to vector<128x8xf32>
    %c0_157 = arith.constant 0 : index
    %c64 = arith.constant 64 : index
    %100 = vector.load %arg9[%c0_157, %c64] : memref<128x72xf32, #tpu.memory_space<vmem>>, vector<128x8xf32>
    tpu.vector_store %arg9[%c0_157, %c64], %99 {strides = array<i32>} : memref<128x72xf32, #tpu.memory_space<vmem>>, vector<128x8xf32>,
    %c0_158 = arith.constant 0 : index
    %c0_159 = arith.constant 0 : index
    %101 = vector.load %arg9[%c0_158, %c0_159] : memref<128x72xf32, #tpu.memory_space<vmem>>, vector<128x72xf32>
    %c0_160 = arith.constant 0 : index
    %c0_161 = arith.constant 0 : index
    %102 = vector.load %arg2[%c0_160, %c0_161] : memref<72x8xf32, #tpu.memory_space<vmem>>, vector<72x8xf32>
    %cst_162 = arith.constant dense<0.000000e+00> : vector<128x8xf32>
    %103 = tpu.matmul %101, %102, %cst_162 {dimension_numbers = #tpu.dot_dimension_numbers<[1], [0], [0], [1], [0, 0, 1, 1], [], []>} : vector<128x72xf32>, vector<72x8xf32>, vector<128x8xf32> -> vector<128x8xf32>
    %c2_163 = arith.constant 2 : index
    %c0_164 = arith.constant 0 : index
    %104 = vector.load %arg4[%c2_163, %c0_164] : memref<6x8xf32, #tpu.memory_space<vmem>>, vector<1x8xf32>
    %c3 = arith.constant 3 : index
    %c0_165 = arith.constant 0 : index
    %105 = vector.load %arg4[%c3, %c0_165] : memref<6x8xf32, #tpu.memory_space<vmem>>, vector<1x8xf32>
    %cst_166 = arith.constant dense<0.000000e+00> : vector<1x8xf32>
    %106 = tpu.matmul %0, %103, %cst_166 {dimension_numbers = #tpu.dot_dimension_numbers<[1], [0], [0], [1], [0, 0, 1, 1], [], []>} : vector<1x128xf32>, vector<128x8xf32>, vector<1x8xf32> -> vector<1x8xf32>
    %cst_167 = arith.constant 7.812500e-03 : f32
    %107 = vector.broadcast %cst_167 : f32 to vector<1x8xf32>
    %108 = arith.mulf %106, %107 : vector<1x8xf32>
    %109 = vector.broadcast %108 : vector<1x8xf32> to vector<128x8xf32>
    %110 = arith.subf %103, %109 : vector<128x8xf32>
    %111 = arith.mulf %110, %110 : vector<128x8xf32>
    %cst_168 = arith.constant dense<0.000000e+00> : vector<1x8xf32>
    %112 = tpu.matmul %0, %111, %cst_168 {dimension_numbers = #tpu.dot_dimension_numbers<[1], [0], [0], [1], [0, 0, 1, 1], [], []>} : vector<1x128xf32>, vector<128x8xf32>, vector<1x8xf32> -> vector<1x8xf32>
    %cst_169 = arith.constant 7.812500e-03 : f32
    %113 = vector.broadcast %cst_169 : f32 to vector<1x8xf32>
    %114 = arith.mulf %112, %113 : vector<1x8xf32>
    %cst_170 = arith.constant 9.99999974E-6 : f32
    %115 = vector.broadcast %cst_170 : f32 to vector<1x8xf32>
    %116 = arith.addf %114, %115 : vector<1x8xf32>
    %117 = math.rsqrt %116 : vector<1x8xf32>
    %118 = arith.mulf %104, %117 : vector<1x8xf32>
    %119 = arith.mulf %108, %118 : vector<1x8xf32>
    %120 = arith.subf %105, %119 : vector<1x8xf32>
    %121 = vector.broadcast %118 : vector<1x8xf32> to vector<128x8xf32>
    %122 = arith.mulf %103, %121 : vector<128x8xf32>
    %123 = vector.broadcast %120 : vector<1x8xf32> to vector<128x8xf32>
    %124 = arith.addf %122, %123 : vector<128x8xf32>
    %c0_171 = arith.constant 0 : index
    %c0_172 = arith.constant 0 : index
    %c0_173 = arith.constant 0 : index
    %c0_174 = arith.constant 0 : index
    %125 = tpu.strided_load %arg0[%c0_171, %c0_172, %c0_173, %c0_174] {strides = array<i32: 1, 2, 2, 1>} : memref<2x16x16x4xf32, #tpu.memory_space<vmem>>, vector<2x8x8x4xf32>
    %126 = vector.shape_cast %125 : vector<2x8x8x4xf32> to vector<128x4xf32>
    %c0_175 = arith.constant 0 : index
    %c0_176 = arith.constant 0 : index
    %127 = vector.load %arg3[%c0_175, %c0_176] : memref<4x8xf32, #tpu.memory_space<vmem>>, vector<4x8xf32>
    %cst_177 = arith.constant dense<0.000000e+00> : vector<128x8xf32>
    %128 = tpu.matmul %126, %127, %cst_177 {dimension_numbers = #tpu.dot_dimension_numbers<[1], [0], [0], [1], [0, 0, 1, 1], [], []>} : vector<128x4xf32>, vector<4x8xf32>, vector<128x8xf32> -> vector<128x8xf32>
    %c4_178 = arith.constant 4 : index
    %c0_179 = arith.constant 0 : index
    %129 = vector.load %arg4[%c4_178, %c0_179] : memref<6x8xf32, #tpu.memory_space<vmem>>, vector<1x8xf32>
    %c5 = arith.constant 5 : index
    %c0_180 = arith.constant 0 : index
    %130 = vector.load %arg4[%c5, %c0_180] : memref<6x8xf32, #tpu.memory_space<vmem>>, vector<1x8xf32>
    %cst_181 = arith.constant dense<0.000000e+00> : vector<1x8xf32>
    %131 = tpu.matmul %0, %128, %cst_181 {dimension_numbers = #tpu.dot_dimension_numbers<[1], [0], [0], [1], [0, 0, 1, 1], [], []>} : vector<1x128xf32>, vector<128x8xf32>, vector<1x8xf32> -> vector<1x8xf32>
    %cst_182 = arith.constant 7.812500e-03 : f32
    %132 = vector.broadcast %cst_182 : f32 to vector<1x8xf32>
    %133 = arith.mulf %131, %132 : vector<1x8xf32>
    %134 = vector.broadcast %133 : vector<1x8xf32> to vector<128x8xf32>
    %135 = arith.subf %128, %134 : vector<128x8xf32>
    %136 = arith.mulf %135, %135 : vector<128x8xf32>
    %cst_183 = arith.constant dense<0.000000e+00> : vector<1x8xf32>
    %137 = tpu.matmul %0, %136, %cst_183 {dimension_numbers = #tpu.dot_dimension_numbers<[1], [0], [0], [1], [0, 0, 1, 1], [], []>} : vector<1x128xf32>, vector<128x8xf32>, vector<1x8xf32> -> vector<1x8xf32>
    %cst_184 = arith.constant 7.812500e-03 : f32
    %138 = vector.broadcast %cst_184 : f32 to vector<1x8xf32>
    %139 = arith.mulf %137, %138 : vector<1x8xf32>
    %cst_185 = arith.constant 9.99999974E-6 : f32
    %140 = vector.broadcast %cst_185 : f32 to vector<1x8xf32>
    %141 = arith.addf %139, %140 : vector<1x8xf32>
    %142 = math.rsqrt %141 : vector<1x8xf32>
    %143 = arith.mulf %129, %142 : vector<1x8xf32>
    %144 = arith.mulf %133, %143 : vector<1x8xf32>
    %145 = arith.subf %130, %144 : vector<1x8xf32>
    %146 = vector.broadcast %143 : vector<1x8xf32> to vector<128x8xf32>
    %147 = arith.mulf %128, %146 : vector<128x8xf32>
    %148 = vector.broadcast %145 : vector<1x8xf32> to vector<128x8xf32>
    %149 = arith.addf %147, %148 : vector<128x8xf32>
    %150 = arith.addf %124, %149 : vector<128x8xf32>
    %cst_186 = arith.constant 0.000000e+00 : f32
    %151 = vector.broadcast %cst_186 : f32 to vector<128x8xf32>
    %152 = arith.maximumf %150, %151 : vector<128x8xf32>
    %153 = vector.shape_cast %152 : vector<128x8xf32> to vector<2x8x8x8xf32>
    %c0_187 = arith.constant 0 : index
    %c0_188 = arith.constant 0 : index
    %c0_189 = arith.constant 0 : index
    %c0_190 = arith.constant 0 : index
    %154 = vector.load %arg5[%c0_187, %c0_188, %c0_189, %c0_190] : memref<2x8x8x8xf32, #tpu.memory_space<vmem>>, vector<2x8x8x8xf32>
    tpu.vector_store %arg5[%c0_187, %c0_188, %c0_189, %c0_190], %153 {strides = array<i32>} : memref<2x8x8x8xf32, #tpu.memory_space<vmem>>, vector<2x8x8x8xf32>,
    return
  }
}

</mosaic_0001>

<bundles_post_ra>
// kernel: basic_block_forward.1
= control target key start
LH: loop header
LB: loop body
LE: loop exit
PB: predicated region body
PF: predicated region fallthrough
CT: control target
= control target key end

     0   :  { %vm85_vm0 = vcmask 31744   ;;  %vm88_vm1 = vcmask 25600   ;;  %v4323_v1 = vmov 0.0   ;;  %vm101_vm2 = vcmask 24576   ;;  %s4324_s14 = smov 8   ;;  %s4325_s15 = smov 4   ;;  %s5975_s0 = inlined_call_operand.vmem [shape: f32[2,16,16,4], index: 0, kind: input, shape index: {}]   ;;  %s5976_s1 = inlined_call_operand.vmem [shape: f32[36,8], index: 1, kind: input, shape index: {}]   ;;  %s5977_s2 = inlined_call_operand.vmem [shape: f32[72,8], index: 2, kind: input, shape index: {}]   ;;  %s5978_s3 = inlined_call_operand.vmem [shape: f32[4,8], index: 3, kind: input, shape index: {}]   ;;  %s5979_s4 = inlined_call_operand.vmem [shape: f32[6,8], index: 4, kind: input, shape index: {}]   ;;  %s5980_s5 = inlined_call_operand.hbm [shape: f32[2,8,8,8], index: 5, kind: output, shape index: {}]  }
   0x1   :  { %v23_v0 = vld [vmem:[%s5975_s0 + $0x10] sm:$0xff]  ;;  %86 = vst.msk [vmem:[#allocation2] sm:$0xff] %vm85_vm0, %v4323_v1  ;;  %87 = vst.msk [vmem:[#allocation2 + $0x8] sm:$0xff] %vm85_vm0, %v4323_v1  ;;  %v24_v2 = vld [vmem:[%s5975_s0 + $0x18] sm:$0xff]  ;;  %s4326_s16 = smov 12   ;;  %s4327_s17 = smov 16  }
   0x2   :  { %89 = vst.msk [vmem:[#allocation2 + $0x10] sm:$0x3] %vm88_vm1, %v4323_v1  ;;  %92 = vst.msk [vmem:[#allocation2 + $0x1c0] sm:$0x3] %vm88_vm1, %v4323_v1  ;;  %v25_v3 = vld [vmem:[%s5975_s0 + $0x20] sm:$0xff]  ;;  %v26_v4 = vld [vmem:[%s5975_s0 + $0x28] sm:$0xff] }
   0x3   :  { %90 = vst.msk [vmem:[#allocation2 + $0x1b0] sm:$0xff] %vm85_vm0, %v4323_v1  ;;  %91 = vst.msk [vmem:[#allocation2 + $0x1b8] sm:$0xff] %vm85_vm0, %v4323_v1  ;;  %v21_v5 = vld [vmem:[%s5975_s0] sm:$0xff]  ;;  %v22_v6 = vld [vmem:[%s5975_s0 + $0x8] sm:$0xff]  ;;  %s4328_s30 = smov 20   ;;  %s4329_s22 = smov 24  }
   0x4   :  { %168 = vst.msk [vmem:[#allocation2 + $0x31] sm:$0xff] %vm85_vm0, %v23_v0  ;;  %169 = vst.msk [vmem:[#allocation2 + $0x39] sm:$0xff] %vm85_vm0, %v24_v2  ;;  %v27_v7 = vld [vmem:[%s5975_s0 + $0x30] sm:$0xff]  ;;  %v28_v8 = vld [vmem:[%s5975_s0 + $0x38] sm:$0xff]  ;;  %s4330_s26 = smov 28  }
   0x5   :  { %104 = vst.msk [vmem:[#allocation2 + $0x48] sm:$0x1] %vm101_vm2, %v4323_v1  ;;  %102 = vst.msk [vmem:[#allocation2 + $0x18] sm:$0x1] %vm101_vm2, %v4323_v1  ;;  %v31_v9 = vld [vmem:[%s5975_s0 + $0x50] sm:$0xff]  ;;  %v32_v10 = vld [vmem:[%s5975_s0 + $0x58] sm:$0xff] }
   0x6   :  { %170 = vst.msk [vmem:[#allocation2 + $0x49] sm:$0xff] %vm85_vm0, %v25_v3  ;;  %171 = vst.msk [vmem:[#allocation2 + $0x51] sm:$0xff] %vm85_vm0, %v26_v4  ;;  %v29_v11 = vld [vmem:[%s5975_s0 + $0x40] sm:$0xff]  ;;  %v30_v12 = vld [vmem:[%s5975_s0 + $0x48] sm:$0xff] }
   0x7   :  { %103 = vst.msk [vmem:[#allocation2 + $0x30] sm:$0x1] %vm101_vm2, %v4323_v1  ;;  %105 = vst.msk [vmem:[#allocation2 + $0x60] sm:$0x1] %vm101_vm2, %v4323_v1  ;;  %v33_v13 = vld [vmem:[%s5975_s0 + $0x60] sm:$0xff]  ;;  %v34_v14 = vld [vmem:[%s5975_s0 + $0x68] sm:$0xff] }
   0x8   :  { %106 = vst.msk [vmem:[#allocation2 + $0x78] sm:$0x1] %vm101_vm2, %v4323_v1  ;;  %107 = vst.msk [vmem:[#allocation2 + $0x90] sm:$0x1] %vm101_vm2, %v4323_v1  ;;  %v35_v15 = vld [vmem:[%s5975_s0 + $0x70] sm:$0xff]  ;;  %v36_v16 = vld [vmem:[%s5975_s0 + $0x78] sm:$0xff] }
   0x9   :  { %108 = vst.msk [vmem:[#allocation2 + $0xa8] sm:$0x1] %vm101_vm2, %v4323_v1  ;;  %109 = vst.msk [vmem:[#allocation2 + $0xc0] sm:$0x1] %vm101_vm2, %v4323_v1  ;;  %v39_v17 = vld [vmem:[%s5975_s0 + $0x90] sm:$0xff]  ;;  %v40_v18 = vld [vmem:[%s5975_s0 + $0x98] sm:$0xff] }
   0xa   :  { %110 = vst.msk [vmem:[#allocation2 + $0xd8] sm:$0x1] %vm101_vm2, %v4323_v1  ;;  %111 = vst.msk [vmem:[#allocation2 + $0xf0] sm:$0x1] %vm101_vm2, %v4323_v1  ;;  %v37_v19 = vld [vmem:[%s5975_s0 + $0x80] sm:$0xff]  ;;  %v38_v20 = vld [vmem:[%s5975_s0 + $0x88] sm:$0xff] }
   0xb   :  { %112 = vst.msk [vmem:[#allocation2 + $0x108] sm:$0x1] %vm101_vm2, %v4323_v1  ;;  %113 = vst.msk [vmem:[#allocation2 + $0x120] sm:$0x1] %vm101_vm2, %v4323_v1  ;;  %v41_v21 = vld [vmem:[%s5975_s0 + $0xa0] sm:$0xff]  ;;  %v42_v22 = vld [vmem:[%s5975_s0 + $0xa8] sm:$0xff] }
   0xc   :  { %114 = vst.msk [vmem:[#allocation2 + $0x138] sm:$0x1] %vm101_vm2, %v4323_v1  ;;  %115 = vst.msk [vmem:[#allocation2 + $0x150] sm:$0x1] %vm101_vm2, %v4323_v1  ;;  %v391_v23 = vld [vmem:[#allocation2 + $0x2] ss:$2 sm:$0xff] }
   0xd   :  { %116 = vst.msk [vmem:[#allocation2 + $0x168] sm:$0x1] %vm101_vm2, %v4323_v1  ;;  %117 = vst.msk [vmem:[#allocation2 + $0x180] sm:$0x1] %vm101_vm2, %v4323_v1  ;;  %v278_v24 = vld [vmem:[#allocation2 + $0x1] ss:$2 sm:$0xff]  ;;  %438 = vrot.lane.b32.xlu1 %v391_v23, %s4324_s14 }
   0xe   :  { %118 = vst.msk [vmem:[#allocation2 + $0x1c8] sm:$0x1] %vm101_vm2, %v4323_v1  ;;  %119 = vst.msk [vmem:[#allocation2 + $0x1e0] sm:$0x1] %vm101_vm2, %v4323_v1  ;;  %v43_v25 = vld [vmem:[%s5975_s0 + $0xb0] sm:$0xff]  ;;  %325 = vrot.lane.b32.xlu0 %v278_v24, %s4325_s15  ;;  %v44_v33 = vld [vmem:[%s5975_s0 + $0xb8] sm:$0xff] }
   0xf   :  { %120 = vst.msk [vmem:[#allocation2 + $0x1f8] sm:$0x1] %vm101_vm2, %v4323_v1  ;;  %121 = vst.msk [vmem:[#allocation2 + $0x210] sm:$0x1] %vm101_vm2, %v4323_v1  ;;  %v393_v26 = vld [vmem:[#allocation2 + $0x32] ss:$2 sm:$0xff] }
  0x10   :  { %122 = vst.msk [vmem:[#allocation2 + $0x228] sm:$0x1] %vm101_vm2, %v4323_v1  ;;  %123 = vst.msk [vmem:[#allocation2 + $0x240] sm:$0x1] %vm101_vm2, %v4323_v1  ;;  %v280_v27 = vld [vmem:[#allocation2 + $0x31] ss:$2 sm:$0xff] }
  0x11   :  { %124 = vst.msk [vmem:[#allocation2 + $0x258] sm:$0x1] %vm101_vm2, %v4323_v1  ;;  %125 = vst.msk [vmem:[#allocation2 + $0x270] sm:$0x1] %vm101_vm2, %v4323_v1  ;;  %440 = vrot.lane.b32.xlu1 %v393_v26, %s4324_s14  ;;  %v505_v28 = vld [vmem:[#allocation2 + $0x48] ss:$2 sm:$0xff] }
  0x12   :  { %126 = vst.msk [vmem:[#allocation2 + $0x288] sm:$0x1] %vm101_vm2, %v4323_v1  ;;  %127 = vst.msk [vmem:[#allocation2 + $0x2a0] sm:$0x1] %vm101_vm2, %v4323_v1  ;;  %327 = vrot.lane.b32.xlu0 %v280_v27, %s4325_s15  ;;  %v618_v34 = vld [vmem:[#allocation2 + $0x49] ss:$2 sm:$0xff] }
  0x13   :  { %128 = vst.msk [vmem:[#allocation2 + $0x2b8] sm:$0x1] %vm101_vm2, %v4323_v1  ;;  %129 = vst.msk [vmem:[#allocation2 + $0x2d0] sm:$0x1] %vm101_vm2, %v4323_v1  ;;  %v47_v35 = vld [vmem:[%s5975_s0 + $0xd0] sm:$0xff]  ;;  %v48_v36 = vld [vmem:[%s5975_s0 + $0xd8] sm:$0xff] }
  0x14   :  { %130 = vst.msk [vmem:[#allocation2 + $0x2e8] sm:$0x1] %vm101_vm2, %v4323_v1  ;;  %131 = vst.msk [vmem:[#allocation2 + $0x300] sm:$0x1] %vm101_vm2, %v4323_v1  ;;  %v45_v37 = vld [vmem:[%s5975_s0 + $0xc0] sm:$0xff]  ;;  %v46_v38 = vld [vmem:[%s5975_s0 + $0xc8] sm:$0xff] }
  0x15   :  { %132 = vst.msk [vmem:[#allocation2 + $0x318] sm:$0x1] %vm101_vm2, %v4323_v1  ;;  %133 = vst.msk [vmem:[#allocation2 + $0x330] sm:$0x1] %vm101_vm2, %v4323_v1  ;;  %552 = vrot.lane.b32.xlu1 %v505_v28, %s4326_s16  ;;  %v49_v39 = vld [vmem:[%s5975_s0 + $0xe0] sm:$0xff]  ;;  %v50_v41 = vld [vmem:[%s5975_s0 + $0xe8] sm:$0xff] }
  0x16   :  { %166 = vst.msk [vmem:[#allocation2 + $0x19] sm:$0xff] %vm85_vm0, %v21_v5  ;;  %167 = vst.msk [vmem:[#allocation2 + $0x21] sm:$0xff] %vm85_vm0, %v22_v6  ;;  %v230_v43 = vld [vmem:[#allocation2] ss:$2 sm:$0xff]  ;;  %v55_v44 = vld [vmem:[%s5975_s0 + $0x110] sm:$0xff] }
  0x17   :  { %172 = vst.msk [vmem:[#allocation2 + $0x61] sm:$0xff] %vm85_vm0, %v27_v7  ;;  %173 = vst.msk [vmem:[#allocation2 + $0x69] sm:$0xff] %vm85_vm0, %v28_v8  ;;  %v56_v45 = vld [vmem:[%s5975_s0 + $0x118] sm:$0xff]  ;;  %v53_v47 = vld [vmem:[%s5975_s0 + $0x100] sm:$0xff] }
  0x18   :  { %176 = vst.msk [vmem:[#allocation2 + $0x91] sm:$0xff] %vm85_vm0, %v31_v9  ;;  %177 = vst.msk [vmem:[#allocation2 + $0x99] sm:$0xff] %vm85_vm0, %v32_v10  ;;  %v232_v46 = vld [vmem:[#allocation2 + $0x30] ss:$2 sm:$0xff]  ;;  %v54_v48 = vld [vmem:[%s5975_s0 + $0x108] sm:$0xff] }
  0x19   :  { %174 = vst.msk [vmem:[#allocation2 + $0x79] sm:$0xff] %vm85_vm0, %v29_v11  ;;  %175 = vst.msk [vmem:[#allocation2 + $0x81] sm:$0xff] %vm85_vm0, %v30_v12  ;;  %v51_v50 = vld [vmem:[%s5975_s0 + $0xf0] sm:$0xff]  ;;  %v52_v55 = vld [vmem:[%s5975_s0 + $0xf8] sm:$0xff] }
  0x1a   :  { %178 = vst.msk [vmem:[#allocation2 + $0xa9] sm:$0xff] %vm85_vm0, %v33_v13  ;;  %179 = vst.msk [vmem:[#allocation2 + $0xb1] sm:$0xff] %vm85_vm0, %v34_v14  ;;  %v842_v51 = vld [vmem:[#allocation2 + $0x30] ss:$2 sm:$0xff]  ;;  %v57_v56 = vld [vmem:[%s5975_s0 + $0x120] sm:$0xff] }
  0x1b   :  { %180 = vst.msk [vmem:[#allocation2 + $0xc1] sm:$0xff] %vm85_vm0, %v35_v15  ;;  %181 = vst.msk [vmem:[#allocation2 + $0xc9] sm:$0xff] %vm85_vm0, %v36_v16  ;;  %v731_v52 = vld [vmem:[#allocation2 + $0x4a] ss:$2 sm:$0xff]  ;;  %v955_v59 = vld [vmem:[#allocation2 + $0x31] ss:$2 sm:$0xff] }
  0x1c   :  { %184 = vst.msk [vmem:[#allocation2 + $0xf1] sm:$0xff] %vm85_vm0, %v39_v17  ;;  %185 = vst.msk [vmem:[#allocation2 + $0xf9] sm:$0xff] %vm85_vm0, %v40_v18  ;;  %v58_v57 = vld [vmem:[%s5975_s0 + $0x128] sm:$0xff]  ;;  %v59_v60 = vld [vmem:[%s5975_s0 + $0x130] sm:$0xff] }
  0x1d   :  { %182 = vst.msk [vmem:[#allocation2 + $0xd9] sm:$0xff] %vm85_vm0, %v37_v19  ;;  %183 = vst.msk [vmem:[#allocation2 + $0xe1] sm:$0xff] %vm85_vm0, %v38_v20  ;;  %v503_v29 = vld [vmem:[#allocation2 + $0x18] ss:$2 sm:$0xff]  ;;  %v616_v31 = vld [vmem:[#allocation2 + $0x19] ss:$2 sm:$0xff] }
  0x1e   :  { %186 = vst.msk [vmem:[#allocation2 + $0x109] sm:$0xff] %vm85_vm0, %v41_v21  ;;  %187 = vst.msk [vmem:[#allocation2 + $0x111] sm:$0xff] %vm85_vm0, %v42_v22  ;;  %550 = vrot.lane.b32.xlu0 %v503_v29, %s4326_s16  ;;  %v282_v30 = vld [vmem:[#allocation2 + $0x61] ss:$2 sm:$0xff]  ;;  %v729_v32 = vld [vmem:[#allocation2 + $0x1a] ss:$2 sm:$0xff] }
  0x1f   :  { %188 = vst.msk [vmem:[#allocation2 + $0x121] sm:$0xff] %vm85_vm0, %v43_v25  ;;  %329 = vrot.lane.b32.xlu1 %v282_v30, %s4325_s15  ;;  %189 = vst.msk [vmem:[#allocation2 + $0x129] sm:$0xff] %vm85_vm0, %v44_v33  ;;  %v395_v40 = vld [vmem:[#allocation2 + $0x62] ss:$2 sm:$0xff]  ;;  %v284_v42 = vld [vmem:[#allocation2 + $0x91] ss:$2 sm:$0xff] }
  0x20   :  { %192 = vst.msk [vmem:[#allocation2 + $0x151] sm:$0xff] %vm85_vm0, %v47_v35  ;;  %193 = vst.msk [vmem:[#allocation2 + $0x159] sm:$0xff] %vm85_vm0, %v48_v36  ;;  %v234_v49 = vld [vmem:[#allocation2 + $0x60] ss:$2 sm:$0xff]  ;;  %v236_v58 = vld [vmem:[#allocation2 + $0x90] ss:$2 sm:$0xff] }
  0x21   :  { %190 = vst.msk [vmem:[#allocation2 + $0x139] sm:$0xff] %vm85_vm0, %v45_v37  ;;  %191 = vst.msk [vmem:[#allocation2 + $0x141] sm:$0xff] %vm85_vm0, %v46_v38  ;;  %v507_v53 = vld [vmem:[#allocation2 + $0x78] ss:$2 sm:$0xff]  ;;  %v63_v63 = vld [vmem:[%s5975_s0 + $0x150] sm:$0xff] }
  0x22   :  { %663 = vrot.lane.b32.xlu0 %v616_v31, %s4327_s17  ;;  %194 = vst.msk [vmem:[#allocation2 + $0x169] sm:$0xff] %vm85_vm0, %v49_v39  ;;  %195 = vst.msk [vmem:[#allocation2 + $0x171] sm:$0xff] %vm85_vm0, %v50_v41  ;;  %v397_v54 = vld [vmem:[#allocation2 + $0x92] ss:$2 sm:$0xff]  ;;  %v62_v3 = vld [vmem:[%s5975_s0 + $0x148] sm:$0xff] }
  0x23   :  { %776 = vrot.lane.b32.xlu1 %v729_v32, %s4328_s30  ;;  %261 = vst.msk [vmem:[#allocation4] sm:$0xff] %vm85_vm0, %v230_v43  ;;  %200 = vst.msk [vmem:[#allocation2 + $0x1e1] sm:$0xff] %vm85_vm0, %v55_v44  ;;  %v60_v61 = vld [vmem:[%s5975_s0 + $0x138] sm:$0xff]  ;;  %v844_v62 = vld [vmem:[#allocation2 + $0x60] ss:$2 sm:$0xff] }
  0x24   :  { %201 = vst.msk [vmem:[#allocation2 + $0x1e9] sm:$0xff] %vm85_vm0, %v56_v45  ;;  %262 = vst.msk [vmem:[#allocation4 + $0x8] sm:$0xff] %vm85_vm0, %v232_v46  ;;  %v64_v0 = vld [vmem:[%s5975_s0 + $0x158] sm:$0xff]  ;;  %v61_v2 = vld [vmem:[%s5975_s0 + $0x140] sm:$0xff] }
  0x25   :  { %198 = vst.msk [vmem:[#allocation2 + $0x1c9] sm:$0xff] %vm85_vm0, %v53_v47  ;;  %199 = vst.msk [vmem:[#allocation2 + $0x1d1] sm:$0xff] %vm85_vm0, %v54_v48  ;;  %v238_v4 = vld [vmem:[#allocation2 + $0xc0] ss:$2 sm:$0xff]  ;;  %v620_v10 = vld [vmem:[#allocation2 + $0x79] ss:$2 sm:$0xff] }
  0x26   :  { %665 = vrot.lane.b32.xlu0 %v618_v34, %s4327_s17  ;;  %263 = vst.msk [vmem:[#allocation4 + $0x10] sm:$0xff] %vm85_vm0, %v234_v49  ;;  %196 = vst.msk [vmem:[#allocation2 + $0x181] sm:$0xff] %vm85_vm0, %v51_v50  ;;  %v1196_v5 = vld [vmem:[%s5976_s1] sm:$0xff]  ;;  %v1197_v6 = vld [vmem:[%s5976_s1 + $0x8] sm:$0xff] }
  0x27   :  { %442 = vrot.lane.b32.xlu1 %v395_v40, %s4324_s14  ;;  %197 = vst.msk [vmem:[#allocation2 + $0x189] sm:$0xff] %vm85_vm0, %v52_v55  ;;  %202 = vst.msk [vmem:[#allocation2 + $0x1f9] sm:$0xff] %vm85_vm0, %v57_v56  ;;  %v4107_v7 = vpack.c.bf16 %v1197_v6, %v1196_v5  ;;  %v65_v8 = vld [vmem:[%s5975_s0 + $0x160] sm:$0xff]  ;;  %v66_v9 = vld [vmem:[%s5975_s0 + $0x168] sm:$0xff] }
  0x28   :  { %203 = vst.msk [vmem:[#allocation2 + $0x201] sm:$0xff] %vm85_vm0, %v58_v57  ;;  %264 = vst.msk [vmem:[#allocation4 + $0x18] sm:$0xff] %vm85_vm0, %v236_v58  ;;  %v509_v11 = vld [vmem:[#allocation2 + $0xa8] ss:$2 sm:$0xff]  ;;  %v1199_v13 = vld [vmem:[%s5976_s1 + $0x18] sm:$0xff] }
  0x29   :  { %204 = vst.msk [vmem:[#allocation2 + $0x211] sm:$0xff] %vm85_vm0, %v59_v60  ;;  %205 = vst.msk [vmem:[#allocation2 + $0x219] sm:$0xff] %vm85_vm0, %v60_v61  ;;  %4108 = vmatprep.subr.bf16.mxu0 %v4107_v7  ;;  %v1198_v12 = vld [vmem:[%s5976_s1 + $0x10] sm:$0xff]  ;;  %v957_v17 = vld [vmem:[#allocation2 + $0x61] ss:$2 sm:$0xff] }
  0x2a   :  { %331 = vrot.lane.b32.xlu0 %v284_v42, %s4325_s15  ;;  %208 = vst.msk [vmem:[#allocation2 + $0x241] sm:$0xff] %vm85_vm0, %v63_v63  ;;  %209 = vst.msk [vmem:[#allocation2 + $0x249] sm:$0xff] %vm85_vm0, %v64_v0  ;;  %4110 = vmatpush3.bf16.msra.mxu0 %v4107_v7  ;;  %v67_v14 = vld [vmem:[%s5975_s0 + $0x170] sm:$0xff]  ;;  %v4111_v15 = vpack.c.bf16 %v1199_v13, %v1198_v12  ;;  %v68_v19 = vld [vmem:[%s5975_s0 + $0x178] sm:$0xff] }
  0x2b   :  { %889 = vrot.lane.b32.xlu1 %v842_v51, %s4329_s22  ;;  %206 = vst.msk [vmem:[#allocation2 + $0x229] sm:$0xff] %vm85_vm0, %v61_v2  ;;  %207 = vst.msk [vmem:[#allocation2 + $0x231] sm:$0xff] %vm85_vm0, %v62_v3  ;;  %v1068_v16 = vld [vmem:[#allocation2 + $0x32] ss:$2 sm:$0xff] }
  0x2c   :  { %265 = vst.msk [vmem:[#allocation4 + $0x20] sm:$0xff] %vm85_vm0, %v238_v4  ;;  %210 = vst.msk [vmem:[#allocation2 + $0x259] sm:$0xff] %vm85_vm0, %v65_v8  ;;  %v240_v18 = vld [vmem:[#allocation2 + $0xf0] ss:$2 sm:$0xff]  ;;  %4112 = vmatprep.subr.bf16.mxu0 %v4111_v15 }
  0x2d   :  { %211 = vst.msk [vmem:[#allocation2 + $0x261] sm:$0xff] %vm85_vm0, %v66_v9  ;;  %212 = vst.msk [vmem:[#allocation2 + $0x271] sm:$0xff] %vm85_vm0, %v67_v14 }
  0x2e   :  { %778 = vrot.lane.b32.xlu0 %v731_v52, %s4328_s30  ;;  %266 = vst.msk [vmem:[#allocation4 + $0x28] sm:$0xff] %vm85_vm0, %v240_v18  ;;  %4114 = vmatpush3.bf16.msra.mxu0 %v4111_v15  ;;  %213 = vst.msk [vmem:[#allocation2 + $0x279] sm:$0xff] %vm85_vm0, %v68_v19 }
  0x2f   :  { %554 = vrot.lane.b32.xlu1 %v507_v53, %s4326_s16 }
  0x32   :  { %444 = vrot.lane.b32.xlu0 %v397_v54, %s4324_s14 }
  0x33   :  { %1002 = vrot.lane.b32.xlu1 %v955_v59, %s4330_s26 }
  0x36   :  { %891 = vrot.lane.b32.xlu0 %v844_v62, %s4329_s22 }
  0x37   :  { %667 = vrot.lane.b32.xlu1 %v620_v10, %s4327_s17 }
  0x3a   :  { %556 = vrot.lane.b32.xlu0 %v509_v11, %s4326_s16 }
  0x3b   :  { %10 = vsyncpa [#allocation7], 0  ;;  %s4331_s19 = smov 32   ;;  %v1200_v20 = vld [vmem:[%s5976_s1 + $0x20] sm:$0xf]  ;;  %vm1250_vm3 = vcmask 1043456  }
  0x3c   :  { %1115 = vrot.lane.b32.xlu1 %v1068_v16, %s4331_s19  ;;  %v622_v21 = vld [vmem:[#allocation2 + $0xa9] ss:$2 sm:$0xff]  ;;  %3803 = vmatprep.subr.msk.mxu0 %vm1250_vm3, %v1200_v20  ;;  %v72_v24 = vld [vmem:[%s5975_s0 + $0x198] sm:$0xff]  ;;  %v1070_v25 = vld [vmem:[#allocation2 + $0x62] ss:$2 sm:$0xff]  ;;  %vm373_vm4 = vcmask 64544  }
  0x3d   :  { %v286_v22 = vld [vmem:[#allocation2 + $0xc1] ss:$2 sm:$0xff]  ;;  %3804 = vmatpush3.msk.msra.mxu0 %vm1250_vm3, %v1200_v20  ;;  %v71_v23 = vld [vmem:[%s5975_s0 + $0x190] sm:$0xff]  ;;  %217 = vst.msk [vmem:[#allocation2 + $0x2a9] sm:$0xff] %vm85_vm0, %v72_v24  ;;  %v733_v26 = vld [vmem:[#allocation2 + $0x7a] ss:$2 sm:$0xff] }
  0x3e   :  { %1004 = vrot.lane.b32.xlu0 %v957_v17, %s4330_s26  ;;  %216 = vst.msk [vmem:[#allocation2 + $0x2a1] sm:$0xff] %vm85_vm0, %v71_v23  ;;  %v399_v27 = vld [vmem:[#allocation2 + $0xc2] ss:$2 sm:$0xff]  ;;  %v288_v28 = vld [vmem:[#allocation2 + $0xf1] ss:$2 sm:$0xff]  ;;  %vm486_vm5 = vcmask 97344  }
  0x3f   :  { %v69_v29 = vld [vmem:[%s5975_s0 + $0x180] sm:$0xff]  ;;  %v70_v30 = vld [vmem:[%s5975_s0 + $0x188] sm:$0xff]  ;;  %v846_v31 = vld [vmem:[#allocation2 + $0x90] ss:$2 sm:$0xff]  ;;  %vm598_vm6 = vcmask 130144   ;;  %vm711_vm7 = vcmask 162944  }
  0x40   :  { %669 = vrot.lane.b32.xlu1 %v622_v21, %s4327_s17  ;;  %214 = vst.msk [vmem:[#allocation2 + $0x289] sm:$0xff] %vm85_vm0, %v69_v29  ;;  %v735_v32 = vld [vmem:[#allocation2 + $0xaa] ss:$2 sm:$0xff]  ;;  %215 = vst.msk [vmem:[#allocation2 + $0x291] sm:$0xff] %vm85_vm0, %v70_v30  ;;  %v73_v35 = vld [vmem:[%s5975_s0 + $0x1a0] sm:$0xff]  ;;  %vm824_vm8 = vcmask 195744  }
  0x41   :  { %v511_v33 = vld [vmem:[#allocation2 + $0xd8] ss:$2 sm:$0xff]  ;;  %v74_v36 = vld [vmem:[%s5975_s0 + $0x1a8] sm:$0xff]  ;;  %218 = vst.msk [vmem:[#allocation2 + $0x2b9] sm:$0xff] %vm85_vm0, %v73_v35  ;;  %v959_v37 = vld [vmem:[#allocation2 + $0x91] ss:$2 sm:$0xff] }
  0x42   :  { %333 = vrot.lane.b32.xlu0 %v286_v22, %s4325_s15  ;;  %v401_v34 = vld [vmem:[#allocation2 + $0xf2] ss:$2 sm:$0xff]  ;;  %219 = vst.msk [vmem:[#allocation2 + $0x2c1] sm:$0xff] %vm85_vm0, %v74_v36  ;;  %v624_v40 = vld [vmem:[#allocation2 + $0xd9] ss:$2 sm:$0xff]  ;;  %v78_v56 = vld [vmem:[%s5975_s0 + $0x1c8] sm:$0xff] }
  0x43   :  { %v848_v38 = vld [vmem:[#allocation2 + $0xc0] ss:$2 sm:$0xff]  ;;  %v75_v42 = vld [vmem:[%s5975_s0 + $0x1b0] sm:$0xff]  ;;  %v76_v43 = vld [vmem:[%s5975_s0 + $0x1b8] sm:$0xff]  ;;  %223 = vst.msk [vmem:[#allocation2 + $0x2f1] sm:$0xff] %vm85_vm0, %v78_v56  ;;  %vm937_vm9 = vcmask 228544  }
  0x44   :  { %1117 = vrot.lane.b32.xlu1 %v1070_v25, %s4331_s19  ;;  %v242_v39 = vld [vmem:[#allocation2 + $0x120] ss:$2 sm:$0xff]  ;;  %220 = vst.msk [vmem:[#allocation2 + $0x2d1] sm:$0xff] %vm85_vm0, %v75_v42  ;;  %v961_v45 = vld [vmem:[#allocation2 + $0xc1] ss:$2 sm:$0xff]  ;;  %221 = vst.msk [vmem:[#allocation2 + $0x2d9] sm:$0xff] %vm85_vm0, %v76_v43 }
  0x45   :  { %267 = vst.msk [vmem:[#allocation4 + $0x30] sm:$0xff] %vm85_vm0, %v242_v39  ;;  %v513_v41 = vld [vmem:[#allocation2 + $0x108] ss:$2 sm:$0xff]  ;;  %v626_v47 = vld [vmem:[#allocation2 + $0x109] ss:$2 sm:$0xff]  ;;  %v80_v50 = vld [vmem:[%s5975_s0 + $0x1d8] sm:$0xff] }
  0x46   :  { %780 = vrot.lane.b32.xlu0 %v733_v26, %s4328_s30  ;;  %v1072_v44 = vld [vmem:[#allocation2 + $0x92] ss:$2 sm:$0xff]  ;;  %v290_v48 = vld [vmem:[#allocation2 + $0x121] ss:$2 sm:$0xff]  ;;  %225 = vst.msk [vmem:[#allocation2 + $0x309] sm:$0xff] %vm85_vm0, %v80_v50  ;;  %vm1050_vm10 = vcmask 261344  }
  0x47   :  { %v244_v46 = vld [vmem:[#allocation2 + $0x150] ss:$2 sm:$0xff]  ;;  %v292_v54 = vld [vmem:[#allocation2 + $0x151] ss:$2 sm:$0xff]  ;;  %v77_v55 = vld [vmem:[%s5975_s0 + $0x1c0] sm:$0xff]  ;;  %vm1163_vm11 = vcmask 294144  }
  0x48   :  { %446 = vrot.lane.b32.xlu1 %v399_v27, %s4324_s14  ;;  %268 = vst.msk [vmem:[#allocation4 + $0x38] sm:$0xff] %vm85_vm0, %v244_v46  ;;  %v79_v49 = vld [vmem:[%s5975_s0 + $0x1d0] sm:$0xff]  ;;  %v737_v52 = vld [vmem:[#allocation2 + $0xda] ss:$2 sm:$0xff]  ;;  %222 = vst.msk [vmem:[#allocation2 + $0x2e9] sm:$0xff] %vm85_vm0, %v77_v55  ;;  %vm1201_vm12 = vcmask 293888  }
  0x49   :  { %224 = vst.msk [vmem:[#allocation2 + $0x301] sm:$0xff] %vm85_vm0, %v79_v49  ;;  %v1074_v51 = vld [vmem:[#allocation2 + $0xc2] ss:$2 sm:$0xff]  ;;  %v405_v60 = vld [vmem:[#allocation2 + $0x152] ss:$2 sm:$0xff]  ;;  %vm4333_vm13 = vmmov 0  }
  0x4a   :  { %335 = vrot.lane.b32.xlu0 %v288_v28, %s4325_s15  ;;  %v403_v53 = vld [vmem:[#allocation2 + $0x122] ss:$2 sm:$0xff]  ;;  %v963_v63 = vld [vmem:[#allocation2 + $0xf1] ss:$2 sm:$0xff]  ;;  %v1076_v5 = vld [vmem:[#allocation2 + $0xf2] ss:$2 sm:$0xff]  ;;  %3861 = vmatprep.mubr.msk.f32.mxu1 %vm4333_vm13, %v4323_v1 }
  0x4b   :  { %v850_v57 = vld [vmem:[#allocation2 + $0xf0] ss:$2 sm:$0xff]  ;;  %v81_v61 = vld [vmem:[%s5975_s0 + $0x1e0] sm:$0xff]  ;;  %v82_v62 = vld [vmem:[%s5975_s0 + $0x1e8] sm:$0xff]  ;;  %vm1640_vm14 = vcmask 64512   ;;  %vm1642_vm15 = vcmask 58368  }
  0x4c   :  { %893 = vrot.lane.b32.xlu1 %v846_v31, %s4329_s22  ;;  %v739_v58 = vld [vmem:[#allocation2 + $0x10a] ss:$2 sm:$0xff]  ;;  %226 = vst.msk [vmem:[#allocation2 + $0x319] sm:$0xff] %vm85_vm0, %v81_v61  ;;  %227 = vst.msk [vmem:[#allocation2 + $0x321] sm:$0xff] %vm85_vm0, %v82_v62  ;;  %v628_v3 = vld [vmem:[#allocation2 + $0x139] ss:$2 sm:$0xff] }
  0x4d   :  { %v515_v59 = vld [vmem:[#allocation2 + $0x138] ss:$2 sm:$0xff]  ;;  %v517_v4 = vld [vmem:[#allocation2 + $0x168] ss:$2 sm:$0xff]  ;;  %v965_v6 = vld [vmem:[#allocation2 + $0x121] ss:$2 sm:$0xff] }
  0x4e   :  { %782 = vrot.lane.b32.xlu0 %v735_v32, %s4328_s30  ;;  %v852_v0 = vld [vmem:[#allocation2 + $0x120] ss:$2 sm:$0xff]  ;;  %v246_v2 = vld [vmem:[#allocation2 + $0x1b0] ss:$2 sm:$0xff]  ;;  %v630_v8 = vld [vmem:[#allocation2 + $0x169] ss:$2 sm:$0xff] }
  0x4f   :  { %269 = vst.msk [vmem:[#allocation4 + $0x40] sm:$0xff] %vm85_vm0, %v246_v2  ;;  %v248_v7 = vld [vmem:[#allocation2 + $0x1e0] ss:$2 sm:$0xff]  ;;  %v294_v9 = vld [vmem:[#allocation2 + $0x1b1] ss:$2 sm:$0xff]  ;;  %vm1652_vm1 = vcmask 57344  }
  0x50   :  { %558 = vrot.lane.b32.xlu1 %v511_v33, %s4326_s16  ;;  %270 = vst.msk [vmem:[#allocation4 + $0x48] sm:$0xff] %vm85_vm0, %v248_v7  ;;  %v83_v10 = vld [vmem:[%s5975_s0 + $0x1f0] sm:$0xff]  ;;  %v84_v11 = vld [vmem:[%s5975_s0 + $0x1f8] sm:$0xff]  ;;  %v296_v15 = vld [vmem:[#allocation2 + $0x1e1] ss:$2 sm:$0xff]  ;;  %vm1813_vm2 = vcmask 130112  }
  0x51   :  { %v1078_v12 = vld [vmem:[#allocation2 + $0x122] ss:$2 sm:$0xff]  ;;  %228 = vst.msk [vmem:[#allocation2 + $0x331] sm:$0xff] %vm85_vm0, %v83_v10  ;;  %229 = vst.msk [vmem:[#allocation2 + $0x339] sm:$0xff] %vm85_vm0, %v84_v11  ;;  %v407_v14 = vld [vmem:[#allocation2 + $0x1b2] ss:$2 sm:$0xff] }
  0x52   :  { %448 = vrot.lane.b32.xlu0 %v401_v34, %s4324_s14  ;;  %v741_v13 = vld [vmem:[#allocation2 + $0x13a] ss:$2 sm:$0xff]  ;;  %v743_v19 = vld [vmem:[#allocation2 + $0x16a] ss:$2 sm:$0xff]  ;;  %v967_v26 = vld [vmem:[#allocation2 + $0x151] ss:$2 sm:$0xff] }
  0x53   :  { %v854_v18 = vld [vmem:[#allocation2 + $0x150] ss:$2 sm:$0xff]  ;;  %v856_v27 = vld [vmem:[#allocation2 + $0x180] ss:$2 sm:$0xff]  ;;  %v632_v31 = vld [vmem:[#allocation2 + $0x1c9] ss:$2 sm:$0xff] }
  0x54   :  { %1006 = vrot.lane.b32.xlu1 %v959_v37, %s4330_s26  ;;  %v519_v22 = vld [vmem:[#allocation2 + $0x1c8] ss:$2 sm:$0xff]  ;;  %v521_v32 = vld [vmem:[#allocation2 + $0x1f8] ss:$2 sm:$0xff]  ;;  %v969_v36 = vld [vmem:[#allocation2 + $0x181] ss:$2 sm:$0xff] }
  0x55   :  { %v409_v23 = vld [vmem:[#allocation2 + $0x1e2] ss:$2 sm:$0xff]  ;;  %v1080_v35 = vld [vmem:[#allocation2 + $0x152] ss:$2 sm:$0xff]  ;;  %v300_v49 = vld [vmem:[#allocation2 + $0x241] ss:$2 sm:$0xff] }
  0x56   :  { %895 = vrot.lane.b32.xlu0 %v848_v38, %s4329_s22  ;;  %v250_v28 = vld [vmem:[#allocation2 + $0x210] ss:$2 sm:$0xff]  ;;  %v252_v37 = vld [vmem:[#allocation2 + $0x240] ss:$2 sm:$0xff]  ;;  %v636_v2 = vld [vmem:[#allocation2 + $0x229] ss:$2 sm:$0xff] }
  0x57   :  { %271 = vst.msk [vmem:[#allocation4 + $0x50] sm:$0xff] %vm85_vm0, %v250_v28  ;;  %272 = vst.msk [vmem:[#allocation4 + $0x58] sm:$0xff] %vm85_vm0, %v252_v37  ;;  %v523_v56 = vld [vmem:[#allocation2 + $0x228] ss:$2 sm:$0xff]  ;;  %s4338_s21 = smov 40  }
  0x58   :  { %671 = vrot.lane.b32.xlu1 %v624_v40, %s4327_s17  ;;  %v634_v40 = vld [vmem:[#allocation2 + $0x1f9] ss:$2 sm:$0xff]  ;;  %v860_v61 = vld [vmem:[#allocation2 + $0x210] ss:$2 sm:$0xff]  ;;  %1641 = vst.msk [vmem:[#allocation3] sm:$0xff] %vm1640_vm14, %v4323_v1  ;;  %1644 = vst.msk [vmem:[#allocation3 + $0xa0] sm:$0xff] %vm1640_vm14, %v4323_v1 }
  0x59   :  { %v254_v62 = vld [vmem:[#allocation2 + $0x270] ss:$2 sm:$0xff]  ;;  %1643 = vst.msk [vmem:[#allocation3 + $0x8] sm:$0x3] %vm1642_vm15, %v4323_v1  ;;  %1645 = vst.msk [vmem:[#allocation3 + $0xa8] sm:$0x3] %vm1642_vm15, %v4323_v1 }
  0x5a   :  { %560 = vrot.lane.b32.xlu0 %v513_v41, %s4326_s16  ;;  %v298_v41 = vld [vmem:[#allocation2 + $0x211] ss:$2 sm:$0xff]  ;;  %273 = vst.msk [vmem:[#allocation4 + $0x60] sm:$0xff] %vm85_vm0, %v254_v62  ;;  %v1084_v7 = vld [vmem:[#allocation2 + $0x1e2] ss:$2 sm:$0xff] }
  0x5b   :  { %v866_v62 = vld [vmem:[#allocation2 + $0x2a0] ss:$2 sm:$0xff]  ;;  %1647 = vst.msk [vmem:[#allocation3 + $0x90] sm:$0xff] %vm1640_vm14, %v4323_v1  ;;  %1649 = vst.msk [vmem:[#allocation3 + $0x130] sm:$0xff] %vm1640_vm14, %v4323_v1 }
  0x5c   :  { %1119 = vrot.lane.b32.xlu1 %v1072_v44, %s4331_s19  ;;  %v1082_v44 = vld [vmem:[#allocation2 + $0x182] ss:$2 sm:$0xff]  ;;  %1648 = vst.msk [vmem:[#allocation3 + $0x98] sm:$0x3] %vm1642_vm15, %v4323_v1  ;;  %1650 = vst.msk [vmem:[#allocation3 + $0x138] sm:$0x3] %vm1642_vm15, %v4323_v1 }
  0x5d   :  { %1653 = vst.msk [vmem:[#allocation3 + $0x10] sm:$0x1] %vm1652_vm1, %v4323_v1  ;;  %1654 = vst.msk [vmem:[#allocation3 + $0x20] sm:$0x1] %vm1652_vm1, %v4323_v1 }
  0x5e   :  { %1008 = vrot.lane.b32.xlu0 %v961_v45, %s4330_s26  ;;  %v745_v45 = vld [vmem:[#allocation2 + $0x1ca] ss:$2 sm:$0xff]  ;;  %1655 = vst.msk [vmem:[#allocation3 + $0x30] sm:$0x1] %vm1652_vm1, %v4323_v1  ;;  %1656 = vst.msk [vmem:[#allocation3 + $0x40] sm:$0x1] %vm1652_vm1, %v4323_v1 }
  0x5f   :  { %1657 = vst.msk [vmem:[#allocation3 + $0x50] sm:$0x1] %vm1652_vm1, %v4323_v1  ;;  %1658 = vst.msk [vmem:[#allocation3 + $0x60] sm:$0x1] %vm1652_vm1, %v4323_v1 }
  0x60   :  { %673 = vrot.lane.b32.xlu1 %v626_v47, %s4327_s17  ;;  %1659 = vst.msk [vmem:[#allocation3 + $0x70] sm:$0x1] %vm1652_vm1, %v4323_v1  ;;  %1660 = vst.msk [vmem:[#allocation3 + $0x80] sm:$0x1] %vm1652_vm1, %v4323_v1 }
  0x61   :  { %1661 = vst.msk [vmem:[#allocation3 + $0xb0] sm:$0x1] %vm1652_vm1, %v4323_v1  ;;  %1662 = vst.msk [vmem:[#allocation3 + $0xc0] sm:$0x1] %vm1652_vm1, %v4323_v1 }
  0x62   :  { %337 = vrot.lane.b32.xlu0 %v290_v48, %s4325_s15  ;;  %v411_v48 = vld [vmem:[#allocation2 + $0x212] ss:$2 sm:$0xff]  ;;  %1663 = vst.msk [vmem:[#allocation3 + $0xd0] sm:$0x1] %vm1652_vm1, %v4323_v1  ;;  %1664 = vst.msk [vmem:[#allocation3 + $0xe0] sm:$0x1] %vm1652_vm1, %v4323_v1 }
  0x63   :  { %1665 = vst.msk [vmem:[#allocation3 + $0xf0] sm:$0x1] %vm1652_vm1, %v4323_v1  ;;  %1666 = vst.msk [vmem:[#allocation3 + $0x100] sm:$0x1] %vm1652_vm1, %v4323_v1 }
  0x64   :  { %1121 = vrot.lane.b32.xlu1 %v1074_v51, %s4331_s19  ;;  %1667 = vst.msk [vmem:[#allocation3 + $0x110] sm:$0x1] %vm1652_vm1, %v4323_v1  ;;  %1668 = vst.msk [vmem:[#allocation3 + $0x120] sm:$0x1] %vm1652_vm1, %v4323_v1 }
  0x65   :  { %1669 = vst.msk [vmem:[#allocation3 + $0x19] sm:$0x1] %vm1652_vm1, %v4323_v1  ;;  %1670 = vst.msk [vmem:[#allocation3 + $0x29] sm:$0x1] %vm1652_vm1, %v4323_v1 }
  0x66   :  { %784 = vrot.lane.b32.xlu0 %v737_v52, %s4328_s30  ;;  %v858_v52 = vld [vmem:[#allocation2 + $0x1e0] ss:$2 sm:$0xff]  ;;  %1671 = vst.msk [vmem:[#allocation3 + $0x39] sm:$0x1] %vm1652_vm1, %v4323_v1  ;;  %1672 = vst.msk [vmem:[#allocation3 + $0x49] sm:$0x1] %vm1652_vm1, %v4323_v1 }
  0x67   :  { %1673 = vst.msk [vmem:[#allocation3 + $0x59] sm:$0x1] %vm1652_vm1, %v4323_v1  ;;  %1674 = vst.msk [vmem:[#allocation3 + $0x69] sm:$0x1] %vm1652_vm1, %v4323_v1 }
  0x68   :  { %450 = vrot.lane.b32.xlu1 %v403_v53, %s4324_s14  ;;  %v747_v53 = vld [vmem:[#allocation2 + $0x1fa] ss:$2 sm:$0xff]  ;;  %1675 = vst.msk [vmem:[#allocation3 + $0x79] sm:$0x1] %vm1652_vm1, %v4323_v1  ;;  %1676 = vst.msk [vmem:[#allocation3 + $0x89] sm:$0x1] %vm1652_vm1, %v4323_v1 }
  0x69   :  { %1677 = vst.msk [vmem:[#allocation3 + $0xb9] sm:$0x1] %vm1652_vm1, %v4323_v1  ;;  %1678 = vst.msk [vmem:[#allocation3 + $0xc9] sm:$0x1] %vm1652_vm1, %v4323_v1 }
  0x6a   :  { %339 = vrot.lane.b32.xlu0 %v292_v54, %s4325_s15  ;;  %1679 = vst.msk [vmem:[#allocation3 + $0xd9] sm:$0x1] %vm1652_vm1, %v4323_v1  ;;  %1680 = vst.msk [vmem:[#allocation3 + $0xe9] sm:$0x1] %vm1652_vm1, %v4323_v1 }
  0x6b   :  { %1681 = vst.msk [vmem:[#allocation3 + $0xf9] sm:$0x1] %vm1652_vm1, %v4323_v1  ;;  %1682 = vst.msk [vmem:[#allocation3 + $0x109] sm:$0x1] %vm1652_vm1, %v4323_v1 }
  0x6c   :  { %897 = vrot.lane.b32.xlu1 %v850_v57, %s4329_s22  ;;  %v413_v57 = vld [vmem:[#allocation2 + $0x242] ss:$2 sm:$0xff]  ;;  %1683 = vst.msk [vmem:[#allocation3 + $0x119] sm:$0x1] %vm1652_vm1, %v4323_v1  ;;  %1684 = vst.msk [vmem:[#allocation3 + $0x129] sm:$0x1] %vm1652_vm1, %v4323_v1 }
  0x6e   :  { %786 = vrot.lane.b32.xlu0 %v739_v58, %s4328_s30 }
  0x70   :  { %562 = vrot.lane.b32.xlu1 %v515_v59, %s4326_s16 }
  0x72   :  { %452 = vrot.lane.b32.xlu0 %v405_v60, %s4324_s14  ;;  %v971_v60 = vld [vmem:[#allocation2 + $0x1e1] ss:$2 sm:$0xff] }
  0x74   :  { %1010 = vrot.lane.b32.xlu1 %v963_v63, %s4330_s26 }
  0x76   :  { %899 = vrot.lane.b32.xlu0 %v852_v0, %s4329_s22 }
  0x78   :  { %675 = vrot.lane.b32.xlu1 %v628_v3, %s4327_s17  ;;  %v525_v3 = vld [vmem:[#allocation2 + $0x258] ss:$2 sm:$0xff] }
  0x7a   :  { %564 = vrot.lane.b32.xlu0 %v517_v4, %s4326_s16 }
  0x7c   :  { %1123 = vrot.lane.b32.xlu1 %v1076_v5, %s4331_s19 }
  0x7e   :  { %1012 = vrot.lane.b32.xlu0 %v965_v6, %s4330_s26 }
  0x7f   :  { %v439_v16 = vpop.permute.xlu1 %438 }
  0x80   :  { %677 = vrot.lane.b32.xlu1 %v630_v8, %s4327_s17  ;;  %v326_v17 = vpop.permute.xlu0 %325  ;;  %v973_v8 = vld [vmem:[#allocation2 + $0x211] ss:$2 sm:$0xff] }
  0x81   :  { %374 = vst.msk [vmem:[#allocation4] sm:$0xff] %vm373_vm4, %v326_v17  ;;  %v1086_v17 = vld [vmem:[#allocation2 + $0x212] ss:$2 sm:$0xff] }
  0x82   :  { %341 = vrot.lane.b32.xlu0 %v294_v9, %s4325_s15  ;;  %487 = vst.msk [vmem:[#allocation4] sm:$0xff] %vm486_vm5, %v439_v16  ;;  %v256_v9 = vld [vmem:[#allocation2 + $0x2a0] ss:$2 sm:$0xff] }
  0x83   :  { %v441_v20 = vpop.permute.xlu1 %440  ;;  %274 = vst.msk [vmem:[#allocation4 + $0x68] sm:$0xff] %vm85_vm0, %v256_v9 }
  0x84   :  { %1125 = vrot.lane.b32.xlu1 %v1078_v12, %s4331_s19  ;;  %v328_v21 = vpop.permute.xlu0 %327  ;;  %v638_v12 = vld [vmem:[#allocation2 + $0x259] ss:$2 sm:$0xff] }
  0x85   :  { %375 = vst.msk [vmem:[#allocation4 + $0x8] sm:$0xff] %vm373_vm4, %v328_v21  ;;  %v415_v21 = vld [vmem:[#allocation2 + $0x272] ss:$2 sm:$0xff] }
  0x86   :  { %788 = vrot.lane.b32.xlu0 %v741_v13, %s4328_s30  ;;  %488 = vst.msk [vmem:[#allocation4 + $0x8] sm:$0xff] %vm486_vm5, %v441_v20  ;;  %v302_v13 = vld [vmem:[#allocation2 + $0x271] ss:$2 sm:$0xff] }
  0x87   :  { %v553_v24 = vpop.permute.xlu1 %552 }
  0x88   :  { %454 = vrot.lane.b32.xlu1 %v407_v14, %s4324_s14  ;;  %600 = vst.msk [vmem:[#allocation4 + $0x8] sm:$0xff] %vm598_vm6, %v553_v24 }
  0x8a   :  { %343 = vrot.lane.b32.xlu0 %v296_v15, %s4325_s15 }
  0x8c   :  { %901 = vrot.lane.b32.xlu1 %v854_v18, %s4329_s22  ;;  %v749_v18 = vld [vmem:[#allocation2 + $0x22a] ss:$2 sm:$0xff] }
  0x8e   :  { %790 = vrot.lane.b32.xlu0 %v743_v19, %s4328_s30 }
  0x90   :  { %v551_v25 = vpop.permute.xlu0 %550  ;;  %566 = vrot.lane.b32.xlu1 %v519_v22, %s4326_s16  ;;  %v304_v22 = vld [vmem:[#allocation2 + $0x2a1] ss:$2 sm:$0xff] }
  0x91   :  { %599 = vst.msk [vmem:[#allocation4] sm:$0xff] %vm598_vm6, %v551_v25  ;;  %v330_v29 = vpop.permute.xlu1 %329  ;;  %v862_v25 = vld [vmem:[#allocation2 + $0x240] ss:$2 sm:$0xff] }
  0x92   :  { %456 = vrot.lane.b32.xlu0 %v409_v23, %s4324_s14  ;;  %376 = vst.msk [vmem:[#allocation4 + $0x10] sm:$0xff] %vm373_vm4, %v330_v29  ;;  %v527_v29 = vld [vmem:[#allocation2 + $0x288] ss:$2 sm:$0xff] }
  0x94   :  { %v664_v30 = vpop.permute.xlu0 %663  ;;  %1014 = vrot.lane.b32.xlu1 %v967_v26, %s4330_s26  ;;  %v751_v26 = vld [vmem:[#allocation2 + $0x25a] ss:$2 sm:$0xff] }
  0x95   :  { %712 = vst.msk [vmem:[#allocation4] sm:$0xff] %vm711_vm7, %v664_v30  ;;  %v777_v33 = vpop.permute.xlu1 %776  ;;  %v417_v30 = vld [vmem:[#allocation2 + $0x2a2] ss:$2 sm:$0xff] }
  0x96   :  { %903 = vrot.lane.b32.xlu0 %v856_v27, %s4329_s22  ;;  %825 = vst.msk [vmem:[#allocation4] sm:$0xff] %vm824_vm8, %v777_v33  ;;  %v975_v33 = vld [vmem:[#allocation2 + $0x241] ss:$2 sm:$0xff] }
  0x98   :  { %v666_v34 = vpop.permute.xlu0 %665  ;;  %679 = vrot.lane.b32.xlu1 %v632_v31, %s4327_s17 }
  0x99   :  { %713 = vst.msk [vmem:[#allocation4 + $0x8] sm:$0xff] %vm711_vm7, %v666_v34  ;;  %v443_v38 = vpop.permute.xlu1 %442  ;;  %v864_v34 = vld [vmem:[#allocation2 + $0x270] ss:$2 sm:$0xff] }
  0x9a   :  { %568 = vrot.lane.b32.xlu0 %v521_v32, %s4326_s16  ;;  %489 = vst.msk [vmem:[#allocation4 + $0x10] sm:$0xff] %vm486_vm5, %v443_v38  ;;  %v640_v38 = vld [vmem:[#allocation2 + $0x289] ss:$2 sm:$0xff] }
  0x9c   :  { %v332_v39 = vpop.permute.xlu0 %331  ;;  %1127 = vrot.lane.b32.xlu1 %v1080_v35, %s4331_s19  ;;  %v258_v35 = vld [vmem:[#allocation2 + $0x2d0] ss:$2 sm:$0xff] }
  0x9d   :  { %377 = vst.msk [vmem:[#allocation4 + $0x18] sm:$0xff] %vm373_vm4, %v332_v39  ;;  %v890_v42 = vpop.permute.xlu1 %889  ;;  %v529_v39 = vld [vmem:[#allocation2 + $0x2b8] ss:$2 sm:$0xff] }
  0x9e   :  { %1016 = vrot.lane.b32.xlu0 %v969_v36, %s4330_s26  ;;  %938 = vst.msk [vmem:[#allocation4] sm:$0xff] %vm937_vm9, %v890_v42 }
  0x9f   :  { %275 = vst.msk [vmem:[#allocation4 + $0x70] sm:$0xff] %vm85_vm0, %v258_v35 }
  0xa0   :  { %v779_v43 = vpop.permute.xlu0 %778  ;;  %681 = vrot.lane.b32.xlu1 %v634_v40, %s4327_s17 }
  0xa1   :  { %826 = vst.msk [vmem:[#allocation4 + $0x8] sm:$0xff] %vm824_vm8, %v779_v43  ;;  %v555_v46 = vpop.permute.xlu1 %554  ;;  %v260_v43 = vld [vmem:[#allocation2 + $0x300] ss:$2 sm:$0xff] }
  0xa2   :  { %345 = vrot.lane.b32.xlu0 %v298_v41, %s4325_s15  ;;  %601 = vst.msk [vmem:[#allocation4 + $0x10] sm:$0xff] %vm598_vm6, %v555_v46 }
  0xa3   :  { %276 = vst.msk [vmem:[#allocation4 + $0x78] sm:$0xff] %vm85_vm0, %v260_v43 }
  0xa4   :  { %v445_v47 = vpop.permute.xlu0 %444  ;;  %1129 = vrot.lane.b32.xlu1 %v1082_v44, %s4331_s19  ;;  %v1088_v44 = vld [vmem:[#allocation2 + $0x242] ss:$2 sm:$0xff] }
  0xa5   :  { %490 = vst.msk [vmem:[#allocation4 + $0x18] sm:$0xff] %vm486_vm5, %v445_v47  ;;  %v1003_v50 = vpop.permute.xlu1 %1002 }
  0xa6   :  { %792 = vrot.lane.b32.xlu0 %v745_v45, %s4328_s30  ;;  %1051 = vst.msk [vmem:[#allocation4] sm:$0xff] %vm1050_vm10, %v1003_v50  ;;  %v977_v45 = vld [vmem:[#allocation2 + $0x271] ss:$2 sm:$0xff] }
  0xa8   :  { %v892_v51 = vpop.permute.xlu0 %891  ;;  %458 = vrot.lane.b32.xlu1 %v411_v48, %s4324_s14  ;;  %v642_v48 = vld [vmem:[#allocation2 + $0x2b9] ss:$2 sm:$0xff] }
  0xa9   :  { %939 = vst.msk [vmem:[#allocation4 + $0x8] sm:$0xff] %vm937_vm9, %v892_v51  ;;  %v668_v54 = vpop.permute.xlu1 %667 }
  0xaa   :  { %347 = vrot.lane.b32.xlu0 %v300_v49, %s4325_s15  ;;  %714 = vst.msk [vmem:[#allocation4 + $0x10] sm:$0xff] %vm711_vm7, %v668_v54  ;;  %v306_v49 = vld [vmem:[#allocation2 + $0x2d1] ss:$2 sm:$0xff]  ;;  %v753_v54 = vld [vmem:[#allocation2 + $0x28a] ss:$2 sm:$0xff] }
  0xac   :  { %v557_v55 = vpop.permute.xlu0 %556  ;;  %905 = vrot.lane.b32.xlu1 %v858_v52, %s4329_s22 }
  0xad   :  { %602 = vst.msk [vmem:[#allocation4 + $0x18] sm:$0xff] %vm598_vm6, %v557_v55 }
  0xae   :  { %794 = vrot.lane.b32.xlu0 %v747_v53, %s4328_s30  ;;  %v1116_v58 = vpop.permute.xlu1 %1115  ;;  %v1090_v53 = vld [vmem:[#allocation2 + $0x272] ss:$2 sm:$0xff] }
  0xaf   :  { %1164 = vst.msk [vmem:[#allocation4] sm:$0xff] %vm1163_vm11, %v1116_v58  ;;  %v419_v58 = vld [vmem:[#allocation2 + $0x2d2] ss:$2 sm:$0xff] }
  0xb0   :  { %v1005_v59 = vpop.permute.xlu0 %1004  ;;  %570 = vrot.lane.b32.xlu1 %v523_v56, %s4326_s16 }
  0xb1   :  { %1052 = vst.msk [vmem:[#allocation4 + $0x8] sm:$0xff] %vm1050_vm10, %v1005_v59 }
  0xb2   :  { %460 = vrot.lane.b32.xlu0 %v413_v57, %s4324_s14  ;;  %v670_v63 = vpop.permute.xlu1 %669  ;;  %v308_v57 = vld [vmem:[#allocation2 + $0x301] ss:$2 sm:$0xff] }
  0xb3   :  { %715 = vst.msk [vmem:[#allocation4 + $0x18] sm:$0xff] %vm711_vm7, %v670_v63 }
  0xb4   :  { %v334_v0 = vpop.permute.xlu0 %333  ;;  %1018 = vrot.lane.b32.xlu1 %v971_v60, %s4330_s26 }
  0xb5   :  { %378 = vst.msk [vmem:[#allocation4 + $0x20] sm:$0xff] %vm373_vm4, %v334_v0 }
  0xb6   :  { %907 = vrot.lane.b32.xlu0 %v860_v61, %s4329_s22  ;;  %v1118_v4 = vpop.permute.xlu1 %1117  ;;  %v1180_v6 = vld [vmem:[#allocation4] sm:$0xff] }
  0xb7   :  { %1165 = vst.msk [vmem:[#allocation4 + $0x8] sm:$0xff] %vm1163_vm11, %v1118_v4  ;;  %3805 = vmatprep.mubr.msk.f32.mxu0 %vm1201_vm12, %v1180_v6  ;;  %v755_v61 = vld [vmem:[#allocation2 + $0x2ba] ss:$2 sm:$0xff] }
  0xb8   :  { %v781_v5 = vpop.permute.xlu0 %780  ;;  %683 = vrot.lane.b32.xlu1 %v636_v2, %s4327_s17  ;;  %v421_v2 = vld [vmem:[#allocation2 + $0x302] ss:$2 sm:$0xff] }
  0xb9   :  { %827 = vst.msk [vmem:[#allocation4 + $0x10] sm:$0xff] %vm824_vm8, %v781_v5  ;;  %v868_v6 = vld [vmem:[#allocation2 + $0x2d0] ss:$2 sm:$0xff] }
  0xba   :  { %572 = vrot.lane.b32.xlu0 %v525_v3, %s4326_s16  ;;  %v447_v10 = vpop.permute.xlu1 %446  ;;  %v531_v3 = vld [vmem:[#allocation2 + $0x2e8] ss:$2 sm:$0xff] }
  0xbb   :  { %491 = vst.msk [vmem:[#allocation4 + $0x20] sm:$0xff] %vm486_vm5, %v447_v10  ;;  %v533_v10 = vld [vmem:[#allocation2 + $0x318] ss:$2 sm:$0xff] }
  0xbc   :  { %v336_v11 = vpop.permute.xlu0 %335  ;;  %1131 = vrot.lane.b32.xlu1 %v1084_v7, %s4331_s19  ;;  %v979_v7 = vld [vmem:[#allocation2 + $0x2a1] ss:$2 sm:$0xff] }
  0xbd   :  { %379 = vst.msk [vmem:[#allocation4 + $0x28] sm:$0xff] %vm373_vm4, %v336_v11  ;;  %v644_v11 = vld [vmem:[#allocation2 + $0x2e9] ss:$2 sm:$0xff] }
  0xbe   :  { %1020 = vrot.lane.b32.xlu0 %v973_v8, %s4330_s26  ;;  %v894_v14 = vpop.permute.xlu1 %893  ;;  %v1181_v16 = vld [vmem:[#allocation4 + $0x8] sm:$0xff] }
  0xbf   :  { %940 = vst.msk [vmem:[#allocation4 + $0x10] sm:$0xff] %vm937_vm9, %v894_v14  ;;  %3806 = vmatmul.mubr.msk.f32.vlgmr.msra.gmra.mrb[0].mxu0 %vm1201_vm12, %v1181_v16  ;;  %v1092_v16 = vld [vmem:[#allocation2 + $0x2a2] ss:$2 sm:$0xff] }
  0xc0   :  { %v783_v15 = vpop.permute.xlu0 %782  ;;  %685 = vrot.lane.b32.xlu1 %v638_v12, %s4327_s17 }
  0xc1   :  { %828 = vst.msk [vmem:[#allocation4 + $0x18] sm:$0xff] %vm824_vm8, %v783_v15  ;;  %v981_v15 = vld [vmem:[#allocation2 + $0x2d1] ss:$2 sm:$0xff] }
  0xc2   :  { %349 = vrot.lane.b32.xlu0 %v302_v13, %s4325_s15  ;;  %v559_v19 = vpop.permute.xlu1 %558 }
  0xc3   :  { %603 = vst.msk [vmem:[#allocation4 + $0x20] sm:$0xff] %vm598_vm6, %v559_v19  ;;  %v646_v19 = vld [vmem:[#allocation2 + $0x319] ss:$2 sm:$0xff] }
  0xc4   :  { %v449_v20 = vpop.permute.xlu0 %448  ;;  %1133 = vrot.lane.b32.xlu1 %v1086_v17, %s4331_s19 }
  0xc5   :  { %492 = vst.msk [vmem:[#allocation4 + $0x28] sm:$0xff] %vm486_vm5, %v449_v20  ;;  %v757_v20 = vld [vmem:[#allocation2 + $0x2ea] ss:$2 sm:$0xff] }
  0xc6   :  { %796 = vrot.lane.b32.xlu0 %v749_v18, %s4328_s30  ;;  %v1007_v23 = vpop.permute.xlu1 %1006 }
  0xc7   :  { %1053 = vst.msk [vmem:[#allocation4 + $0x10] sm:$0xff] %vm1050_vm10, %v1007_v23 }
  0xc8   :  { %v896_v24 = vpop.permute.xlu0 %895  ;;  %462 = vrot.lane.b32.xlu1 %v415_v21, %s4324_s14 }
  0xc9   :  { %941 = vst.msk [vmem:[#allocation4 + $0x18] sm:$0xff] %vm937_vm9, %v896_v24  ;;  %v1094_v24 = vld [vmem:[#allocation2 + $0x2d2] ss:$2 sm:$0xff] }
  0xca   :  { %351 = vrot.lane.b32.xlu0 %v304_v22, %s4325_s15  ;;  %v672_v27 = vpop.permute.xlu1 %671 }
  0xcb   :  { %716 = vst.msk [vmem:[#allocation4 + $0x20] sm:$0xff] %vm711_vm7, %v672_v27 }
  0xcc   :  { %v561_v28 = vpop.permute.xlu0 %560  ;;  %909 = vrot.lane.b32.xlu1 %v862_v25, %s4329_s22  ;;  %v759_v25 = vld [vmem:[#allocation2 + $0x31a] ss:$2 sm:$0xff] }
  0xcd   :  { %604 = vst.msk [vmem:[#allocation4 + $0x28] sm:$0xff] %vm598_vm6, %v561_v28  ;;  %v870_v28 = vld [vmem:[#allocation2 + $0x300] ss:$2 sm:$0xff] }
  0xce   :  { %798 = vrot.lane.b32.xlu0 %v751_v26, %s4328_s30  ;;  %v1120_v31 = vpop.permute.xlu1 %1119 }
  0xcf   :  { %1166 = vst.msk [vmem:[#allocation4 + $0x10] sm:$0xff] %vm1163_vm11, %v1120_v31 }
  0xd0   :  { %v1009_v32 = vpop.permute.xlu0 %1008  ;;  %574 = vrot.lane.b32.xlu1 %v527_v29, %s4326_s16  ;;  %v872_v29 = vld [vmem:[#allocation2 + $0x330] ss:$2 sm:$0xff] }
  0xd1   :  { %1054 = vst.msk [vmem:[#allocation4 + $0x18] sm:$0xff] %vm1050_vm10, %v1009_v32  ;;  %v983_v32 = vld [vmem:[#allocation2 + $0x301] ss:$2 sm:$0xff] }
  0xd2   :  { %464 = vrot.lane.b32.xlu0 %v417_v30, %s4324_s14  ;;  %v674_v36 = vpop.permute.xlu1 %673 }
  0xd3   :  { %717 = vst.msk [vmem:[#allocation4 + $0x28] sm:$0xff] %vm711_vm7, %v674_v36  ;;  %v1096_v36 = vld [vmem:[#allocation2 + $0x302] ss:$2 sm:$0xff] }
  0xd4   :  { %v338_v37 = vpop.permute.xlu0 %337  ;;  %1022 = vrot.lane.b32.xlu1 %v975_v33, %s4330_s26  ;;  %v985_v33 = vld [vmem:[#allocation2 + $0x331] ss:$2 sm:$0xff] }
  0xd5   :  { %380 = vst.msk [vmem:[#allocation4 + $0x30] sm:$0xff] %vm373_vm4, %v338_v37  ;;  %v1098_v37 = vld [vmem:[#allocation2 + $0x332] ss:$2 sm:$0xff] }
  0xd6   :  { %911 = vrot.lane.b32.xlu0 %v864_v34, %s4329_s22  ;;  %v1122_v40 = vpop.permute.xlu1 %1121  ;;  %v1182_v42 = vld [vmem:[#allocation4 + $0x10] sm:$0xff] }
  0xd7   :  { %1167 = vst.msk [vmem:[#allocation4 + $0x18] sm:$0xff] %vm1163_vm11, %v1122_v40  ;;  %3808 = vmatprep.mubr.msk.f32.mxu0 %vm1201_vm12, %v1182_v42  ;;  %v4332_v42 = vmov 0.0|0.0  }
  0xd8   :  { %v785_v41 = vpop.permute.xlu0 %784  ;;  %687 = vrot.lane.b32.xlu1 %v640_v38, %s4327_s17  ;;  %4115 = vmatprep.subr.bf16.mxu1 %v4332_v42 }
  0xd9   :  { %829 = vst.msk [vmem:[#allocation4 + $0x20] sm:$0xff] %vm824_vm8, %v785_v41  ;;  %4139 = vmatprep.subr.bf16.mxu0 %v4332_v42 }
  0xda   :  { %576 = vrot.lane.b32.xlu0 %v529_v39, %s4326_s16  ;;  %v451_v46 = vpop.permute.xlu1 %450 }
  0xdb   :  { %493 = vst.msk [vmem:[#allocation4 + $0x30] sm:$0xff] %vm486_vm5, %v451_v46 }
  0xdc   :  { %v340_v47 = vpop.permute.xlu0 %339  ;;  %1135 = vrot.lane.b32.xlu1 %v1088_v44, %s4331_s19 }
  0xdd   :  { %381 = vst.msk [vmem:[#allocation4 + $0x38] sm:$0xff] %vm373_vm4, %v340_v47 }
  0xde   :  { %1024 = vrot.lane.b32.xlu0 %v977_v45, %s4330_s26  ;;  %v898_v50 = vpop.permute.xlu1 %897  ;;  %v1183_v52 = vld [vmem:[#allocation4 + $0x18] sm:$0xff] }
  0xdf   :  { %942 = vst.msk [vmem:[#allocation4 + $0x20] sm:$0xff] %vm937_vm9, %v898_v50  ;;  %3809 = vmatmul.mubr.msk.f32.gmra.mrb[2].mxu0 %vm1201_vm12, %v1183_v52 }
  0xe0   :  { %v787_v51 = vpop.permute.xlu0 %786  ;;  %689 = vrot.lane.b32.xlu1 %v642_v48, %s4327_s17 }
  0xe1   :  { %830 = vst.msk [vmem:[#allocation4 + $0x28] sm:$0xff] %vm824_vm8, %v787_v51 }
  0xe2   :  { %353 = vrot.lane.b32.xlu0 %v306_v49, %s4325_s15  ;;  %v563_v55 = vpop.permute.xlu1 %562 }
  0xe3   :  { %605 = vst.msk [vmem:[#allocation4 + $0x30] sm:$0xff] %vm598_vm6, %v563_v55 }
  0xe4   :  { %v453_v56 = vpop.permute.xlu0 %452  ;;  %1137 = vrot.lane.b32.xlu1 %v1090_v53, %s4331_s19 }
  0xe5   :  { %494 = vst.msk [vmem:[#allocation4 + $0x38] sm:$0xff] %vm486_vm5, %v453_v56 }
  0xe6   :  { %800 = vrot.lane.b32.xlu0 %v753_v54, %s4328_s30  ;;  %v1011_v59 = vpop.permute.xlu1 %1010 }
  0xe7   :  { %1055 = vst.msk [vmem:[#allocation4 + $0x20] sm:$0xff] %vm1050_vm10, %v1011_v59 }
  0xe8   :  { %v900_v60 = vpop.permute.xlu0 %899  ;;  %466 = vrot.lane.b32.xlu1 %v419_v58, %s4324_s14 }
  0xe9   :  { %943 = vst.msk [vmem:[#allocation4 + $0x28] sm:$0xff] %vm937_vm9, %v900_v60 }
  0xea   :  { %355 = vrot.lane.b32.xlu0 %v308_v57, %s4325_s15  ;;  %v676_v63 = vpop.permute.xlu1 %675  ;;  %s4335_s15 = smov 64  }
  0xeb   :  { %718 = vst.msk [vmem:[#allocation4 + $0x30] sm:$0xff] %vm711_vm7, %v676_v63 }
  0xec   :  { %v565_v0 = vpop.permute.xlu0 %564  ;;  %913 = vrot.lane.b32.xlu1 %v866_v62, %s4329_s22 }
  0xed   :  { %606 = vst.msk [vmem:[#allocation4 + $0x38] sm:$0xff] %vm598_vm6, %v565_v0 }
  0xee   :  { %802 = vrot.lane.b32.xlu0 %v755_v61, %s4328_s30  ;;  %v1124_v4 = vpop.permute.xlu1 %1123 }
  0xef   :  { %1168 = vst.msk [vmem:[#allocation4 + $0x20] sm:$0xff] %vm1163_vm11, %v1124_v4 }
  0xf0   :  { %v1013_v5 = vpop.permute.xlu0 %1012  ;;  %578 = vrot.lane.b32.xlu1 %v531_v3, %s4326_s16 }
  0xf1   :  { %1056 = vst.msk [vmem:[#allocation4 + $0x28] sm:$0xff] %vm1050_vm10, %v1013_v5 }
  0xf2   :  { %468 = vrot.lane.b32.xlu0 %v421_v2, %s4324_s14  ;;  %v678_v8 = vpop.permute.xlu1 %677 }
  0xf3   :  { %719 = vst.msk [vmem:[#allocation4 + $0x38] sm:$0xff] %vm711_vm7, %v678_v8 }
  0xf4   :  { %v342_v9 = vpop.permute.xlu0 %341  ;;  %1026 = vrot.lane.b32.xlu1 %v979_v7, %s4330_s26 }
  0xf5   :  { %382 = vst.msk [vmem:[#allocation4 + $0x40] sm:$0xff] %vm373_vm4, %v342_v9 }
  0xf6   :  { %915 = vrot.lane.b32.xlu0 %v868_v6, %s4329_s22  ;;  %v1126_v12 = vpop.permute.xlu1 %1125  ;;  %v1184_v14 = vld [vmem:[#allocation4 + $0x20] sm:$0xff] }
  0xf7   :  { %1169 = vst.msk [vmem:[#allocation4 + $0x28] sm:$0xff] %vm1163_vm11, %v1126_v12  ;;  %3811 = vmatprep.mubr.msk.f32.mxu0 %vm1201_vm12, %v1184_v14 }
  0xf8   :  { %v789_v13 = vpop.permute.xlu0 %788  ;;  %691 = vrot.lane.b32.xlu1 %v644_v11, %s4327_s17 }
  0xf9   :  { %831 = vst.msk [vmem:[#allocation4 + $0x30] sm:$0xff] %vm824_vm8, %v789_v13 }
  0xfa   :  { %580 = vrot.lane.b32.xlu0 %v533_v10, %s4326_s16  ;;  %v455_v17 = vpop.permute.xlu1 %454  ;;  %s4336_s16 = smov 48  }
  0xfb   :  { %495 = vst.msk [vmem:[#allocation4 + $0x40] sm:$0xff] %vm486_vm5, %v455_v17 }
  0xfc   :  { %v344_v18 = vpop.permute.xlu0 %343  ;;  %1139 = vrot.lane.b32.xlu1 %v1092_v16, %s4331_s19 }
  0xfd   :  { %383 = vst.msk [vmem:[#allocation4 + $0x48] sm:$0xff] %vm373_vm4, %v344_v18 }
  0xfe   :  { %1028 = vrot.lane.b32.xlu0 %v981_v15, %s4330_s26  ;;  %v902_v21 = vpop.permute.xlu1 %901  ;;  %v1185_v23 = vld [vmem:[#allocation4 + $0x28] sm:$0xff] }
  0xff   :  { %944 = vst.msk [vmem:[#allocation4 + $0x30] sm:$0xff] %vm937_vm9, %v902_v21  ;;  %3812 = vmatmul.mubr.msk.f32.gmra.mrb[4].mxu0 %vm1201_vm12, %v1185_v23 }
 0x100   :  { %v791_v22 = vpop.permute.xlu0 %790  ;;  %804 = vrot.lane.b32.xlu1 %v757_v20, %s4328_s30 }
 0x101   :  { %832 = vst.msk [vmem:[#allocation4 + $0x38] sm:$0xff] %vm824_vm8, %v791_v22 }
 0x102   :  { %693 = vrot.lane.b32.xlu0 %v646_v19, %s4327_s17  ;;  %v567_v26 = vpop.permute.xlu1 %566 }
 0x103   :  { %607 = vst.msk [vmem:[#allocation4 + $0x40] sm:$0xff] %vm598_vm6, %v567_v26 }
 0x104   :  { %v457_v27 = vpop.permute.xlu0 %456  ;;  %806 = vrot.lane.b32.xlu1 %v759_v25, %s4328_s30  ;;  %s4337_s30 = smov 56  }
 0x105   :  { %496 = vst.msk [vmem:[#allocation4 + $0x48] sm:$0xff] %vm486_vm5, %v457_v27 }
 0x106   :  { %1141 = vrot.lane.b32.xlu0 %v1094_v24, %s4331_s19  ;;  %v1015_v30 = vpop.permute.xlu1 %1014 }
 0x107   :  { %1057 = vst.msk [vmem:[#allocation4 + $0x30] sm:$0xff] %vm1050_vm10, %v1015_v30 }
 0x108   :  { %v904_v31 = vpop.permute.xlu0 %903  ;;  %919 = vrot.lane.b32.xlu1 %v872_v29, %s4329_s22 }
 0x109   :  { %945 = vst.msk [vmem:[#allocation4 + $0x38] sm:$0xff] %vm937_vm9, %v904_v31 }
 0x10a   :  { %917 = vrot.lane.b32.xlu0 %v870_v28, %s4329_s22  ;;  %v680_v34 = vpop.permute.xlu1 %679 }
 0x10b   :  { %720 = vst.msk [vmem:[#allocation4 + $0x40] sm:$0xff] %vm711_vm7, %v680_v34 }
 0x10c   :  { %v569_v35 = vpop.permute.xlu0 %568  ;;  %1032 = vrot.lane.b32.xlu1 %v985_v33, %s4330_s26 }
 0x10d   :  { %608 = vst.msk [vmem:[#allocation4 + $0x48] sm:$0xff] %vm598_vm6, %v569_v35 }
 0x10e   :  { %1030 = vrot.lane.b32.xlu0 %v983_v32, %s4330_s26  ;;  %v1128_v38 = vpop.permute.xlu1 %1127 }
 0x10f   :  { %1170 = vst.msk [vmem:[#allocation4 + $0x30] sm:$0xff] %vm1163_vm11, %v1128_v38 }
 0x110   :  { %v1017_v39 = vpop.permute.xlu0 %1016  ;;  %1145 = vrot.lane.b32.xlu1 %v1098_v37, %s4331_s19 }
 0x111   :  { %1058 = vst.msk [vmem:[#allocation4 + $0x38] sm:$0xff] %vm1050_vm10, %v1017_v39 }
 0x112   :  { %1143 = vrot.lane.b32.xlu0 %v1096_v36, %s4331_s19  ;;  %v682_v40 = vpop.permute.xlu1 %681 }
 0x113   :  { %721 = vst.msk [vmem:[#allocation4 + $0x48] sm:$0xff] %vm711_vm7, %v682_v40 }
 0x114   :  { %v346_v41 = vpop.permute.xlu0 %345 }
 0x115   :  { %384 = vst.msk [vmem:[#allocation4 + $0x50] sm:$0xff] %vm373_vm4, %v346_v41 }
 0x116   :  { %v1130_v43 = vpop.permute.xlu1 %1129  ;;  %v1186_v45 = vld [vmem:[#allocation4 + $0x30] sm:$0xff] }
 0x117   :  { %1171 = vst.msk [vmem:[#allocation4 + $0x38] sm:$0xff] %vm1163_vm11, %v1130_v43  ;;  %3814 = vmatprep.mubr.msk.f32.mxu0 %vm1201_vm12, %v1186_v45 }
 0x118   :  { %v793_v44 = vpop.permute.xlu0 %792 }
 0x119   :  { %833 = vst.msk [vmem:[#allocation4 + $0x40] sm:$0xff] %vm824_vm8, %v793_v44 }
 0x11a   :  { %v459_v46 = vpop.permute.xlu1 %458 }
 0x11b   :  { %497 = vst.msk [vmem:[#allocation4 + $0x50] sm:$0xff] %vm486_vm5, %v459_v46 }
 0x11c   :  { %v348_v47 = vpop.permute.xlu0 %347 }
 0x11d   :  { %385 = vst.msk [vmem:[#allocation4 + $0x58] sm:$0xff] %vm373_vm4, %v348_v47 }
 0x11e   :  { %v906_v48 = vpop.permute.xlu1 %905  ;;  %v1187_v50 = vld [vmem:[#allocation4 + $0x38] sm:$0xff] }
 0x11f   :  { %946 = vst.msk [vmem:[#allocation4 + $0x40] sm:$0xff] %vm937_vm9, %v906_v48  ;;  %3815 = vmatmul.mubr.msk.f32.gmra.mrb[6].mxu0 %vm1201_vm12, %v1187_v50 }
 0x120   :  { %v795_v49 = vpop.permute.xlu0 %794 }
 0x121   :  { %834 = vst.msk [vmem:[#allocation4 + $0x48] sm:$0xff] %vm824_vm8, %v795_v49 }
 0x122   :  { %v571_v51 = vpop.permute.xlu1 %570 }
 0x123   :  { %609 = vst.msk [vmem:[#allocation4 + $0x50] sm:$0xff] %vm598_vm6, %v571_v51 }
 0x124   :  { %v461_v52 = vpop.permute.xlu0 %460 }
 0x125   :  { %498 = vst.msk [vmem:[#allocation4 + $0x58] sm:$0xff] %vm486_vm5, %v461_v52 }
 0x126   :  { %v1019_v53 = vpop.permute.xlu1 %1018 }
 0x127   :  { %1059 = vst.msk [vmem:[#allocation4 + $0x40] sm:$0xff] %vm1050_vm10, %v1019_v53 }
 0x128   :  { %v908_v54 = vpop.permute.xlu0 %907 }
 0x129   :  { %947 = vst.msk [vmem:[#allocation4 + $0x48] sm:$0xff] %vm937_vm9, %v908_v54 }
 0x12a   :  { %v684_v55 = vpop.permute.xlu1 %683 }
 0x12b   :  { %722 = vst.msk [vmem:[#allocation4 + $0x50] sm:$0xff] %vm711_vm7, %v684_v55 }
 0x12c   :  { %v573_v56 = vpop.permute.xlu0 %572 }
 0x12d   :  { %610 = vst.msk [vmem:[#allocation4 + $0x58] sm:$0xff] %vm598_vm6, %v573_v56 }
 0x12e   :  { %v1132_v57 = vpop.permute.xlu1 %1131 }
 0x12f   :  { %1172 = vst.msk [vmem:[#allocation4 + $0x40] sm:$0xff] %vm1163_vm11, %v1132_v57 }
 0x130   :  { %v1021_v58 = vpop.permute.xlu0 %1020 }
 0x131   :  { %1060 = vst.msk [vmem:[#allocation4 + $0x48] sm:$0xff] %vm1050_vm10, %v1021_v58 }
 0x132   :  { %v686_v59 = vpop.permute.xlu1 %685 }
 0x133   :  { %723 = vst.msk [vmem:[#allocation4 + $0x58] sm:$0xff] %vm711_vm7, %v686_v59 }
 0x134   :  { %v350_v60 = vpop.permute.xlu0 %349 }
 0x135   :  { %386 = vst.msk [vmem:[#allocation4 + $0x60] sm:$0xff] %vm373_vm4, %v350_v60 }
 0x136   :  { %v1134_v61 = vpop.permute.xlu1 %1133  ;;  %v1188_v63 = vld [vmem:[#allocation4 + $0x40] sm:$0xff] }
 0x137   :  { %1173 = vst.msk [vmem:[#allocation4 + $0x48] sm:$0xff] %vm1163_vm11, %v1134_v61  ;;  %3817 = vmatprep.mubr.msk.f32.mxu0 %vm1201_vm12, %v1188_v63 }
 0x138   :  { %v797_v62 = vpop.permute.xlu0 %796 }
 0x139   :  { %835 = vst.msk [vmem:[#allocation4 + $0x50] sm:$0xff] %vm824_vm8, %v797_v62 }
 0x13a   :  { %v463_v0 = vpop.permute.xlu1 %462 }
 0x13b   :  { %499 = vst.msk [vmem:[#allocation4 + $0x60] sm:$0xff] %vm486_vm5, %v463_v0 }
 0x13c   :  { %v352_v2 = vpop.permute.xlu0 %351 }
 0x13d   :  { %387 = vst.msk [vmem:[#allocation4 + $0x68] sm:$0xff] %vm373_vm4, %v352_v2 }
 0x13e   :  { %v910_v3 = vpop.permute.xlu1 %909  ;;  %v1189_v5 = vld [vmem:[#allocation4 + $0x48] sm:$0xff] }
 0x13f   :  { %948 = vst.msk [vmem:[#allocation4 + $0x50] sm:$0xff] %vm937_vm9, %v910_v3  ;;  %3818 = vmatmul.mubr.msk.f32.gmra.mrb[8].mxu0 %vm1201_vm12, %v1189_v5 }
 0x140   :  { %v799_v4 = vpop.permute.xlu0 %798 }
 0x141   :  { %836 = vst.msk [vmem:[#allocation4 + $0x58] sm:$0xff] %vm824_vm8, %v799_v4 }
 0x142   :  { %v575_v6 = vpop.permute.xlu1 %574 }
 0x143   :  { %611 = vst.msk [vmem:[#allocation4 + $0x60] sm:$0xff] %vm598_vm6, %v575_v6 }
 0x144   :  { %v465_v7 = vpop.permute.xlu0 %464 }
 0x145   :  { %500 = vst.msk [vmem:[#allocation4 + $0x68] sm:$0xff] %vm486_vm5, %v465_v7 }
 0x146   :  { %v1023_v8 = vpop.permute.xlu1 %1022 }
 0x147   :  { %1061 = vst.msk [vmem:[#allocation4 + $0x50] sm:$0xff] %vm1050_vm10, %v1023_v8  ;;  %v4334_v8 = vmov 1.0  }
 0x148   :  { %v912_v9 = vpop.permute.xlu0 %911 }
 0x149   :  { %949 = vst.msk [vmem:[#allocation4 + $0x58] sm:$0xff] %vm937_vm9, %v912_v9  ;;  %v1472_v9 = vlaneseq }
 0x14a   :  { %v688_v10 = vpop.permute.xlu1 %687 }
 0x14b   :  { %724 = vst.msk [vmem:[#allocation4 + $0x60] sm:$0xff] %vm711_vm7, %v688_v10  ;;  %v1473_v10 = vshrl.u32 %v1472_v9, 7 }
 0x14c   :  { %v577_v11 = vpop.permute.xlu0 %576 }
 0x14d   :  { %612 = vst.msk [vmem:[#allocation4 + $0x68] sm:$0xff] %vm598_vm6, %v577_v11  ;;  %v5068_v11 = vsub.s32 0, %v1473_v10 }
 0x14e   :  { %v1136_v12 = vpop.permute.xlu1 %1135 }
 0x14f   :  { %1174 = vst.msk [vmem:[#allocation4 + $0x50] sm:$0xff] %vm1163_vm11, %v1136_v12 }
 0x150   :  { %v1025_v13 = vpop.permute.xlu0 %1024 }
 0x151   :  { %1062 = vst.msk [vmem:[#allocation4 + $0x58] sm:$0xff] %vm1050_vm10, %v1025_v13 }
 0x152   :  { %v690_v14 = vpop.permute.xlu1 %689 }
 0x153   :  { %725 = vst.msk [vmem:[#allocation4 + $0x68] sm:$0xff] %vm711_vm7, %v690_v14 }
 0x154   :  { %v354_v15 = vpop.permute.xlu0 %353 }
 0x155   :  { %388 = vst.msk [vmem:[#allocation4 + $0x70] sm:$0xff] %vm373_vm4, %v354_v15 }
 0x156   :  { %v1138_v16 = vpop.permute.xlu1 %1137  ;;  %v1190_v18 = vld [vmem:[#allocation4 + $0x50] sm:$0xff] }
 0x157   :  { %1175 = vst.msk [vmem:[#allocation4 + $0x58] sm:$0xff] %vm1163_vm11, %v1138_v16  ;;  %3820 = vmatprep.mubr.msk.f32.mxu0 %vm1201_vm12, %v1190_v18 }
 0x158   :  { %v801_v17 = vpop.permute.xlu0 %800 }
 0x159   :  { %837 = vst.msk [vmem:[#allocation4 + $0x60] sm:$0xff] %vm824_vm8, %v801_v17 }
 0x15a   :  { %v467_v20 = vpop.permute.xlu1 %466 }
 0x15b   :  { %501 = vst.msk [vmem:[#allocation4 + $0x70] sm:$0xff] %vm486_vm5, %v467_v20 }
 0x15c   :  { %v356_v19 = vpop.permute.xlu0 %355 }
 0x15d   :  { %389 = vst.msk [vmem:[#allocation4 + $0x78] sm:$0xff] %vm373_vm4, %v356_v19  ;;  %vm1910_vm4 = vcmask 195712  }
 0x15e   :  { %v914_v22 = vpop.permute.xlu1 %913  ;;  %v1191_v23 = vld [vmem:[#allocation4 + $0x58] sm:$0xff] }
 0x15f   :  { %950 = vst.msk [vmem:[#allocation4 + $0x60] sm:$0xff] %vm937_vm9, %v914_v22  ;;  %3821 = vmatmul.mubr.msk.f32.gmra.mrb[10].mxu0 %vm1201_vm12, %v1191_v23 }
 0x160   :  { %v803_v21 = vpop.permute.xlu0 %802 }
 0x161   :  { %838 = vst.msk [vmem:[#allocation4 + $0x68] sm:$0xff] %vm824_vm8, %v803_v21 }
 0x162   :  { %v579_v25 = vpop.permute.xlu1 %578 }
 0x163   :  { %613 = vst.msk [vmem:[#allocation4 + $0x70] sm:$0xff] %vm598_vm6, %v579_v25 }
 0x164   :  { %v469_v24 = vpop.permute.xlu0 %468 }
 0x165   :  { %502 = vst.msk [vmem:[#allocation4 + $0x78] sm:$0xff] %vm486_vm5, %v469_v24  ;;  %vm2007_vm5 = vcmask 261312  }
 0x166   :  { %v1027_v27 = vpop.permute.xlu1 %1026 }
 0x167   :  { %1063 = vst.msk [vmem:[#allocation4 + $0x60] sm:$0xff] %vm1050_vm10, %v1027_v27 }
 0x168   :  { %v916_v26 = vpop.permute.xlu0 %915 }
 0x169   :  { %951 = vst.msk [vmem:[#allocation4 + $0x68] sm:$0xff] %vm937_vm9, %v916_v26 }
 0x16a   :  { %v692_v29 = vpop.permute.xlu1 %691 }
 0x16b   :  { %726 = vst.msk [vmem:[#allocation4 + $0x70] sm:$0xff] %vm711_vm7, %v692_v29 }
 0x16c   :  { %v581_v28 = vpop.permute.xlu0 %580 }
 0x16d   :  { %614 = vst.msk [vmem:[#allocation4 + $0x78] sm:$0xff] %vm598_vm6, %v581_v28  ;;  %vm2104_vm6 = vcmask 326912  }
 0x16e   :  { %v1140_v31 = vpop.permute.xlu1 %1139 }
 0x16f   :  { %1176 = vst.msk [vmem:[#allocation4 + $0x60] sm:$0xff] %vm1163_vm11, %v1140_v31 }
 0x170   :  { %v1029_v30 = vpop.permute.xlu0 %1028 }
 0x171   :  { %1064 = vst.msk [vmem:[#allocation4 + $0x68] sm:$0xff] %vm1050_vm10, %v1029_v30 }
 0x172   :  { %v805_v33 = vpop.permute.xlu1 %804 }
 0x173   :  { %839 = vst.msk [vmem:[#allocation4 + $0x70] sm:$0xff] %vm824_vm8, %v805_v33 }
 0x174   :  { %v694_v32 = vpop.permute.xlu0 %693 }
 0x175   :  { %727 = vst.msk [vmem:[#allocation4 + $0x78] sm:$0xff] %vm711_vm7, %v694_v32  ;;  %vm2201_vm7 = vcmask 392512  }
 0x176   :  { %v807_v35 = vpop.permute.xlu1 %806  ;;  %v1192_v36 = vld [vmem:[#allocation4 + $0x60] sm:$0xff] }
 0x177   :  { %840 = vst.msk [vmem:[#allocation4 + $0x78] sm:$0xff] %vm824_vm8, %v807_v35  ;;  %3823 = vmatprep.mubr.msk.f32.mxu0 %vm1201_vm12, %v1192_v36  ;;  %vm2299_vm8 = vcmask 458112  }
 0x178   :  { %v1142_v34 = vpop.permute.xlu0 %1141 }
 0x179   :  { %1177 = vst.msk [vmem:[#allocation4 + $0x68] sm:$0xff] %vm1163_vm11, %v1142_v34 }
 0x17a   :  { %v920_v38 = vpop.permute.xlu1 %919 }
 0x17b   :  { %953 = vst.msk [vmem:[#allocation4 + $0x78] sm:$0xff] %vm937_vm9, %v920_v38 }
 0x17c   :  { %v918_v37 = vpop.permute.xlu0 %917 }
 0x17d   :  { %952 = vst.msk [vmem:[#allocation4 + $0x70] sm:$0xff] %vm937_vm9, %v918_v37  ;;  %vm2396_vm9 = vcmask 523712  }
 0x17e   :  { %v1033_v40 = vpop.permute.xlu1 %1032 }
 0x17f   :  { %1066 = vst.msk [vmem:[#allocation4 + $0x78] sm:$0xff] %vm1050_vm10, %v1033_v40 }
 0x180   :  { %v1031_v39 = vpop.permute.xlu0 %1030  ;;  %v1193_v41 = vld [vmem:[#allocation4 + $0x68] sm:$0xff] }
 0x181   :  { %1065 = vst.msk [vmem:[#allocation4 + $0x70] sm:$0xff] %vm1050_vm10, %v1031_v39  ;;  %3824 = vmatmul.mubr.msk.f32.gmra.mrb[12].mxu0 %vm1201_vm12, %v1193_v41  ;;  %vm2493_vm10 = vcmask 589312  }
 0x182   :  { %v1146_v44 = vpop.permute.xlu1 %1145 }
 0x183   :  { %1179 = vst.msk [vmem:[#allocation4 + $0x78] sm:$0xff] %vm1163_vm11, %v1146_v44 }
 0x184   :  { %v1144_v43 = vpop.permute.xlu0 %1143 }
 0x185   :  { %1178 = vst.msk [vmem:[#allocation4 + $0x70] sm:$0xff] %vm1163_vm11, %v1144_v43  ;;  %vm2535_vm11 = vcmask 588800  }
 0x18a   :  { %v1195_v46 = vld [vmem:[#allocation4 + $0x78] sm:$0xff] }
 0x18c   :  { %v1194_v45 = vld [vmem:[#allocation4 + $0x70] sm:$0xff] }
 0x18d   :  { %3826 = vmatprep.mubr.msk.f32.mxu0 %vm1201_vm12, %v1194_v45 }
 0x18e   :  { %3827 = vmatmul.mubr.msk.f32.gmra.mrb[14].mxu0 %vm1201_vm12, %v1195_v46 }
 0x18f   :  { %3896 = vmatprep.mubr.msk.f32.mxu0 %vm4333_vm13, %v4323_v1 }
 0x192   :  { %v5008_v47 = vpop.f32.mrb[0].mxu0 }
 0x193   :  { %v5010_v48 = vpop.f32.mrb[1].mxu0 }
 0x194   :  { %v4116_v49 = vpack.c.bf16 %v5008_v47, %v5010_v48 }
 0x196   :  { %4117 = vmatpush3.bf16.msra.mxu1 %v4116_v49 }
 0x197   :  { %4118 = vmatprep.subr.bf16.mxu1 %v4332_v42 }
 0x1b2   :  { %v5015_v50 = vpop.f32.mrb[2].mxu0 }
 0x1b3   :  { %v5017_v51 = vpop.f32.mrb[3].mxu0 }
 0x1b4   :  { %v4119_v52 = vpack.c.bf16 %v5015_v50, %v5017_v51 }
 0x1b6   :  { %4120 = vmatpush3.bf16.msra.mxu1 %v4119_v52 }
 0x1b7   :  { %4121 = vmatprep.subr.bf16.mxu1 %v4332_v42 }
 0x1d2   :  { %v5022_v53 = vpop.f32.mrb[4].mxu0 }
 0x1d3   :  { %v5024_v54 = vpop.f32.mrb[5].mxu0 }
 0x1d4   :  { %v4122_v55 = vpack.c.bf16 %v5022_v53, %v5024_v54 }
 0x1d6   :  { %4123 = vmatpush3.bf16.msra.mxu1 %v4122_v55 }
 0x1d7   :  { %4124 = vmatprep.subr.bf16.mxu1 %v4332_v42 }
 0x1f2   :  { %v5033_v56 = vpop.f32.mrb[6].mxu0 }
 0x1f3   :  { %v5035_v57 = vpop.f32.mrb[7].mxu0 }
 0x1f4   :  { %v4125_v58 = vpack.c.bf16 %v5033_v56, %v5035_v57 }
 0x1f6   :  { %4126 = vmatpush3.bf16.msra.mxu1 %v4125_v58 }
 0x1f7   :  { %4127 = vmatprep.subr.bf16.mxu1 %v4332_v42 }
 0x212   :  { %v5040_v59 = vpop.f32.mrb[8].mxu0 }
 0x213   :  { %v5042_v60 = vpop.f32.mrb[9].mxu0 }
 0x214   :  { %v4128_v61 = vpack.c.bf16 %v5040_v59, %v5042_v60 }
 0x216   :  { %4129 = vmatpush3.bf16.msra.mxu1 %v4128_v61 }
 0x217   :  { %4130 = vmatprep.subr.bf16.mxu1 %v4332_v42 }
 0x232   :  { %v5047_v62 = vpop.f32.mrb[10].mxu0 }
 0x233   :  { %v5049_v63 = vpop.f32.mrb[11].mxu0 }
 0x234   :  { %v4131_v0 = vpack.c.bf16 %v5047_v62, %v5049_v63 }
 0x236   :  { %4132 = vmatpush3.bf16.msra.mxu1 %v4131_v0 }
 0x237   :  { %4133 = vmatprep.subr.bf16.mxu1 %v4332_v42 }
 0x254   :  { %v5054_v2 = vpop.f32.mrb[12].mxu0 }
 0x255   :  { %v5056_v3 = vpop.f32.mrb[13].mxu0 }
 0x256   :  { %v4134_v4 = vpack.c.bf16 %v5054_v2, %v5056_v3 }
 0x258   :  { %4135 = vmatpush3.bf16.msra.mxu1 %v4134_v4 }
 0x259   :  { %4136 = vmatprep.subr.bf16.mxu1 %v4332_v42 }
 0x261   :  { %v5061_v5 = vpop.f32.mrb[14].mxu0 }
 0x262   :  { %v5063_v6 = vpop.f32.mrb[15].mxu0 }
 0x263   :  { %v4137_v7 = vpack.c.bf16 %v5061_v5, %v5063_v6 }
 0x265   :  { %4138 = vmatpush3.bf16.msra.mxu1 %v4137_v7 }
 0x268   :  { %3862 = vmatmul.mubr.f32.vlgmr.msra.gmra.mrb[0].mxu1 %v4334_v8 }
 0x33b   :  { %v1467_v12 = vpop.f32.mrb[0].mxu1 }
 0x33c   :  { %v5070_v13 = vmul.f32 0.0078125, %v1467_v12  ;;  %v3863_v14 = vpop.f32.mrb[1].mxu1  ;;  %v1733_v12 = vld [vmem:[#allocation3 + $0x1] sm:$0xff] }
 0x33d   :  { %1765 = vrot.lane.b32.xlu0 %v1733_v12, %s4324_s14  ;;  %v1830_v14 = vld [vmem:[#allocation3 + $0x2] sm:$0xff] }
 0x33e   :  { %v1475_v15 = vrot.slane %v5070_v13, %v5068_v11 }
 0x340   :  { %v1476_v16 = vsub.f32 %v5010_v48, %v1475_v15  ;;  %v1477_v17 = vsub.f32 %v5008_v47, %v1475_v15  ;;  %v1478_v18 = vsub.f32 %v5017_v51, %v1475_v15  ;;  %v1479_v19 = vsub.f32 %v5015_v50, %v1475_v15 }
 0x341   :  { %v1480_v20 = vsub.f32 %v5024_v54, %v1475_v15  ;;  %v1481_v21 = vsub.f32 %v5022_v53, %v1475_v15  ;;  %v1482_v22 = vsub.f32 %v5035_v57, %v1475_v15  ;;  %v1483_v23 = vsub.f32 %v5033_v56, %v1475_v15  ;;  %1862 = vrot.lane.b32.xlu0 %v1830_v14, %s4327_s17 }
 0x342   :  { %v1492_v24 = vmul.f32 %v1476_v16, %v1476_v16  ;;  %v1493_v25 = vmul.f32 %v1477_v17, %v1477_v17  ;;  %v1494_v26 = vmul.f32 %v1478_v18, %v1478_v18  ;;  %v1495_v27 = vmul.f32 %v1479_v19, %v1479_v19  ;;  %v1741_v16 = vld [vmem:[#allocation3 + $0xa1] sm:$0xff]  ;;  %v2420_v17 = vld [vmem:[#allocation3 + $0x92] sm:$0xff] }
 0x343   :  { %v1496_v28 = vmul.f32 %v1480_v20, %v1480_v20  ;;  %v1497_v29 = vmul.f32 %v1481_v21, %v1481_v21  ;;  %v1498_v30 = vmul.f32 %v1482_v22, %v1482_v22  ;;  %v1499_v31 = vmul.f32 %v1483_v23, %v1483_v23  ;;  %v2226_v18 = vld [vmem:[#allocation3 + $0x90] sm:$0xff]  ;;  %v1701_v22 = vld [vmem:[#allocation3] sm:$0xff] }
 0x344   :  { %v4140_v32 = vpack.c.bf16 %v1493_v25, %v1492_v24  ;;  %v4143_v33 = vpack.c.bf16 %v1495_v27, %v1494_v26  ;;  %v1484_v34 = vsub.f32 %v5042_v60, %v1475_v15  ;;  %v1485_v35 = vsub.f32 %v5040_v59, %v1475_v15  ;;  %v2234_v19 = vld [vmem:[#allocation3 + $0x130] sm:$0xff]  ;;  %1717 = vst.msk [vmem:[#allocation5] sm:$0xff] %vm1640_vm14, %v1701_v22 }
 0x345   :  { %v4146_v36 = vpack.c.bf16 %v1497_v29, %v1496_v28  ;;  %v4149_v37 = vpack.c.bf16 %v1499_v31, %v1498_v30  ;;  %v1486_v38 = vsub.f32 %v5049_v63, %v1475_v15  ;;  %v1487_v39 = vsub.f32 %v5047_v62, %v1475_v15  ;;  %1781 = vrot.lane.b32.xlu0 %v1741_v16, %s4324_s14  ;;  %v2323_v20 = vld [vmem:[#allocation3 + $0x91] sm:$0xff]  ;;  %v1709_v28 = vld [vmem:[#allocation3 + $0xa0] sm:$0xff] }
 0x346   :  { %4141 = vmatpush3.bf16.msra.mxu0 %v4140_v32  ;;  %v1500_v40 = vmul.f32 %v1484_v34, %v1484_v34  ;;  %v1501_v41 = vmul.f32 %v1485_v35, %v1485_v35  ;;  %v1488_v43 = vsub.f32 %v5056_v3, %v1475_v15  ;;  %v1489_v44 = vsub.f32 %v5054_v2, %v1475_v15  ;;  %v2331_v21 = vld [vmem:[#allocation3 + $0x131] sm:$0xff]  ;;  %v1399_v32 = vld [vmem:[%s5979_s4] sm:$0x1]  ;;  %v1400_v35 = vld [vmem:[%s5979_s4 + $0x1] sm:$0x1] }
 0x347   :  { %4142 = vmatprep.subr.bf16.mxu0 %v4332_v42  ;;  %v1502_v45 = vmul.f32 %v1486_v38, %v1486_v38  ;;  %v1503_v46 = vmul.f32 %v1487_v39, %v1487_v39  ;;  %v1490_v49 = vsub.f32 %v5063_v6, %v1475_v15  ;;  %v1491_v52 = vsub.f32 %v5061_v5, %v1475_v15  ;;  %v1838_v15 = vld [vmem:[#allocation3 + $0xa2] sm:$0xff] }
 0x348   :  { %v4152_v55 = vpack.c.bf16 %v1501_v41, %v1500_v40  ;;  %v1504_v58 = vmul.f32 %v1488_v43, %v1488_v43  ;;  %v1505_v61 = vmul.f32 %v1489_v44, %v1489_v44  ;;  %1878 = vrot.lane.b32.xlu1 %v1838_v15, %s4327_s17  ;;  %1725 = vst.msk [vmem:[#allocation5 + $0x40] sm:$0xff] %vm1640_vm14, %v1709_v28 }
 0x349   :  { %v4155_v0 = vpack.c.bf16 %v1503_v46, %v1502_v45  ;;  %v1506_v4 = vmul.f32 %v1490_v49, %v1490_v49  ;;  %v1507_v7 = vmul.f32 %v1491_v52, %v1491_v52  ;;  %2265 = vrot.lane.b32.xlu0 %v2226_v18, %s4336_s16 }
 0x34a   :  { %4144 = vmatpush3.bf16.msra.mxu0 %v4143_v33  ;;  %v4158_v9 = vpack.c.bf16 %v1505_v61, %v1504_v58 }
 0x34b   :  { %4145 = vmatprep.subr.bf16.mxu0 %v4332_v42  ;;  %v4161_v10 = vpack.c.bf16 %v1507_v7, %v1506_v4 }
 0x34c   :  { %2459 = vrot.lane.b32.xlu1 %v2420_v17, %s4335_s15 }
 0x34d   :  { %2362 = vrot.lane.b32.xlu0 %v2323_v20, %s4337_s30 }
 0x34e   :  { %4147 = vmatpush3.bf16.msra.mxu0 %v4146_v36 }
 0x34f   :  { %4148 = vmatprep.subr.bf16.mxu0 %v4332_v42 }
 0x350   :  { %2281 = vrot.lane.b32.xlu1 %v2234_v19, %s4336_s16 }
 0x352   :  { %4150 = vmatpush3.bf16.msra.mxu0 %v4149_v37 }
 0x353   :  { %4151 = vmatprep.subr.bf16.mxu0 %v4332_v42 }
 0x354   :  { %2378 = vrot.lane.b32.xlu1 %v2331_v21, %s4337_s30 }
 0x356   :  { %4153 = vmatpush3.bf16.msra.mxu0 %v4152_v55 }
 0x357   :  { %4154 = vmatprep.subr.bf16.mxu0 %v4332_v42 }
 0x35a   :  { %4156 = vmatpush3.bf16.msra.mxu0 %v4155_v0 }
 0x35b   :  { %4157 = vmatprep.subr.bf16.mxu0 %v4332_v42 }
 0x35e   :  { %4159 = vmatpush3.bf16.msra.mxu0 %v4158_v9 }
 0x35f   :  { %4160 = vmatprep.subr.bf16.mxu0 %v4332_v42 }
 0x362   :  { %4162 = vmatpush3.bf16.msra.mxu0 %v4161_v10 }
 0x363   :  { %4179 = vmatprep.subr.bf16.mxu0 %v4332_v42 }
 0x365   :  { %3897 = vmatmul.mubr.f32.vlgmr.msra.gmra.mrb[16].mxu0 %v4334_v8 }
 0x366   :  { %3973 = vmatprep.mubr.msk.f32.mxu0 %vm4333_vm13, %v4323_v1 }
 0x3af   :  { %v1766_v27 = vpop.permute.xlu0 %1765 }
 0x3b0   :  { %1814 = vst.msk [vmem:[#allocation5] sm:$0xff] %vm1813_vm2, %v1766_v27 }
 0x3b3   :  { %v1863_v29 = vpop.permute.xlu0 %1862 }
 0x3b4   :  { %1911 = vst.msk [vmem:[#allocation5] sm:$0xff] %vm1910_vm4, %v1863_v29 }
 0x3b7   :  { %v1782_v31 = vpop.permute.xlu0 %1781 }
 0x3b8   :  { %1822 = vst.msk [vmem:[#allocation5 + $0x40] sm:$0xff] %vm1813_vm2, %v1782_v31 }
 0x3ba   :  { %v1879_v30 = vpop.permute.xlu1 %1878 }
 0x3bb   :  { %1919 = vst.msk [vmem:[#allocation5 + $0x40] sm:$0xff] %vm1910_vm4, %v1879_v30 }
 0x438   :  { %v1574_v23 = vpop.f32.mrb[16].mxu0 }
 0x439   :  { %v1578_v24 = vmul.f32 0.0078125, %v1574_v23  ;;  %v3898_v25 = vpop.f32.mrb[17].mxu0 }
 0x43b   :  { %v1579_v26 = vadd.f32 1e-05, %v1578_v24 }
 0x43d   :  { %4293 = vrsqrt.f32 %v1579_v26 }
 0x447   :  { %v4294_v33 = vpop.eup %4293 }
 0x448   :  { %v1581_v34 = vmul.f32 %v4294_v33, %v1399_v32 }
 0x44a   :  { %v1582_v36 = vmul.f32 %v1581_v34, %v5070_v13  ;;  %v1587_v37 = vrot.slane %v1581_v34, %v5068_v11 }
 0x44c   :  { %v1583_v38 = vsub.f32 %v1400_v35, %v1582_v36  ;;  %v1588_v39 = vmul.f32 %v1587_v37, %v5010_v48  ;;  %v1589_v40 = vmul.f32 %v5008_v47, %v1587_v37  ;;  %v1590_v41 = vmul.f32 %v1587_v37, %v5017_v51 }
 0x44d   :  { %v1591_v43 = vmul.f32 %v5015_v50, %v1587_v37  ;;  %v1592_v44 = vmul.f32 %v1587_v37, %v5024_v54  ;;  %v1593_v45 = vmul.f32 %v5022_v53, %v1587_v37  ;;  %v1594_v46 = vmul.f32 %v1587_v37, %v5035_v57 }
 0x44e   :  { %v1607_v49 = vrot.slane %v1583_v38, %v5068_v11  ;;  %v1595_v13 = vmul.f32 %v5033_v56, %v1587_v37  ;;  %v1596_v52 = vmul.f32 %v1587_v37, %v5042_v60  ;;  %v1597_v48 = vmul.f32 %v5040_v59, %v1587_v37 }
 0x44f   :  { %v1598_v47 = vmul.f32 %v1587_v37, %v5049_v63  ;;  %v1599_v51 = vmul.f32 %v5047_v62, %v1587_v37  ;;  %v1600_v50 = vmul.f32 %v1587_v37, %v5056_v3  ;;  %v1601_v17 = vmul.f32 %v5054_v2, %v1587_v37 }
 0x450   :  { %v1608_v55 = vadd.f32 %v1607_v49, %v1588_v39  ;;  %v1609_v54 = vadd.f32 %v1607_v49, %v1589_v40  ;;  %v1610_v58 = vadd.f32 %v1607_v49, %v1590_v41  ;;  %v1611_v53 = vadd.f32 %v1607_v49, %v1591_v43 }
 0x451   :  { %v1612_v61 = vadd.f32 %v1607_v49, %v1592_v44  ;;  %v1613_v57 = vadd.f32 %v1607_v49, %v1593_v45  ;;  %v1614_v0 = vadd.f32 %v1607_v49, %v1594_v46  ;;  %v1615_v4 = vadd.f32 %v1607_v49, %v1595_v13 }
 0x452   :  { %v1624_v7 = vmax.f32 %v1608_v55, 0.0  ;;  %v1625_v56 = vmax.f32 %v1609_v54, 0.0  ;;  %v1626_v9 = vmax.f32 %v1610_v58, 0.0  ;;  %v1627_v60 = vmax.f32 %v1611_v53, 0.0  ;;  %v2530_v54 = vld [vmem:[%s5977_s2 + $0x20] sm:$0xff]  ;;  %v2531_v58 = vld [vmem:[%s5977_s2 + $0x28] sm:$0xff] }
 0x453   :  { %v1628_v10 = vmax.f32 %v1612_v61, 0.0  ;;  %v1629_v59 = vmax.f32 %v1613_v57, 0.0  ;;  %v1630_v12 = vmax.f32 %v1614_v0, 0.0  ;;  %v1631_v63 = vmax.f32 %v1615_v4, 0.0  ;;  %v2532_v57 = vld [vmem:[%s5977_s2 + $0x30] sm:$0xff]  ;;  %v2533_v0 = vld [vmem:[%s5977_s2 + $0x38] sm:$0xff] }
 0x454   :  { %1685 = vst.msk [vmem:[#allocation3 + $0x11] sm:$0xff] %vm1640_vm14, %v1624_v7  ;;  %1686 = vst.msk [vmem:[#allocation3 + $0x21] sm:$0xff] %vm1640_vm14, %v1625_v56  ;;  %v1616_v62 = vadd.f32 %v1607_v49, %v1596_v52  ;;  %v1617_v3 = vadd.f32 %v1607_v49, %v1597_v48  ;;  %v1618_v14 = vadd.f32 %v1607_v49, %v1598_v47  ;;  %v2526_v52 = vld [vmem:[%s5977_s2] sm:$0xff]  ;;  %v2527_v48 = vld [vmem:[%s5977_s2 + $0x8] sm:$0xff] }
 0x455   :  { %1687 = vst.msk [vmem:[#allocation3 + $0x31] sm:$0xff] %vm1640_vm14, %v1626_v9  ;;  %1688 = vst.msk [vmem:[#allocation3 + $0x41] sm:$0xff] %vm1640_vm14, %v1627_v60  ;;  %v1619_v15 = vadd.f32 %v1607_v49, %v1599_v51  ;;  %v1620_v16 = vadd.f32 %v1607_v49, %v1600_v50  ;;  %v1602_v18 = vmul.f32 %v1587_v37, %v5063_v6  ;;  %v2528_v51 = vld [vmem:[%s5977_s2 + $0x10] sm:$0xff]  ;;  %v2529_v50 = vld [vmem:[%s5977_s2 + $0x18] sm:$0xff] }
 0x456   :  { %1689 = vst.msk [vmem:[#allocation3 + $0x51] sm:$0xff] %vm1640_vm14, %v1628_v10  ;;  %1690 = vst.msk [vmem:[#allocation3 + $0x61] sm:$0xff] %vm1640_vm14, %v1629_v59  ;;  %v1632_v19 = vmax.f32 %v1616_v62, 0.0  ;;  %v1633_v20 = vmax.f32 %v1617_v3, 0.0  ;;  %v1634_v21 = vmax.f32 %v1618_v14, 0.0  ;;  %v1603_v22 = vmul.f32 %v5061_v5, %v1587_v37  ;;  %v2534_v7 = vld [vmem:[%s5977_s2 + $0x40] sm:$0xff]  ;;  %v5366_v3 = vpop.permute.xlu1 %2459 }
 0x457   :  { %1691 = vst.msk [vmem:[#allocation3 + $0x71] sm:$0xff] %vm1640_vm14, %v1630_v12  ;;  %1692 = vst.msk [vmem:[#allocation3 + $0x81] sm:$0xff] %vm1640_vm14, %v1631_v63  ;;  %v1635_v23 = vmax.f32 %v1619_v15, 0.0  ;;  %v1636_v24 = vmax.f32 %v1620_v16, 0.0  ;;  %v1621_v25 = vadd.f32 %v1607_v49, %v1601_v17  ;;  %v1622_v26 = vadd.f32 %v1607_v49, %v1602_v18  ;;  %v5372_v15 = vpop.permute.xlu0 %2265 }
 0x458   :  { %1693 = vst.msk [vmem:[#allocation3 + $0xb1] sm:$0xff] %vm1640_vm14, %v1632_v19  ;;  %1694 = vst.msk [vmem:[#allocation3 + $0xc1] sm:$0xff] %vm1640_vm14, %v1633_v20  ;;  %v1623_v27 = vadd.f32 %v1607_v49, %v1603_v22  ;;  %v4163_v47 = vpack.c.bf16 %v2527_v48, %v2526_v52  ;;  %v4167_v55 = vpack.c.bf16 %v2529_v50, %v2528_v51 }
 0x459   :  { %1695 = vst.msk [vmem:[#allocation3 + $0xd1] sm:$0xff] %vm1640_vm14, %v1634_v21  ;;  %1696 = vst.msk [vmem:[#allocation3 + $0xe1] sm:$0xff] %vm1640_vm14, %v1635_v23  ;;  %v1637_v2 = vmax.f32 %v1621_v25, 0.0  ;;  %v1638_v6 = vmax.f32 %v1622_v26, 0.0  ;;  %v4171_v53 = vpack.c.bf16 %v2531_v58, %v2530_v54  ;;  %v4175_v4 = vpack.c.bf16 %v2533_v0, %v2532_v57 }
 0x45a   :  { %1697 = vst.msk [vmem:[#allocation3 + $0xf1] sm:$0xff] %vm1640_vm14, %v1636_v24  ;;  %v1639_v28 = vmax.f32 %v1623_v27, 0.0  ;;  %4164 = vmatprep.subr.bf16.mxu1 %v4163_v47  ;;  %v5370_v14 = vpop.permute.xlu1 %2281 }
 0x45b   :  { %v1927_v29 = vld [vmem:[#allocation3 + $0x10] sm:$0xff]  ;;  %1698 = vst.msk [vmem:[#allocation3 + $0x101] sm:$0xff] %vm1640_vm14, %v1637_v2  ;;  %1699 = vst.msk [vmem:[#allocation3 + $0x111] sm:$0xff] %vm1640_vm14, %v1638_v6  ;;  %v1928_v30 = vld [vmem:[#allocation3 + $0x20] sm:$0xff]  ;;  %4166 = vmatpush3.bf16.msra.mxu1 %v4163_v47  ;;  %v5380_v20 = vpop.permute.xlu0 %2362 }
 0x45c   :  { %v1734_v5 = vld [vmem:[#allocation3 + $0x11] sm:$0xff]  ;;  %1959 = vrot.lane.b32.xlu0 %v1927_v29, %s4329_s22  ;;  %1718 = vst.msk [vmem:[#allocation5 + $0x8] sm:$0xff] %vm1640_vm14, %v1927_v29  ;;  %1700 = vst.msk [vmem:[#allocation3 + $0x121] sm:$0xff] %vm1640_vm14, %v1639_v28  ;;  %v5237_v32 = vld [vmem:[#allocation3 + $0x40] sm:$0xff]  ;;  %4168 = vmatprep.subr.bf16.mxu1 %v4167_v55 }
 0x45d   :  { %1767 = vrot.lane.b32.xlu1 %v1734_v5, %s4324_s14  ;;  %v2220_v31 = vld [vmem:[#allocation3 + $0x30] sm:$0xff]  ;;  %1719 = vst.msk [vmem:[#allocation5 + $0x10] sm:$0xff] %vm1640_vm14, %v1928_v30  ;;  %1721 = vst.msk [vmem:[#allocation5 + $0x20] sm:$0xff] %vm1640_vm14, %v5237_v32  ;;  %v5246_v35 = vld [vmem:[#allocation3 + $0x60] sm:$0xff] }
 0x45e   :  { %1720 = vst.msk [vmem:[#allocation5 + $0x18] sm:$0xff] %vm1640_vm14, %v2220_v31  ;;  %v1831_v33 = vld [vmem:[#allocation3 + $0x12] sm:$0xff]  ;;  %1723 = vst.msk [vmem:[#allocation5 + $0x30] sm:$0xff] %vm1640_vm14, %v5246_v35  ;;  %v2025_v37 = vld [vmem:[#allocation3 + $0x21] sm:$0xff]  ;;  %v5378_v19 = vpop.permute.xlu1 %2378 }
 0x45f   :  { %v5240_v34 = vld [vmem:[#allocation3 + $0x50] sm:$0xff]  ;;  %v5256_v38 = vld [vmem:[#allocation3 + $0xc0] sm:$0xff]  ;;  %4170 = vmatpush3.bf16.msra.mxu1 %v4167_v55 }
 0x460   :  { %2056 = vrot.lane.b32.xlu0 %v1734_v5, %s4331_s19  ;;  %1722 = vst.msk [vmem:[#allocation5 + $0x28] sm:$0xff] %vm1640_vm14, %v5240_v34  ;;  %v5250_v36 = vld [vmem:[#allocation3 + $0x70] sm:$0xff]  ;;  %1727 = vst.msk [vmem:[#allocation5 + $0x50] sm:$0xff] %vm1640_vm14, %v5256_v38  ;;  %v5268_v41 = vld [vmem:[#allocation3 + $0xe0] sm:$0xff]  ;;  %4172 = vmatprep.subr.bf16.mxu1 %v4171_v53 }
 0x461   :  { %1864 = vrot.lane.b32.xlu1 %v1831_v33, %s4327_s17  ;;  %1724 = vst.msk [vmem:[#allocation5 + $0x38] sm:$0xff] %vm1640_vm14, %v5250_v36  ;;  %v5260_v39 = vld [vmem:[#allocation3 + $0xb0] sm:$0xff]  ;;  %1729 = vst.msk [vmem:[#allocation5 + $0x60] sm:$0xff] %vm1640_vm14, %v5268_v41  ;;  %v2122_v49 = vld [vmem:[#allocation3 + $0x22] sm:$0xff] }
 0x462   :  { %v5264_v40 = vld [vmem:[#allocation3 + $0xd0] sm:$0xff]  ;;  %1726 = vst.msk [vmem:[#allocation5 + $0x48] sm:$0xff] %vm1640_vm14, %v5260_v39  ;;  %v5278_v45 = vld [vmem:[#allocation3 + $0x100] sm:$0xff] }
 0x463   :  { %1728 = vst.msk [vmem:[#allocation5 + $0x58] sm:$0xff] %vm1640_vm14, %v5264_v40  ;;  %v1736_v43 = vld [vmem:[#allocation3 + $0x31] sm:$0xff]  ;;  %1731 = vst.msk [vmem:[#allocation5 + $0x70] sm:$0xff] %vm1640_vm14, %v5278_v45  ;;  %v1737_v61 = vld [vmem:[#allocation3 + $0x41] sm:$0xff]  ;;  %4174 = vmatpush3.bf16.msra.mxu1 %v4171_v53 }
 0x464   :  { %2058 = vrot.lane.b32.xlu0 %v2025_v37, %s4331_s19  ;;  %v5272_v44 = vld [vmem:[#allocation3 + $0xf0] sm:$0xff]  ;;  %4176 = vmatprep.subr.bf16.mxu1 %v4175_v4  ;;  %v2124_v9 = vld [vmem:[#allocation3 + $0x42] sm:$0xff] }
 0x465   :  { %1961 = vrot.lane.b32.xlu1 %v1928_v30, %s4329_s22  ;;  %1730 = vst.msk [vmem:[#allocation5 + $0x68] sm:$0xff] %vm1640_vm14, %v5272_v44  ;;  %v5282_v46 = vld [vmem:[#allocation3 + $0x110] sm:$0xff]  ;;  %v1739_v10 = vld [vmem:[#allocation3 + $0x61] sm:$0xff] }
 0x466   :  { %1732 = vst.msk [vmem:[#allocation5 + $0x78] sm:$0xff] %vm1640_vm14, %v5282_v46  ;;  %v1833_v13 = vld [vmem:[#allocation3 + $0x32] sm:$0xff]  ;;  %v2126_v12 = vld [vmem:[#allocation3 + $0x62] sm:$0xff] }
 0x467   :  { %4178 = vmatpush3.bf16.msra.mxu1 %v4175_v4  ;;  %v1738_v56 = vld [vmem:[#allocation3 + $0x51] sm:$0xff]  ;;  %v1934_v62 = vld [vmem:[#allocation3 + $0x80] sm:$0xff] }
 0x468   :  { %1771 = vrot.lane.b32.xlu0 %v1736_v43, %s4324_s14  ;;  %3915 = vmatprep.subr.mxu1 %v2534_v7  ;;  %v1835_v60 = vld [vmem:[#allocation3 + $0x52] sm:$0xff]  ;;  %v2128_v17 = vld [vmem:[#allocation3 + $0x82] sm:$0xff] }
 0x469   :  { %1769 = vrot.lane.b32.xlu1 %v2025_v37, %s4324_s14  ;;  %v1740_v59 = vld [vmem:[#allocation3 + $0x71] sm:$0xff]  ;;  %v2031_v18 = vld [vmem:[#allocation3 + $0x81] sm:$0xff] }
 0x46a   :  { %v1837_v63 = vld [vmem:[#allocation3 + $0x72] sm:$0xff]  ;;  %v1743_v26 = vld [vmem:[#allocation3 + $0xc1] sm:$0xff] }
 0x46b   :  { %3916 = vmatpush3.msra.mxu1 %v2534_v7  ;;  %v1742_v16 = vld [vmem:[#allocation3 + $0xb1] sm:$0xff]  ;;  %v1745_v48 = vld [vmem:[#allocation3 + $0xe1] sm:$0xff] }
 0x46c   :  { %2155 = vrot.lane.b32.xlu0 %v2122_v49, %s4338_s21  ;;  %4203 = vmatprep.subr.bf16.mxu1 %v4332_v42  ;;  %v1839_v21 = vld [vmem:[#allocation3 + $0xb2] sm:$0xff]  ;;  %v2132_v53 = vld [vmem:[#allocation3 + $0xe2] sm:$0xff] }
 0x46d   :  { %2153 = vrot.lane.b32.xlu1 %v1831_v33, %s4338_s21  ;;  %v1744_v29 = vld [vmem:[#allocation3 + $0xd1] sm:$0xff] }
 0x46e   :  { %v1746_v50 = vld [vmem:[#allocation3 + $0xf1] sm:$0xff] }
 0x46f   :  { %v1843_v0 = vld [vmem:[#allocation3 + $0xf2] sm:$0xff] }
 0x470   :  { %1868 = vrot.lane.b32.xlu0 %v1833_v13, %s4327_s17 }
 0x471   :  { %1866 = vrot.lane.b32.xlu1 %v2122_v49, %s4327_s17 }
 0x474   :  { %2253 = vrot.lane.b32.xlu0 %v2220_v31, %s4336_s16 }
 0x475   :  { %2251 = vrot.lane.b32.xlu1 %v1928_v30, %s4336_s16 }
 0x478   :  { %1965 = vrot.lane.b32.xlu0 %v5237_v32, %s4329_s22 }
 0x479   :  { %1963 = vrot.lane.b32.xlu1 %v2220_v31, %s4329_s22  ;;  %v2130_v31 = vld [vmem:[#allocation3 + $0xc2] sm:$0xff] }
 0x47c   :  { %2350 = vrot.lane.b32.xlu0 %v1736_v43, %s4337_s30 }
 0x47d   :  { %2348 = vrot.lane.b32.xlu1 %v2025_v37, %s4337_s30 }
 0x480   :  { %1773 = vrot.lane.b32.xlu0 %v1737_v61, %s4324_s14 }
 0x481   :  { %2060 = vrot.lane.b32.xlu1 %v1736_v43, %s4331_s19 }
 0x484   :  { %2157 = vrot.lane.b32.xlu0 %v1833_v13, %s4338_s21 }
 0x485   :  { %2445 = vrot.lane.b32.xlu1 %v2122_v49, %s4335_s15 }
 0x488   :  { %1775 = vrot.lane.b32.xlu0 %v1738_v56, %s4324_s14 }
 0x489   :  { %2062 = vrot.lane.b32.xlu1 %v1737_v61, %s4331_s19 }
 0x48c   :  { %2159 = vrot.lane.b32.xlu0 %v2124_v9, %s4338_s21 }
 0x48d   :  { %2447 = vrot.lane.b32.xlu1 %v1833_v13, %s4335_s15 }
 0x490   :  { %1872 = vrot.lane.b32.xlu0 %v1835_v60, %s4327_s17 }
 0x491   :  { %1870 = vrot.lane.b32.xlu1 %v2124_v9, %s4327_s17 }
 0x494   :  { %2257 = vrot.lane.b32.xlu0 %v5240_v34, %s4336_s16 }
 0x495   :  { %2255 = vrot.lane.b32.xlu1 %v5237_v32, %s4336_s16 }
 0x498   :  { %1969 = vrot.lane.b32.xlu0 %v5246_v35, %s4329_s22 }
 0x499   :  { %1967 = vrot.lane.b32.xlu1 %v5240_v34, %s4329_s22  ;;  %v1841_v34 = vld [vmem:[#allocation3 + $0xd2] sm:$0xff] }
 0x49c   :  { %2354 = vrot.lane.b32.xlu0 %v1738_v56, %s4337_s30 }
 0x49d   :  { %2352 = vrot.lane.b32.xlu1 %v1737_v61, %s4337_s30 }
 0x4a0   :  { %1777 = vrot.lane.b32.xlu0 %v1739_v10, %s4324_s14 }
 0x4a1   :  { %2064 = vrot.lane.b32.xlu1 %v1738_v56, %s4331_s19 }
 0x4a4   :  { %2161 = vrot.lane.b32.xlu0 %v1835_v60, %s4338_s21 }
 0x4a5   :  { %2449 = vrot.lane.b32.xlu1 %v2124_v9, %s4335_s15 }
 0x4a8   :  { %1779 = vrot.lane.b32.xlu0 %v1740_v59, %s4324_s14 }
 0x4a9   :  { %2066 = vrot.lane.b32.xlu1 %v1739_v10, %s4331_s19 }
 0x4ac   :  { %2163 = vrot.lane.b32.xlu0 %v2126_v12, %s4338_s21 }
 0x4ad   :  { %2451 = vrot.lane.b32.xlu1 %v1835_v60, %s4335_s15 }
 0x4b0   :  { %1876 = vrot.lane.b32.xlu0 %v1837_v63, %s4327_s17 }
 0x4b1   :  { %1874 = vrot.lane.b32.xlu1 %v2126_v12, %s4327_s17 }
 0x4b4   :  { %2261 = vrot.lane.b32.xlu0 %v5250_v36, %s4336_s16 }
 0x4b5   :  { %2259 = vrot.lane.b32.xlu1 %v5246_v35, %s4336_s16 }
 0x4b8   :  { %1973 = vrot.lane.b32.xlu0 %v1934_v62, %s4329_s22 }
 0x4b9   :  { %1971 = vrot.lane.b32.xlu1 %v5250_v36, %s4329_s22 }
 0x4bc   :  { %2358 = vrot.lane.b32.xlu0 %v1740_v59, %s4337_s30 }
 0x4bd   :  { %2356 = vrot.lane.b32.xlu1 %v1739_v10, %s4337_s30 }
 0x4c0   :  { %2165 = vrot.lane.b32.xlu0 %v1837_v63, %s4338_s21 }
 0x4c1   :  { %2068 = vrot.lane.b32.xlu1 %v1740_v59, %s4331_s19 }
 0x4c4   :  { %1783 = vrot.lane.b32.xlu0 %v1742_v16, %s4324_s14 }
 0x4c5   :  { %2453 = vrot.lane.b32.xlu1 %v2126_v12, %s4335_s15 }
 0x4c8   :  { %2167 = vrot.lane.b32.xlu0 %v2128_v17, %s4338_s21 }
 0x4c9   :  { %2070 = vrot.lane.b32.xlu1 %v2031_v18, %s4331_s19 }
 0x4cc   :  { %1880 = vrot.lane.b32.xlu0 %v1839_v21, %s4327_s17 }
 0x4cd   :  { %2455 = vrot.lane.b32.xlu1 %v1837_v63, %s4335_s15 }
 0x4ce   :  { %v1960_v23 = vpop.permute.xlu0 %1959 }
 0x4cf   :  { %v1768_v22 = vpop.permute.xlu1 %1767  ;;  %2008 = vst.msk [vmem:[#allocation5] sm:$0xff] %vm2007_vm5, %v1960_v23 }
 0x4d0   :  { %1815 = vst.msk [vmem:[#allocation5 + $0x8] sm:$0xff] %vm1813_vm2, %v1768_v22  ;;  %1977 = vrot.lane.b32.xlu0 %v5256_v38, %s4329_s22 }
 0x4d1   :  { %2263 = vrot.lane.b32.xlu1 %v1934_v62, %s4336_s16 }
 0x4d2   :  { %v2057_v25 = vpop.permute.xlu0 %2056 }
 0x4d3   :  { %v1865_v24 = vpop.permute.xlu1 %1864  ;;  %2105 = vst.msk [vmem:[#allocation5] sm:$0xff] %vm2104_vm6, %v2057_v25 }
 0x4d4   :  { %1912 = vst.msk [vmem:[#allocation5 + $0x8] sm:$0xff] %vm1910_vm4, %v1865_v24  ;;  %1785 = vrot.lane.b32.xlu0 %v1743_v26, %s4324_s14  ;;  %v2134_v24 = vld [vmem:[#allocation3 + $0x102] sm:$0xff] }
 0x4d5   :  { %1975 = vrot.lane.b32.xlu1 %v5260_v39, %s4329_s22 }
 0x4d6   :  { %v2059_v2 = vpop.permute.xlu0 %2058 }
 0x4d7   :  { %v1962_v27 = vpop.permute.xlu1 %1961 }
 0x4d8   :  { %2009 = vst.msk [vmem:[#allocation5 + $0x8] sm:$0xff] %vm2007_vm5, %v1962_v27  ;;  %2169 = vrot.lane.b32.xlu0 %v1839_v21, %s4338_s21  ;;  %v1845_v27 = vld [vmem:[#allocation3 + $0x112] sm:$0xff] }
 0x4d9   :  { %2106 = vst.msk [vmem:[#allocation5 + $0x8] sm:$0xff] %vm2104_vm6, %v2059_v2  ;;  %2360 = vrot.lane.b32.xlu1 %v2031_v18, %s4337_s30  ;;  %v1748_v18 = vld [vmem:[#allocation3 + $0x111] sm:$0xff] }
 0x4da   :  { %v1772_v28 = vpop.permute.xlu0 %1771 }
 0x4db   :  { %v1770_v6 = vpop.permute.xlu1 %1769  ;;  %1817 = vst.msk [vmem:[#allocation5 + $0x18] sm:$0xff] %vm1813_vm2, %v1772_v28 }
 0x4dc   :  { %1816 = vst.msk [vmem:[#allocation5 + $0x10] sm:$0xff] %vm1813_vm2, %v1770_v6  ;;  %1787 = vrot.lane.b32.xlu0 %v1744_v29, %s4324_s14 }
 0x4dd   :  { %2072 = vrot.lane.b32.xlu1 %v1742_v16, %s4331_s19 }
 0x4de   :  { %v2156_v30 = vpop.permute.xlu0 %2155 }
 0x4df   :  { %v2154_v5 = vpop.permute.xlu1 %2153  ;;  %2203 = vst.msk [vmem:[#allocation5 + $0x8] sm:$0xff] %vm2201_vm7, %v2156_v30  ;;  %v1942_v30 = vld [vmem:[#allocation3 + $0x120] sm:$0xff] }
 0x4e0   :  { %2202 = vst.msk [vmem:[#allocation5] sm:$0xff] %vm2201_vm7, %v2154_v5  ;;  %2171 = vrot.lane.b32.xlu0 %v2130_v31, %s4338_s21 }
 0x4e1   :  { %2457 = vrot.lane.b32.xlu1 %v2128_v17, %s4335_s15 }
 0x4e2   :  { %v1869_v33 = vpop.permute.xlu0 %1868 }
 0x4e3   :  { %v1867_v32 = vpop.permute.xlu1 %1866  ;;  %1914 = vst.msk [vmem:[#allocation5 + $0x18] sm:$0xff] %vm1910_vm4, %v1869_v33 }
 0x4e4   :  { %1913 = vst.msk [vmem:[#allocation5 + $0x10] sm:$0xff] %vm1910_vm4, %v1867_v32  ;;  %1884 = vrot.lane.b32.xlu0 %v1841_v34, %s4327_s17 }
 0x4e5   :  { %2074 = vrot.lane.b32.xlu1 %v1743_v26, %s4331_s19 }
 0x4e6   :  { %v2254_v36 = vpop.permute.xlu0 %2253 }
 0x4e7   :  { %v2252_v35 = vpop.permute.xlu1 %2251  ;;  %2301 = vst.msk [vmem:[#allocation5 + $0x8] sm:$0xff] %vm2299_vm8, %v2254_v36 }
 0x4e8   :  { %2300 = vst.msk [vmem:[#allocation5] sm:$0xff] %vm2299_vm8, %v2252_v35  ;;  %2269 = vrot.lane.b32.xlu0 %v5264_v40, %s4336_s16  ;;  %v2039_v35 = vld [vmem:[#allocation3 + $0x121] sm:$0xff] }
 0x4e9   :  { %1882 = vrot.lane.b32.xlu1 %v2130_v31, %s4327_s17 }
 0x4ea   :  { %v1966_v39 = vpop.permute.xlu0 %1965 }
 0x4eb   :  { %v1964_v37 = vpop.permute.xlu1 %1963  ;;  %2011 = vst.msk [vmem:[#allocation5 + $0x18] sm:$0xff] %vm2007_vm5, %v1966_v39 }
 0x4ec   :  { %2010 = vst.msk [vmem:[#allocation5 + $0x10] sm:$0xff] %vm2007_vm5, %v1964_v37  ;;  %1981 = vrot.lane.b32.xlu0 %v5268_v41, %s4329_s22 }
 0x4ed   :  { %2267 = vrot.lane.b32.xlu1 %v5256_v38, %s4336_s16 }
 0x4ee   :  { %v2351_v49 = vpop.permute.xlu0 %2350 }
 0x4ef   :  { %v2349_v43 = vpop.permute.xlu1 %2348  ;;  %2398 = vst.msk [vmem:[#allocation5 + $0x8] sm:$0xff] %vm2396_vm9, %v2351_v49 }
 0x4f0   :  { %2397 = vst.msk [vmem:[#allocation5] sm:$0xff] %vm2396_vm9, %v2349_v43  ;;  %2366 = vrot.lane.b32.xlu0 %v1744_v29, %s4337_s30 }
 0x4f1   :  { %1979 = vrot.lane.b32.xlu1 %v5264_v40, %s4329_s22 }
 0x4f2   :  { %v1774_v52 = vpop.permute.xlu0 %1773 }
 0x4f3   :  { %v2061_v13 = vpop.permute.xlu1 %2060  ;;  %1818 = vst.msk [vmem:[#allocation5 + $0x20] sm:$0xff] %vm1813_vm2, %v1774_v52 }
 0x4f4   :  { %2107 = vst.msk [vmem:[#allocation5 + $0x10] sm:$0xff] %vm2104_vm6, %v2061_v13  ;;  %1789 = vrot.lane.b32.xlu0 %v1745_v48, %s4324_s14 }
 0x4f5   :  { %2364 = vrot.lane.b32.xlu1 %v1743_v26, %s4337_s30 }
 0x4f6   :  { %v2158_v47 = vpop.permute.xlu0 %2157 }
 0x4f7   :  { %v2446_v38 = vpop.permute.xlu1 %2445  ;;  %2204 = vst.msk [vmem:[#allocation5 + $0x10] sm:$0xff] %vm2201_vm7, %v2158_v47 }
 0x4f8   :  { %2494 = vst.msk [vmem:[#allocation5] sm:$0xff] %vm2493_vm10, %v2446_v38  ;;  %2173 = vrot.lane.b32.xlu0 %v1841_v34, %s4338_s21 }
 0x4f9   :  { %2076 = vrot.lane.b32.xlu1 %v1744_v29, %s4331_s19 }
 0x4fa   :  { %v1776_v51 = vpop.permute.xlu0 %1775 }
 0x4fb   :  { %v2063_v40 = vpop.permute.xlu1 %2062  ;;  %1819 = vst.msk [vmem:[#allocation5 + $0x28] sm:$0xff] %vm1813_vm2, %v1776_v51 }
 0x4fc   :  { %2108 = vst.msk [vmem:[#allocation5 + $0x18] sm:$0xff] %vm2104_vm6, %v2063_v40  ;;  %1791 = vrot.lane.b32.xlu0 %v1746_v50, %s4324_s14 }
 0x4fd   :  { %2461 = vrot.lane.b32.xlu1 %v2130_v31, %s4335_s15 }
 0x4fe   :  { %v2160_v54 = vpop.permute.xlu0 %2159 }
 0x4ff   :  { %v2448_v55 = vpop.permute.xlu1 %2447  ;;  %v2510_v58 = vld [vmem:[#allocation5] sm:$0xff]  ;;  %2205 = vst.msk [vmem:[#allocation5 + $0x18] sm:$0xff] %vm2201_vm7, %v2160_v54 }
 0x500   :  { %2495 = vst.msk [vmem:[#allocation5 + $0x8] sm:$0xff] %vm2493_vm10, %v2448_v55  ;;  %3917 = vmatprep.mubr.msk.f32.mxu1 %vm2535_vm11, %v2510_v58  ;;  %2175 = vrot.lane.b32.xlu0 %v2132_v53, %s4338_s21 }
 0x501   :  { %2078 = vrot.lane.b32.xlu1 %v1745_v48, %s4331_s19 }
 0x502   :  { %v1873_v57 = vpop.permute.xlu0 %1872 }
 0x503   :  { %v1871_v61 = vpop.permute.xlu1 %1870  ;;  %1916 = vst.msk [vmem:[#allocation5 + $0x28] sm:$0xff] %vm1910_vm4, %v1873_v57 }
 0x504   :  { %1915 = vst.msk [vmem:[#allocation5 + $0x20] sm:$0xff] %vm1910_vm4, %v1871_v61  ;;  %1888 = vrot.lane.b32.xlu0 %v1843_v0, %s4327_s17 }
 0x505   :  { %2463 = vrot.lane.b32.xlu1 %v1841_v34, %s4335_s15 }
 0x506   :  { %v2258_v7 = vpop.permute.xlu0 %2257 }
 0x507   :  { %v2256_v4 = vpop.permute.xlu1 %2255  ;;  %v2511_v56 = vld [vmem:[#allocation5 + $0x8] sm:$0xff]  ;;  %2303 = vst.msk [vmem:[#allocation5 + $0x18] sm:$0xff] %vm2299_vm8, %v2258_v7 }
 0x508   :  { %2302 = vst.msk [vmem:[#allocation5 + $0x10] sm:$0xff] %vm2299_vm8, %v2256_v4  ;;  %3918 = vmatmul.mubr.msk.f32.vlgmr.msra.gmra.mrb[2].mxu1 %vm2535_vm11, %v2511_v56  ;;  %2273 = vrot.lane.b32.xlu0 %v5272_v44, %s4336_s16 }
 0x509   :  { %1886 = vrot.lane.b32.xlu1 %v2132_v53, %s4327_s17 }
 0x50a   :  { %v1970_v60 = vpop.permute.xlu0 %1969 }
 0x50b   :  { %v1968_v9 = vpop.permute.xlu1 %1967  ;;  %2013 = vst.msk [vmem:[#allocation5 + $0x28] sm:$0xff] %vm2007_vm5, %v1970_v60 }
 0x50c   :  { %2012 = vst.msk [vmem:[#allocation5 + $0x20] sm:$0xff] %vm2007_vm5, %v1968_v9  ;;  %1985 = vrot.lane.b32.xlu0 %v5278_v45, %s4329_s22 }
 0x50d   :  { %2271 = vrot.lane.b32.xlu1 %v5268_v41, %s4336_s16  ;;  %v1747_v41 = vld [vmem:[#allocation3 + $0x101] sm:$0xff] }
 0x50e   :  { %v2355_v59 = vpop.permute.xlu0 %2354 }
 0x50f   :  { %v2353_v10 = vpop.permute.xlu1 %2352  ;;  %2400 = vst.msk [vmem:[#allocation5 + $0x18] sm:$0xff] %vm2396_vm9, %v2355_v59 }
 0x510   :  { %2399 = vst.msk [vmem:[#allocation5 + $0x10] sm:$0xff] %vm2396_vm9, %v2353_v10  ;;  %2370 = vrot.lane.b32.xlu0 %v1746_v50, %s4337_s30 }
 0x511   :  { %1983 = vrot.lane.b32.xlu1 %v5272_v44, %s4329_s22 }
 0x512   :  { %v1778_v63 = vpop.permute.xlu0 %1777 }
 0x513   :  { %v2065_v12 = vpop.permute.xlu1 %2064  ;;  %1820 = vst.msk [vmem:[#allocation5 + $0x30] sm:$0xff] %vm1813_vm2, %v1778_v63 }
 0x514   :  { %2109 = vst.msk [vmem:[#allocation5 + $0x20] sm:$0xff] %vm2104_vm6, %v2065_v12  ;;  %1793 = vrot.lane.b32.xlu0 %v1747_v41, %s4324_s14 }
 0x515   :  { %2368 = vrot.lane.b32.xlu1 %v1745_v48, %s4337_s30 }
 0x516   :  { %v2162_v16 = vpop.permute.xlu0 %2161 }
 0x517   :  { %v2450_v62 = vpop.permute.xlu1 %2449  ;;  %2206 = vst.msk [vmem:[#allocation5 + $0x20] sm:$0xff] %vm2201_vm7, %v2162_v16 }
 0x518   :  { %2496 = vst.msk [vmem:[#allocation5 + $0x10] sm:$0xff] %vm2493_vm10, %v2450_v62  ;;  %2177 = vrot.lane.b32.xlu0 %v1843_v0, %s4338_s21 }
 0x519   :  { %2080 = vrot.lane.b32.xlu1 %v1746_v50, %s4331_s19 }
 0x51a   :  { %v1780_v17 = vpop.permute.xlu0 %1779 }
 0x51b   :  { %v2067_v44 = vpop.permute.xlu1 %2066  ;;  %1821 = vst.msk [vmem:[#allocation5 + $0x38] sm:$0xff] %vm1813_vm2, %v1780_v17 }
 0x51c   :  { %2110 = vst.msk [vmem:[#allocation5 + $0x28] sm:$0xff] %vm2104_vm6, %v2067_v44  ;;  %1795 = vrot.lane.b32.xlu0 %v1748_v18, %s4324_s14 }
 0x51d   :  { %2465 = vrot.lane.b32.xlu1 %v2132_v53, %s4335_s15 }
 0x51e   :  { %v2164_v22 = vpop.permute.xlu0 %2163 }
 0x51f   :  { %v2452_v21 = vpop.permute.xlu1 %2451  ;;  %v2512_v23 = vld [vmem:[#allocation5 + $0x10] sm:$0xff]  ;;  %2207 = vst.msk [vmem:[#allocation5 + $0x28] sm:$0xff] %vm2201_vm7, %v2164_v22 }
 0x520   :  { %2497 = vst.msk [vmem:[#allocation5 + $0x18] sm:$0xff] %vm2493_vm10, %v2452_v21  ;;  %3920 = vmatprep.mubr.msk.f32.mxu1 %vm2535_vm11, %v2512_v23  ;;  %2179 = vrot.lane.b32.xlu0 %v2134_v24, %s4338_s21 }
 0x521   :  { %2082 = vrot.lane.b32.xlu1 %v1747_v41, %s4331_s19 }
 0x522   :  { %v1877_v26 = vpop.permute.xlu0 %1876 }
 0x523   :  { %v1875_v25 = vpop.permute.xlu1 %1874  ;;  %1918 = vst.msk [vmem:[#allocation5 + $0x38] sm:$0xff] %vm1910_vm4, %v1877_v26 }
 0x524   :  { %1917 = vst.msk [vmem:[#allocation5 + $0x30] sm:$0xff] %vm1910_vm4, %v1875_v25  ;;  %1892 = vrot.lane.b32.xlu0 %v1845_v27, %s4327_s17 }
 0x525   :  { %2467 = vrot.lane.b32.xlu1 %v1843_v0, %s4335_s15 }
 0x526   :  { %v2262_v6 = vpop.permute.xlu0 %2261 }
 0x527   :  { %v2260_v2 = vpop.permute.xlu1 %2259  ;;  %v2513_v28 = vld [vmem:[#allocation5 + $0x18] sm:$0xff]  ;;  %2305 = vst.msk [vmem:[#allocation5 + $0x28] sm:$0xff] %vm2299_vm8, %v2262_v6 }
 0x528   :  { %2304 = vst.msk [vmem:[#allocation5 + $0x20] sm:$0xff] %vm2299_vm8, %v2260_v2  ;;  %3921 = vmatmul.mubr.msk.f32.gmra.mrb[4].mxu1 %vm2535_vm11, %v2513_v28  ;;  %2277 = vrot.lane.b32.xlu0 %v5282_v46, %s4336_s16 }
 0x529   :  { %1890 = vrot.lane.b32.xlu1 %v2134_v24, %s4327_s17 }
 0x52a   :  { %v1974_v5 = vpop.permute.xlu0 %1973 }
 0x52b   :  { %v1972_v29 = vpop.permute.xlu1 %1971  ;;  %2015 = vst.msk [vmem:[#allocation5 + $0x38] sm:$0xff] %vm2007_vm5, %v1974_v5 }
 0x52c   :  { %2014 = vst.msk [vmem:[#allocation5 + $0x30] sm:$0xff] %vm2007_vm5, %v1972_v29  ;;  %1989 = vrot.lane.b32.xlu0 %v1942_v30, %s4329_s22 }
 0x52d   :  { %2275 = vrot.lane.b32.xlu1 %v5278_v45, %s4336_s16 }
 0x52e   :  { %v2359_v32 = vpop.permute.xlu0 %2358 }
 0x52f   :  { %v2357_v31 = vpop.permute.xlu1 %2356  ;;  %2402 = vst.msk [vmem:[#allocation5 + $0x28] sm:$0xff] %vm2396_vm9, %v2359_v32 }
 0x530   :  { %2401 = vst.msk [vmem:[#allocation5 + $0x20] sm:$0xff] %vm2396_vm9, %v2357_v31  ;;  %2374 = vrot.lane.b32.xlu0 %v1748_v18, %s4337_s30 }
 0x531   :  { %1987 = vrot.lane.b32.xlu1 %v5282_v46, %s4329_s22 }
 0x532   :  { %v2166_v34 = vpop.permute.xlu0 %2165 }
 0x533   :  { %v2069_v33 = vpop.permute.xlu1 %2068 }
 0x534   :  { %2111 = vst.msk [vmem:[#allocation5 + $0x30] sm:$0xff] %vm2104_vm6, %v2069_v33  ;;  %2086 = vrot.lane.b32.xlu0 %v2039_v35, %s4331_s19 }
 0x535   :  { %2208 = vst.msk [vmem:[#allocation5 + $0x30] sm:$0xff] %vm2201_vm7, %v2166_v34  ;;  %2372 = vrot.lane.b32.xlu1 %v1747_v41, %s4337_s30 }
 0x536   :  { %v1784_v36 = vpop.permute.xlu0 %1783 }
 0x537   :  { %v2454_v45 = vpop.permute.xlu1 %2453  ;;  %1823 = vst.msk [vmem:[#allocation5 + $0x48] sm:$0xff] %vm1813_vm2, %v1784_v36 }
 0x538   :  { %2498 = vst.msk [vmem:[#allocation5 + $0x20] sm:$0xff] %vm2493_vm10, %v2454_v45  ;;  %2471 = vrot.lane.b32.xlu0 %v1845_v27, %s4335_s15 }
 0x539   :  { %2084 = vrot.lane.b32.xlu1 %v1748_v18, %s4331_s19 }
 0x53a   :  { %v2168_v37 = vpop.permute.xlu0 %2167 }
 0x53b   :  { %v2071_v46 = vpop.permute.xlu1 %2070 }
 0x53c   :  { %2112 = vst.msk [vmem:[#allocation5 + $0x38] sm:$0xff] %vm2104_vm6, %v2071_v46  ;;  %2279 = vrot.lane.b32.xlu0 %v1942_v30, %s4336_s16 }
 0x53d   :  { %2209 = vst.msk [vmem:[#allocation5 + $0x38] sm:$0xff] %vm2201_vm7, %v2168_v37  ;;  %2469 = vrot.lane.b32.xlu1 %v2134_v24, %s4335_s15 }
 0x53e   :  { %2307 = vst.msk [vmem:[#allocation5 + $0x38] sm:$0xff] %vm2299_vm8, %v5372_v15  ;;  %v1881_v43 = vpop.permute.xlu0 %1880 }
 0x53f   :  { %2404 = vst.msk [vmem:[#allocation5 + $0x38] sm:$0xff] %vm2396_vm9, %v5380_v20  ;;  %v2456_v39 = vpop.permute.xlu1 %2455  ;;  %v2514_v49 = vld [vmem:[#allocation5 + $0x20] sm:$0xff] }
 0x540   :  { %2501 = vst.msk [vmem:[#allocation5 + $0x38] sm:$0xff] %vm2493_vm10, %v5366_v3  ;;  %2499 = vst.msk [vmem:[#allocation5 + $0x28] sm:$0xff] %vm2493_vm10, %v2456_v39  ;;  %3923 = vmatprep.mubr.msk.f32.mxu1 %vm2535_vm11, %v2514_v49  ;;  %2376 = vrot.lane.b32.xlu0 %v2039_v35, %s4337_s30  ;;  %v2136_v20 = vld [vmem:[#allocation3 + $0x122] sm:$0xff]  ;;  %v2428_v3 = vld [vmem:[#allocation3 + $0x132] sm:$0xff] }
 0x541   :  { %1920 = vst.msk [vmem:[#allocation5 + $0x48] sm:$0xff] %vm1910_vm4, %v1881_v43  ;;  %2181 = vrot.lane.b32.xlu1 %v1845_v27, %s4338_s21 }
 0x542   :  { %v1978_v13 = vpop.permute.xlu0 %1977 }
 0x543   :  { %v2264_v15 = vpop.permute.xlu1 %2263  ;;  %2017 = vst.msk [vmem:[#allocation5 + $0x48] sm:$0xff] %vm2007_vm5, %v1978_v13 }
 0x544   :  { %2306 = vst.msk [vmem:[#allocation5 + $0x30] sm:$0xff] %vm2299_vm8, %v2264_v15  ;;  %2473 = vrot.lane.b32.xlu0 %v2136_v20, %s4335_s15 }
 0x545   :  { %2183 = vrot.lane.b32.xlu1 %v2136_v20, %s4338_s21 }
 0x546   :  { %v1786_v48 = vpop.permute.xlu0 %1785 }
 0x547   :  { %v1976_v52 = vpop.permute.xlu1 %1975  ;;  %v2515_v38 = vld [vmem:[#allocation5 + $0x28] sm:$0xff]  ;;  %1824 = vst.msk [vmem:[#allocation5 + $0x50] sm:$0xff] %vm1813_vm2, %v1786_v48  ;;  %v2517_v4 = vld [vmem:[#allocation5 + $0x38] sm:$0xff] }
 0x548   :  { %2016 = vst.msk [vmem:[#allocation5 + $0x40] sm:$0xff] %vm2007_vm5, %v1976_v52  ;;  %3924 = vmatmul.mubr.msk.f32.gmra.mrb[6].mxu1 %vm2535_vm11, %v2515_v38 }
 0x549   :  { %2475 = vrot.lane.b32.xlu1 %v2428_v3, %s4335_s15 }
 0x54a   :  { %v2170_v40 = vpop.permute.xlu0 %2169 }
 0x54b   :  { %v2361_v47 = vpop.permute.xlu1 %2360 }
 0x54c   :  { %2403 = vst.msk [vmem:[#allocation5 + $0x30] sm:$0xff] %vm2396_vm9, %v2361_v47 }
 0x54e   :  { %v1788_v50 = vpop.permute.xlu0 %1787 }
 0x54f   :  { %v2073_v51 = vpop.permute.xlu1 %2072  ;;  %1825 = vst.msk [vmem:[#allocation5 + $0x58] sm:$0xff] %vm1813_vm2, %v1788_v50 }
 0x550   :  { %2113 = vst.msk [vmem:[#allocation5 + $0x40] sm:$0xff] %vm2104_vm6, %v2073_v51 }
 0x551   :  { %2210 = vst.msk [vmem:[#allocation5 + $0x40] sm:$0xff] %vm2201_vm7, %v2170_v40 }
 0x552   :  { %v2172_v54 = vpop.permute.xlu0 %2171 }
 0x553   :  { %v2458_v55 = vpop.permute.xlu1 %2457 }
 0x554   :  { %2500 = vst.msk [vmem:[#allocation5 + $0x30] sm:$0xff] %vm2493_vm10, %v2458_v55 }
 0x556   :  { %v1885_v53 = vpop.permute.xlu0 %1884 }
 0x557   :  { %v2075_v58 = vpop.permute.xlu1 %2074  ;;  %1922 = vst.msk [vmem:[#allocation5 + $0x58] sm:$0xff] %vm1910_vm4, %v1885_v53 }
 0x558   :  { %2114 = vst.msk [vmem:[#allocation5 + $0x48] sm:$0xff] %vm2104_vm6, %v2075_v58 }
 0x559   :  { %2211 = vst.msk [vmem:[#allocation5 + $0x48] sm:$0xff] %vm2201_vm7, %v2172_v54 }
 0x55a   :  { %v2270_v57 = vpop.permute.xlu0 %2269 }
 0x55b   :  { %v1883_v61 = vpop.permute.xlu1 %1882  ;;  %v2516_v0 = vld [vmem:[#allocation5 + $0x30] sm:$0xff]  ;;  %2309 = vst.msk [vmem:[#allocation5 + $0x48] sm:$0xff] %vm2299_vm8, %v2270_v57 }
 0x55c   :  { %1921 = vst.msk [vmem:[#allocation5 + $0x50] sm:$0xff] %vm1910_vm4, %v1883_v61  ;;  %3926 = vmatprep.mubr.msk.f32.mxu1 %vm2535_vm11, %v2516_v0 }
 0x55d   :  { %3927 = vmatmul.mubr.msk.f32.gmra.mrb[8].mxu1 %vm2535_vm11, %v2517_v4 }
 0x55e   :  { %v1982_v56 = vpop.permute.xlu0 %1981 }
 0x55f   :  { %v2268_v7 = vpop.permute.xlu1 %2267  ;;  %2019 = vst.msk [vmem:[#allocation5 + $0x58] sm:$0xff] %vm2007_vm5, %v1982_v56 }
 0x560   :  { %2308 = vst.msk [vmem:[#allocation5 + $0x40] sm:$0xff] %vm2299_vm8, %v2268_v7 }
 0x562   :  { %v2367_v60 = vpop.permute.xlu0 %2366 }
 0x563   :  { %v1980_v9 = vpop.permute.xlu1 %1979  ;;  %2406 = vst.msk [vmem:[#allocation5 + $0x48] sm:$0xff] %vm2396_vm9, %v2367_v60 }
 0x564   :  { %2018 = vst.msk [vmem:[#allocation5 + $0x50] sm:$0xff] %vm2007_vm5, %v1980_v9 }
 0x566   :  { %v1790_v59 = vpop.permute.xlu0 %1789 }
 0x567   :  { %v2365_v10 = vpop.permute.xlu1 %2364  ;;  %1826 = vst.msk [vmem:[#allocation5 + $0x60] sm:$0xff] %vm1813_vm2, %v1790_v59 }
 0x568   :  { %2405 = vst.msk [vmem:[#allocation5 + $0x40] sm:$0xff] %vm2396_vm9, %v2365_v10 }
 0x56a   :  { %v2174_v63 = vpop.permute.xlu0 %2173 }
 0x56b   :  { %v2077_v12 = vpop.permute.xlu1 %2076 }
 0x56c   :  { %2115 = vst.msk [vmem:[#allocation5 + $0x50] sm:$0xff] %vm2104_vm6, %v2077_v12 }
 0x56d   :  { %2212 = vst.msk [vmem:[#allocation5 + $0x50] sm:$0xff] %vm2201_vm7, %v2174_v63 }
 0x56e   :  { %v1792_v62 = vpop.permute.xlu0 %1791 }
 0x56f   :  { %v2462_v41 = vpop.permute.xlu1 %2461  ;;  %1827 = vst.msk [vmem:[#allocation5 + $0x68] sm:$0xff] %vm1813_vm2, %v1792_v62 }
 0x570   :  { %2502 = vst.msk [vmem:[#allocation5 + $0x40] sm:$0xff] %vm2493_vm10, %v2462_v41 }
 0x572   :  { %v2176_v44 = vpop.permute.xlu0 %2175 }
 0x573   :  { %v2079_v16 = vpop.permute.xlu1 %2078 }
 0x574   :  { %2116 = vst.msk [vmem:[#allocation5 + $0x58] sm:$0xff] %vm2104_vm6, %v2079_v16 }
 0x575   :  { %2213 = vst.msk [vmem:[#allocation5 + $0x58] sm:$0xff] %vm2201_vm7, %v2176_v44 }
 0x576   :  { %v1889_v18 = vpop.permute.xlu0 %1888 }
 0x577   :  { %v2464_v17 = vpop.permute.xlu1 %2463  ;;  %v2518_v21 = vld [vmem:[#allocation5 + $0x40] sm:$0xff]  ;;  %1924 = vst.msk [vmem:[#allocation5 + $0x68] sm:$0xff] %vm1910_vm4, %v1889_v18 }
 0x578   :  { %2503 = vst.msk [vmem:[#allocation5 + $0x48] sm:$0xff] %vm2493_vm10, %v2464_v17  ;;  %3929 = vmatprep.mubr.msk.f32.mxu1 %vm2535_vm11, %v2518_v21 }
 0x57a   :  { %v2274_v23 = vpop.permute.xlu0 %2273 }
 0x57b   :  { %v1887_v22 = vpop.permute.xlu1 %1886  ;;  %2311 = vst.msk [vmem:[#allocation5 + $0x58] sm:$0xff] %vm2299_vm8, %v2274_v23 }
 0x57c   :  { %1923 = vst.msk [vmem:[#allocation5 + $0x60] sm:$0xff] %vm1910_vm4, %v1887_v22 }
 0x57e   :  { %v1986_v25 = vpop.permute.xlu0 %1985 }
 0x57f   :  { %v2272_v24 = vpop.permute.xlu1 %2271  ;;  %v2519_v26 = vld [vmem:[#allocation5 + $0x48] sm:$0xff]  ;;  %2021 = vst.msk [vmem:[#allocation5 + $0x68] sm:$0xff] %vm2007_vm5, %v1986_v25 }
 0x580   :  { %2310 = vst.msk [vmem:[#allocation5 + $0x50] sm:$0xff] %vm2299_vm8, %v2272_v24  ;;  %3930 = vmatmul.mubr.msk.f32.gmra.mrb[10].mxu1 %vm2535_vm11, %v2519_v26  ;;  %v2985_v26 = vld [vmem:[%s5978_s3] sm:$0xf] }
 0x582   :  { %v2371_v2 = vpop.permute.xlu0 %2370 }
 0x583   :  { %v1984_v27 = vpop.permute.xlu1 %1983  ;;  %2408 = vst.msk [vmem:[#allocation5 + $0x58] sm:$0xff] %vm2396_vm9, %v2371_v2  ;;  %v3598_v2 = vld [vmem:[%s5975_s0 + $0x20] ss:$2 sm:$0xff] }
 0x584   :  { %2020 = vst.msk [vmem:[#allocation5 + $0x60] sm:$0xff] %vm2007_vm5, %v1984_v27  ;;  %v2954_v27 = vld [vmem:[%s5975_s0] ss:$2 sm:$0xff] }
 0x586   :  { %v1794_v28 = vpop.permute.xlu0 %1793 }
 0x587   :  { %v2369_v6 = vpop.permute.xlu1 %2368  ;;  %1828 = vst.msk [vmem:[#allocation5 + $0x70] sm:$0xff] %vm1813_vm2, %v1794_v28  ;;  %v3600_v28 = vld [vmem:[%s5975_s0 + $0x60] ss:$2 sm:$0xff] }
 0x588   :  { %2407 = vst.msk [vmem:[#allocation5 + $0x50] sm:$0xff] %vm2396_vm9, %v2369_v6  ;;  %v3599_v6 = vld [vmem:[%s5975_s0 + $0x40] ss:$2 sm:$0xff] }
 0x58a   :  { %v2178_v5 = vpop.permute.xlu0 %2177 }
 0x58b   :  { %v2081_v29 = vpop.permute.xlu1 %2080 }
 0x58c   :  { %2117 = vst.msk [vmem:[#allocation5 + $0x60] sm:$0xff] %vm2104_vm6, %v2081_v29  ;;  %v3601_v29 = vld [vmem:[%s5975_s0 + $0x80] ss:$2 sm:$0xff] }
 0x58d   :  { %2214 = vst.msk [vmem:[#allocation5 + $0x60] sm:$0xff] %vm2201_vm7, %v2178_v5  ;;  %v3602_v5 = vld [vmem:[%s5975_s0 + $0xa0] ss:$2 sm:$0xff] }
 0x58e   :  { %v1796_v31 = vpop.permute.xlu0 %1795 }
 0x58f   :  { %v2466_v30 = vpop.permute.xlu1 %2465  ;;  %1829 = vst.msk [vmem:[#allocation5 + $0x78] sm:$0xff] %vm1813_vm2, %v1796_v31  ;;  %v3604_v31 = vld [vmem:[%s5975_s0 + $0xe0] ss:$2 sm:$0xff] }
 0x590   :  { %2504 = vst.msk [vmem:[#allocation5 + $0x50] sm:$0xff] %vm2493_vm10, %v2466_v30  ;;  %v3603_v30 = vld [vmem:[%s5975_s0 + $0xc0] ss:$2 sm:$0xff] }
 0x592   :  { %v2180_v33 = vpop.permute.xlu0 %2179 }
 0x593   :  { %v2083_v32 = vpop.permute.xlu1 %2082 }
 0x594   :  { %2118 = vst.msk [vmem:[#allocation5 + $0x68] sm:$0xff] %vm2104_vm6, %v2083_v32  ;;  %v3605_v32 = vld [vmem:[%s5975_s0 + $0x100] ss:$2 sm:$0xff] }
 0x595   :  { %2215 = vst.msk [vmem:[#allocation5 + $0x68] sm:$0xff] %vm2201_vm7, %v2180_v33  ;;  %v3606_v33 = vld [vmem:[%s5975_s0 + $0x120] ss:$2 sm:$0xff] }
 0x596   :  { %v1893_v35 = vpop.permute.xlu0 %1892 }
 0x597   :  { %v2468_v34 = vpop.permute.xlu1 %2467  ;;  %v2520_v45 = vld [vmem:[#allocation5 + $0x50] sm:$0xff]  ;;  %1926 = vst.msk [vmem:[#allocation5 + $0x78] sm:$0xff] %vm1910_vm4, %v1893_v35  ;;  %v3608_v35 = vld [vmem:[%s5975_s0 + $0x160] ss:$2 sm:$0xff] }
 0x598   :  { %2505 = vst.msk [vmem:[#allocation5 + $0x58] sm:$0xff] %vm2493_vm10, %v2468_v34  ;;  %3932 = vmatprep.mubr.msk.f32.mxu1 %vm2535_vm11, %v2520_v45  ;;  %v3607_v34 = vld [vmem:[%s5975_s0 + $0x140] ss:$2 sm:$0xff] }
 0x599   :  { %v3609_v45 = vld [vmem:[%s5975_s0 + $0x180] ss:$2 sm:$0xff] }
 0x59a   :  { %v2278_v46 = vpop.permute.xlu0 %2277 }
 0x59b   :  { %v1891_v36 = vpop.permute.xlu1 %1890  ;;  %2313 = vst.msk [vmem:[#allocation5 + $0x68] sm:$0xff] %vm2299_vm8, %v2278_v46  ;;  %v3611_v46 = vld [vmem:[%s5975_s0 + $0x1c0] ss:$2 sm:$0xff] }
 0x59c   :  { %1925 = vst.msk [vmem:[#allocation5 + $0x70] sm:$0xff] %vm1910_vm4, %v1891_v36  ;;  %v3610_v36 = vld [vmem:[%s5975_s0 + $0x1a0] ss:$2 sm:$0xff] }
 0x59e   :  { %v1990_v39 = vpop.permute.xlu0 %1989 }
 0x59f   :  { %v2276_v37 = vpop.permute.xlu1 %2275  ;;  %v2521_v43 = vld [vmem:[#allocation5 + $0x58] sm:$0xff]  ;;  %2023 = vst.msk [vmem:[#allocation5 + $0x78] sm:$0xff] %vm2007_vm5, %v1990_v39 }
 0x5a0   :  { %2312 = vst.msk [vmem:[#allocation5 + $0x60] sm:$0xff] %vm2299_vm8, %v2276_v37  ;;  %3933 = vmatmul.mubr.msk.f32.gmra.mrb[12].mxu1 %vm2535_vm11, %v2521_v43  ;;  %v3612_v37 = vld [vmem:[%s5975_s0 + $0x1e0] ss:$2 sm:$0xff] }
 0x5a2   :  { %v2375_v15 = vpop.permute.xlu0 %2374 }
 0x5a3   :  { %v1988_v49 = vpop.permute.xlu1 %1987  ;;  %2410 = vst.msk [vmem:[#allocation5 + $0x68] sm:$0xff] %vm2396_vm9, %v2375_v15 }
 0x5a4   :  { %2022 = vst.msk [vmem:[#allocation5 + $0x70] sm:$0xff] %vm2007_vm5, %v1988_v49 }
 0x5a6   :  { %v2087_v20 = vpop.permute.xlu0 %2086 }
 0x5a7   :  { %v2373_v13 = vpop.permute.xlu1 %2372  ;;  %2120 = vst.msk [vmem:[#allocation5 + $0x78] sm:$0xff] %vm2104_vm6, %v2087_v20 }
 0x5a8   :  { %2409 = vst.msk [vmem:[#allocation5 + $0x60] sm:$0xff] %vm2396_vm9, %v2373_v13 }
 0x5aa   :  { %v2472_v52 = vpop.permute.xlu0 %2471 }
 0x5ab   :  { %v2085_v3 = vpop.permute.xlu1 %2084  ;;  %2507 = vst.msk [vmem:[#allocation5 + $0x68] sm:$0xff] %vm2493_vm10, %v2472_v52 }
 0x5ac   :  { %2119 = vst.msk [vmem:[#allocation5 + $0x70] sm:$0xff] %vm2104_vm6, %v2085_v3 }
 0x5ae   :  { %v2280_v38 = vpop.permute.xlu0 %2279 }
 0x5af   :  { %v2470_v48 = vpop.permute.xlu1 %2469 }
 0x5b0   :  { %2506 = vst.msk [vmem:[#allocation5 + $0x60] sm:$0xff] %vm2493_vm10, %v2470_v48 }
 0x5b2   :  { %v2377_v40 = vpop.permute.xlu0 %2376  ;;  %v2523_v54 = vld [vmem:[#allocation5 + $0x68] sm:$0xff] }
 0x5b3   :  { %v2182_v47 = vpop.permute.xlu1 %2181 }
 0x5b4   :  { %2216 = vst.msk [vmem:[#allocation5 + $0x70] sm:$0xff] %vm2201_vm7, %v2182_v47 }
 0x5b5   :  { %2314 = vst.msk [vmem:[#allocation5 + $0x70] sm:$0xff] %vm2299_vm8, %v2280_v38 }
 0x5b6   :  { %2411 = vst.msk [vmem:[#allocation5 + $0x70] sm:$0xff] %vm2396_vm9, %v2377_v40  ;;  %v2474_v50 = vpop.permute.xlu0 %2473 }
 0x5b7   :  { %v2184_v51 = vpop.permute.xlu1 %2183  ;;  %v2522_v55 = vld [vmem:[#allocation5 + $0x60] sm:$0xff]  ;;  %2508 = vst.msk [vmem:[#allocation5 + $0x70] sm:$0xff] %vm2493_vm10, %v2474_v50 }
 0x5b8   :  { %2217 = vst.msk [vmem:[#allocation5 + $0x78] sm:$0xff] %vm2201_vm7, %v2184_v51  ;;  %3935 = vmatprep.mubr.msk.f32.mxu1 %vm2535_vm11, %v2522_v55 }
 0x5b9   :  { %2315 = vst.msk [vmem:[#allocation5 + $0x78] sm:$0xff] %vm2299_vm8, %v5370_v14  ;;  %3936 = vmatmul.mubr.msk.f32.gmra.mrb[14].mxu1 %vm2535_vm11, %v2523_v54 }
 0x5ba   :  { %2412 = vst.msk [vmem:[#allocation5 + $0x78] sm:$0xff] %vm2396_vm9, %v5378_v19 }
 0x5bb   :  { %v2476_v58 = vpop.permute.xlu1 %2475 }
 0x5bc   :  { %2509 = vst.msk [vmem:[#allocation5 + $0x78] sm:$0xff] %vm2493_vm10, %v2476_v58 }
 0x5be   :  { %v2524_v53 = vld [vmem:[#allocation5 + $0x70] sm:$0xff] }
 0x5bf   :  { %3938 = vmatprep.mubr.msk.f32.mxu1 %vm2535_vm11, %v2524_v53 }
 0x5c3   :  { %v2525_v61 = vld [vmem:[#allocation5 + $0x78] sm:$0xff] }
 0x5c4   :  { %3939 = vmatmul.mubr.msk.f32.gmra.mrb[16].mxu1 %vm2535_vm11, %v2525_v61 }
 0x5c5   :  { %4008 = vmatprep.mubr.msk.f32.mxu1 %vm4333_vm13, %v4323_v1 }
 0x5db   :  { %v5605_v57 = vpop.f32.mrb[2].mxu1 }
 0x5dc   :  { %v5607_v14 = vpop.f32.mrb[3].mxu1 }
 0x5dd   :  { %v4180_v0 = vpack.c.bf16 %v5605_v57, %v5607_v14 }
 0x5df   :  { %4181 = vmatpush3.bf16.msra.mxu0 %v4180_v0 }
 0x5e0   :  { %4182 = vmatprep.subr.bf16.mxu0 %v4332_v42 }
 0x5fb   :  { %v5612_v19 = vpop.f32.mrb[4].mxu1 }
 0x5fc   :  { %v5614_v4 = vpop.f32.mrb[5].mxu1 }
 0x5fd   :  { %v4183_v7 = vpack.c.bf16 %v5612_v19, %v5614_v4 }
 0x5ff   :  { %4184 = vmatpush3.bf16.msra.mxu0 %v4183_v7 }
 0x600   :  { %4185 = vmatprep.subr.bf16.mxu0 %v4332_v42 }
 0x61b   :  { %v5619_v56 = vpop.f32.mrb[6].mxu1 }
 0x61c   :  { %v5621_v9 = vpop.f32.mrb[7].mxu1 }
 0x61d   :  { %v4186_v60 = vpack.c.bf16 %v5619_v56, %v5621_v9 }
 0x61f   :  { %4187 = vmatpush3.bf16.msra.mxu0 %v4186_v60 }
 0x620   :  { %4188 = vmatprep.subr.bf16.mxu0 %v4332_v42 }
 0x630   :  { %v5626_v10 = vpop.f32.mrb[8].mxu1 }
 0x631   :  { %v5628_v59 = vpop.f32.mrb[9].mxu1 }
 0x632   :  { %v4189_v12 = vpack.c.bf16 %v5626_v10, %v5628_v59 }
 0x634   :  { %4190 = vmatpush3.bf16.msra.mxu0 %v4189_v12 }
 0x635   :  { %4191 = vmatprep.subr.bf16.mxu0 %v4332_v42 }
 0x653   :  { %v5633_v63 = vpop.f32.mrb[10].mxu1 }
 0x654   :  { %v5635_v41 = vpop.f32.mrb[11].mxu1 }
 0x655   :  { %v4192_v62 = vpack.c.bf16 %v5633_v63, %v5635_v41 }
 0x657   :  { %4193 = vmatpush3.bf16.msra.mxu0 %v4192_v62 }
 0x658   :  { %4194 = vmatprep.subr.bf16.mxu0 %v4332_v42 }
 0x673   :  { %v5640_v16 = vpop.f32.mrb[12].mxu1 }
 0x674   :  { %v5642_v44 = vpop.f32.mrb[13].mxu1 }
 0x675   :  { %v4195_v17 = vpack.c.bf16 %v5640_v16, %v5642_v44 }
 0x677   :  { %4196 = vmatpush3.bf16.msra.mxu0 %v4195_v17 }
 0x678   :  { %4197 = vmatprep.subr.bf16.mxu0 %v4332_v42 }
 0x68c   :  { %v5647_v18 = vpop.f32.mrb[14].mxu1 }
 0x68d   :  { %v5649_v21 = vpop.f32.mrb[15].mxu1 }
 0x68e   :  { %v4198_v22 = vpack.c.bf16 %v5647_v18, %v5649_v21 }
 0x690   :  { %4199 = vmatpush3.bf16.msra.mxu0 %v4198_v22 }
 0x691   :  { %4200 = vmatprep.subr.bf16.mxu0 %v4332_v42 }
 0x697   :  { %v5654_v23 = vpop.f32.mrb[16].mxu1 }
 0x698   :  { %v5656_v24 = vpop.f32.mrb[17].mxu1 }
 0x699   :  { %v4201_v25 = vpack.c.bf16 %v5654_v23, %v5656_v24 }
 0x69b   :  { %4202 = vmatpush3.bf16.msra.mxu0 %v4201_v25 }
 0x69c   :  { %4011 = vmatprep.subr.msk.mxu0 %vm1250_vm3, %v2985_v26 }
 0x69e   :  { %3974 = vmatmul.mubr.f32.vlgmr.msra.gmra.mrb[18].mxu0 %v4334_v8 }
 0x69f   :  { %4012 = vmatpush3.msk.msra.mxu0 %vm1250_vm3, %v2985_v26  ;;  %4013 = vmatprep.mubr.msk.f32.mxu0 %vm85_vm0, %v2954_v27 }
 0x6a0   :  { %4227 = vmatprep.subr.bf16.mxu0 %v4332_v42 }
 0x6a2   :  { %4014 = vmatmul.mubr.msk.f32.vlgmr.msra.gmra.mrb[20].mxu0 %vm85_vm0, %v3598_v2 }
 0x6a3   :  { %4016 = vmatprep.mubr.msk.f32.mxu0 %vm85_vm0, %v3599_v6 }
 0x6a6   :  { %4017 = vmatmul.mubr.msk.f32.gmra.mrb[22].mxu0 %vm85_vm0, %v3600_v28 }
 0x6a7   :  { %4019 = vmatprep.mubr.msk.f32.mxu0 %vm85_vm0, %v3601_v29 }
 0x6aa   :  { %4020 = vmatmul.mubr.msk.f32.gmra.mrb[24].mxu0 %vm85_vm0, %v3602_v5 }
 0x6ab   :  { %4022 = vmatprep.mubr.msk.f32.mxu0 %vm85_vm0, %v3603_v30 }
 0x6ae   :  { %4023 = vmatmul.mubr.msk.f32.gmra.mrb[26].mxu0 %vm85_vm0, %v3604_v31 }
 0x6af   :  { %4025 = vmatprep.mubr.msk.f32.mxu0 %vm85_vm0, %v3605_v32 }
 0x6b2   :  { %4026 = vmatmul.mubr.msk.f32.gmra.mrb[28].mxu0 %vm85_vm0, %v3606_v33 }
 0x6b3   :  { %4028 = vmatprep.mubr.msk.f32.mxu0 %vm85_vm0, %v3607_v34 }
 0x6b6   :  { %4029 = vmatmul.mubr.msk.f32.gmra.mrb[30].mxu0 %vm85_vm0, %v3608_v35 }
 0x6b7   :  { %4031 = vmatprep.mubr.msk.f32.mxu0 %vm85_vm0, %v3609_v45 }
 0x6ba   :  { %4032 = vmatmul.mubr.msk.f32.gmra.mrb[32].mxu0 %vm85_vm0, %v3610_v36 }
 0x6bb   :  { %4034 = vmatprep.mubr.msk.f32.mxu0 %vm85_vm0, %v3611_v46 }
 0x6be   :  { %4035 = vmatmul.mubr.msk.f32.gmra.mrb[34].mxu0 %vm85_vm0, %v3612_v37 }
 0x6bf   :  { %4069 = vmatprep.mubr.msk.f32.mxu0 %vm4333_vm13, %v4323_v1 }
 0x771   :  { %v2797_v39 = vpop.f32.mrb[18].mxu0 }
 0x772   :  { %v5733_v43 = vmul.f32 0.0078125, %v2797_v39  ;;  %v3975_v49 = vpop.f32.mrb[19].mxu0 }
 0x774   :  { %v2805_v15 = vrot.slane %v5733_v43, %v5068_v11 }
 0x775   :  { %v5737_v13 = vpop.f32.mrb[20].mxu0 }
 0x776   :  { %v5739_v20 = vpop.f32.mrb[21].mxu0  ;;  %v2806_v3 = vsub.f32 %v5607_v14, %v2805_v15  ;;  %v2807_v52 = vsub.f32 %v5605_v57, %v2805_v15  ;;  %v2808_v48 = vsub.f32 %v5614_v4, %v2805_v15  ;;  %v2809_v38 = vsub.f32 %v5612_v19, %v2805_v15 }
 0x777   :  { %v4228_v47 = vpack.c.bf16 %v5737_v13, %v5739_v20  ;;  %v2810_v40 = vsub.f32 %v5621_v9, %v2805_v15  ;;  %v2811_v51 = vsub.f32 %v5619_v56, %v2805_v15  ;;  %v2812_v50 = vsub.f32 %v5628_v59, %v2805_v15 }
 0x778   :  { %v2822_v55 = vmul.f32 %v2806_v3, %v2806_v3  ;;  %v2823_v54 = vmul.f32 %v2807_v52, %v2807_v52  ;;  %v2824_v58 = vmul.f32 %v2808_v48, %v2808_v48  ;;  %v2825_v53 = vmul.f32 %v2809_v38, %v2809_v38 }
 0x779   :  { %v5750_v61 = vpop.f32.mrb[22].mxu0  ;;  %4229 = vmatpush3.bf16.msra.mxu0 %v4228_v47  ;;  %v2826_v0 = vmul.f32 %v2810_v40, %v2810_v40  ;;  %v2827_v7 = vmul.f32 %v2811_v51, %v2811_v51  ;;  %v2813_v60 = vsub.f32 %v5626_v10, %v2805_v15  ;;  %v2828_v12 = vmul.f32 %v2812_v50, %v2812_v50 }
 0x77a   :  { %v5753_v62 = vpop.f32.mrb[23].mxu0  ;;  %v4204_v17 = vpack.c.bf16 %v2823_v54, %v2822_v55  ;;  %4230 = vmatprep.subr.bf16.mxu0 %v4332_v42  ;;  %v4207_v22 = vpack.c.bf16 %v2825_v53, %v2824_v58  ;;  %v2814_v25 = vsub.f32 %v5635_v41, %v2805_v15  ;;  %v2815_v26 = vsub.f32 %v5633_v63, %v2805_v15 }
 0x77b   :  { %v4231_v27 = vpack.c.bf16 %v5750_v61, %v5753_v62  ;;  %v4210_v2 = vpack.c.bf16 %v2827_v7, %v2826_v0  ;;  %v2829_v6 = vmul.f32 %v2813_v60, %v2813_v60  ;;  %v2816_v28 = vsub.f32 %v5642_v44, %v2805_v15 }
 0x77c   :  { %4205 = vmatpush3.bf16.msra.mxu1 %v4204_v17  ;;  %v2830_v29 = vmul.f32 %v2814_v25, %v2814_v25  ;;  %v2831_v5 = vmul.f32 %v2815_v26, %v2815_v26  ;;  %v2817_v30 = vsub.f32 %v5640_v16, %v2805_v15  ;;  %v2818_v31 = vsub.f32 %v5649_v21, %v2805_v15 }
 0x77d   :  { %v5763_v32 = vpop.f32.mrb[24].mxu0  ;;  %4232 = vmatpush3.bf16.msra.mxu0 %v4231_v27  ;;  %4206 = vmatprep.subr.bf16.mxu1 %v4332_v42  ;;  %v4213_v33 = vpack.c.bf16 %v2829_v6, %v2828_v12  ;;  %v2832_v34 = vmul.f32 %v2816_v28, %v2816_v28  ;;  %v2819_v35 = vsub.f32 %v5647_v18, %v2805_v15 }
 0x77e   :  { %v5767_v45 = vpop.f32.mrb[25].mxu0  ;;  %4233 = vmatprep.subr.bf16.mxu0 %v4332_v42  ;;  %v4216_v36 = vpack.c.bf16 %v2831_v5, %v2830_v29  ;;  %v2833_v46 = vmul.f32 %v2817_v30, %v2817_v30  ;;  %v2834_v37 = vmul.f32 %v2818_v31, %v2818_v31  ;;  %v2820_v39 = vsub.f32 %v5656_v24, %v2805_v15 }
 0x77f   :  { %v4234_v49 = vpack.c.bf16 %v5763_v32, %v5767_v45  ;;  %v2835_v3 = vmul.f32 %v2819_v35, %v2819_v35  ;;  %v2821_v52 = vsub.f32 %v5654_v23, %v2805_v15 }
 0x780   :  { %4208 = vmatpush3.bf16.msra.mxu1 %v4207_v22  ;;  %v4219_v48 = vpack.c.bf16 %v2833_v46, %v2832_v34  ;;  %v2836_v38 = vmul.f32 %v2820_v39, %v2820_v39 }
 0x781   :  { %v5774_v47 = vpop.f32.mrb[26].mxu0  ;;  %4235 = vmatpush3.bf16.msra.mxu0 %v4234_v49  ;;  %4209 = vmatprep.subr.bf16.mxu1 %v4332_v42  ;;  %v4222_v40 = vpack.c.bf16 %v2835_v3, %v2834_v37  ;;  %v2837_v51 = vmul.f32 %v2821_v52, %v2821_v52 }
 0x782   :  { %v5777_v50 = vpop.f32.mrb[27].mxu0  ;;  %4236 = vmatprep.subr.bf16.mxu0 %v4332_v42 }
 0x783   :  { %v4237_v55 = vpack.c.bf16 %v5774_v47, %v5777_v50  ;;  %v4225_v54 = vpack.c.bf16 %v2837_v51, %v2836_v38 }
 0x784   :  { %4211 = vmatpush3.bf16.msra.mxu1 %v4210_v2 }
 0x785   :  { %v5782_v15 = vpop.f32.mrb[28].mxu0  ;;  %4238 = vmatpush3.bf16.msra.mxu0 %v4237_v55  ;;  %4212 = vmatprep.subr.bf16.mxu1 %v4332_v42 }
 0x786   :  { %v5785_v58 = vpop.f32.mrb[29].mxu0  ;;  %4239 = vmatprep.subr.bf16.mxu0 %v4332_v42 }
 0x787   :  { %v4240_v53 = vpack.c.bf16 %v5782_v15, %v5785_v58 }
 0x788   :  { %4214 = vmatpush3.bf16.msra.mxu1 %v4213_v33 }
 0x789   :  { %v5790_v0 = vpop.f32.mrb[30].mxu0  ;;  %4241 = vmatpush3.bf16.msra.mxu0 %v4240_v53  ;;  %4215 = vmatprep.subr.bf16.mxu1 %v4332_v42 }
 0x78a   :  { %v5793_v7 = vpop.f32.mrb[31].mxu0  ;;  %4242 = vmatprep.subr.bf16.mxu0 %v4332_v42 }
 0x78b   :  { %v4243_v60 = vpack.c.bf16 %v5790_v0, %v5793_v7 }
 0x78c   :  { %4217 = vmatpush3.bf16.msra.mxu1 %v4216_v36 }
 0x78d   :  { %v5798_v12 = vpop.f32.mrb[32].mxu0  ;;  %4244 = vmatpush3.bf16.msra.mxu0 %v4243_v60  ;;  %4218 = vmatprep.subr.bf16.mxu1 %v4332_v42 }
 0x78e   :  { %v5801_v17 = vpop.f32.mrb[33].mxu0  ;;  %4245 = vmatprep.subr.bf16.mxu0 %v4332_v42 }
 0x78f   :  { %v4246_v22 = vpack.c.bf16 %v5798_v12, %v5801_v17 }
 0x790   :  { %4220 = vmatpush3.bf16.msra.mxu1 %v4219_v48 }
 0x791   :  { %v5806_v25 = vpop.f32.mrb[34].mxu0  ;;  %4247 = vmatpush3.bf16.msra.mxu0 %v4246_v22  ;;  %4221 = vmatprep.subr.bf16.mxu1 %v4332_v42 }
 0x792   :  { %v5809_v26 = vpop.f32.mrb[35].mxu0  ;;  %4248 = vmatprep.subr.bf16.mxu0 %v4332_v42 }
 0x793   :  { %v4249_v27 = vpack.c.bf16 %v5806_v25, %v5809_v26 }
 0x794   :  { %4223 = vmatpush3.bf16.msra.mxu1 %v4222_v40 }
 0x795   :  { %4250 = vmatpush3.bf16.msra.mxu0 %v4249_v27  ;;  %4224 = vmatprep.subr.bf16.mxu1 %v4332_v42 }
 0x798   :  { %4226 = vmatpush3.bf16.msra.mxu1 %v4225_v54  ;;  %4070 = vmatmul.mubr.f32.vlgmr.msra.gmra.mrb[36].mxu0 %v4334_v8 }
 0x799   :  { %4251 = vmatprep.subr.bf16.mxu1 %v4332_v42 }
 0x79b   :  { %4009 = vmatmul.mubr.f32.vlgmr.msra.gmra.mrb[18].mxu1 %v4334_v8 }
 0x79c   :  { %4104 = vmatprep.mubr.msk.f32.mxu1 %vm4333_vm13, %v4323_v1 }
 0x86b   :  { %v3250_v2 = vpop.f32.mrb[36].mxu0 }
 0x86c   :  { %v5820_v6 = vmul.f32 0.0078125, %v3250_v2  ;;  %v4071_v28 = vpop.f32.mrb[37].mxu0 }
 0x86e   :  { %v3258_v29 = vrot.slane %v5820_v6, %v5068_v11  ;;  %v2904_v5 = vpop.f32.mrb[18].mxu1 }
 0x86f   :  { %v2908_v30 = vmul.f32 0.0078125, %v2904_v5  ;;  %v4010_v31 = vpop.f32.mrb[19].mxu1 }
 0x870   :  { %v3259_v33 = vsub.f32 %v5739_v20, %v3258_v29  ;;  %v3260_v34 = vsub.f32 %v5737_v13, %v3258_v29  ;;  %v3261_v35 = vsub.f32 %v5753_v62, %v3258_v29  ;;  %v3262_v36 = vsub.f32 %v5750_v61, %v3258_v29 }
 0x871   :  { %v2909_v46 = vadd.f32 1e-05, %v2908_v30  ;;  %v3263_v1 = vsub.f32 %v5767_v45, %v3258_v29  ;;  %v3264_v37 = vsub.f32 %v5763_v32, %v3258_v29  ;;  %v3265_v39 = vsub.f32 %v5777_v50, %v3258_v29 }
 0x872   :  { %v3275_v49 = vmul.f32 %v3259_v33, %v3259_v33  ;;  %v3276_v3 = vmul.f32 %v3260_v34, %v3260_v34  ;;  %v3277_v52 = vmul.f32 %v3261_v35, %v3261_v35  ;;  %v3278_v48 = vmul.f32 %v3262_v36, %v3262_v36 }
 0x873   :  { %4295 = vrsqrt.f32 %v2909_v46  ;;  %v3279_v38 = vmul.f32 %v3263_v1, %v3263_v1  ;;  %v3280_v40 = vmul.f32 %v3264_v37, %v3264_v37  ;;  %v3266_v51 = vsub.f32 %v5774_v47, %v3258_v29 }
 0x874   :  { %v4252_v55 = vpack.c.bf16 %v3276_v3, %v3275_v49  ;;  %v4255_v54 = vpack.c.bf16 %v3278_v48, %v3277_v52  ;;  %v3281_v53 = vmul.f32 %v3265_v39, %v3265_v39  ;;  %v3267_v60 = vsub.f32 %v5785_v58, %v3258_v29 }
 0x875   :  { %v4258_v22 = vpack.c.bf16 %v3280_v40, %v3279_v38  ;;  %v3282_v27 = vmul.f32 %v3266_v51, %v3266_v51  ;;  %v3268_v2 = vsub.f32 %v5782_v15, %v3258_v29  ;;  %v3269_v28 = vsub.f32 %v5793_v7, %v3258_v29  ;;  %v2729_v51 = vld [vmem:[%s5979_s4 + $0x2] sm:$0x1] }
 0x876   :  { %4253 = vmatpush3.bf16.msra.mxu1 %v4252_v55  ;;  %v3283_v5 = vmul.f32 %v3267_v60, %v3267_v60  ;;  %v3270_v30 = vsub.f32 %v5790_v0, %v3258_v29  ;;  %v3271_v31 = vsub.f32 %v5801_v17, %v3258_v29  ;;  %v3272_v33 = vsub.f32 %v5798_v12, %v3258_v29 }
 0x877   :  { %4254 = vmatprep.subr.bf16.mxu1 %v4332_v42  ;;  %v4261_v34 = vpack.c.bf16 %v3282_v27, %v3281_v53  ;;  %v3284_v35 = vmul.f32 %v3268_v2, %v3268_v2  ;;  %v3285_v36 = vmul.f32 %v3269_v28, %v3269_v28  ;;  %v3273_v46 = vsub.f32 %v5809_v26, %v3258_v29 }
 0x878   :  { %v3286_v1 = vmul.f32 %v3270_v30, %v3270_v30  ;;  %v3287_v37 = vmul.f32 %v3271_v31, %v3271_v31  ;;  %v3288_v39 = vmul.f32 %v3272_v33, %v3272_v33  ;;  %v3274_v49 = vsub.f32 %v5806_v25, %v3258_v29  ;;  %v2730_v29 = vld [vmem:[%s5979_s4 + $0x3] sm:$0x1] }
 0x879   :  { %v4264_v3 = vpack.c.bf16 %v3284_v35, %v3283_v5  ;;  %v3289_v52 = vmul.f32 %v3273_v46, %v3273_v46 }
 0x87a   :  { %4256 = vmatpush3.bf16.msra.mxu1 %v4255_v54  ;;  %v4267_v48 = vpack.c.bf16 %v3286_v1, %v3285_v36  ;;  %v4270_v38 = vpack.c.bf16 %v3288_v39, %v3287_v37  ;;  %v3290_v40 = vmul.f32 %v3274_v49, %v3274_v49 }
 0x87b   :  { %4257 = vmatprep.subr.bf16.mxu1 %v4332_v42 }
 0x87c   :  { %v4273_v55 = vpack.c.bf16 %v3290_v40, %v3289_v52 }
 0x87d   :  { %v4296_v53 = vpop.eup %4295 }
 0x87e   :  { %v2911_v60 = vmul.f32 %v4296_v53, %v2729_v51  ;;  %4259 = vmatpush3.bf16.msra.mxu1 %v4258_v22 }
 0x87f   :  { %4260 = vmatprep.subr.bf16.mxu1 %v4332_v42 }
 0x880   :  { %v2912_v54 = vmul.f32 %v2911_v60, %v5733_v43  ;;  %v2917_v27 = vrot.slane %v2911_v60, %v5068_v11 }
 0x882   :  { %v2913_v2 = vsub.f32 %v2730_v29, %v2912_v54  ;;  %4262 = vmatpush3.bf16.msra.mxu1 %v4261_v34  ;;  %v2918_v28 = vmul.f32 %v2917_v27, %v5607_v14  ;;  %v2919_v5 = vmul.f32 %v5605_v57, %v2917_v27  ;;  %v2920_v30 = vmul.f32 %v2917_v27, %v5614_v4 }
 0x883   :  { %4263 = vmatprep.subr.bf16.mxu1 %v4332_v42  ;;  %v2921_v22 = vmul.f32 %v5612_v19, %v2917_v27  ;;  %v2922_v31 = vmul.f32 %v2917_v27, %v5621_v9  ;;  %v2923_v33 = vmul.f32 %v5619_v56, %v2917_v27  ;;  %v2924_v43 = vmul.f32 %v2917_v27, %v5628_v59 }
 0x884   :  { %v2937_v35 = vrot.slane %v2913_v2, %v5068_v11  ;;  %v2925_v34 = vmul.f32 %v5626_v10, %v2917_v27  ;;  %v2926_v14 = vmul.f32 %v2917_v27, %v5635_v41  ;;  %v2927_v57 = vmul.f32 %v5633_v63, %v2917_v27 }
 0x885   :  { %v2928_v4 = vmul.f32 %v2917_v27, %v5642_v44  ;;  %v2929_v36 = vmul.f32 %v5640_v16, %v2917_v27  ;;  %v2930_v19 = vmul.f32 %v2917_v27, %v5649_v21  ;;  %v2931_v9 = vmul.f32 %v5647_v18, %v2917_v27 }
 0x886   :  { %4265 = vmatpush3.bf16.msra.mxu1 %v4264_v3  ;;  %v2932_v56 = vmul.f32 %v2917_v27, %v5656_v24  ;;  %v2933_v59 = vmul.f32 %v5654_v23, %v2917_v27  ;;  %v5869_v46 = vadd.f32 %v2937_v35, %v2918_v28  ;;  %v5871_v10 = vadd.f32 %v2937_v35, %v2919_v5 }
 0x887   :  { %4266 = vmatprep.subr.bf16.mxu1 %v4332_v42  ;;  %v5874_v63 = vadd.f32 %v2937_v35, %v2920_v30  ;;  %v5876_v41 = vadd.f32 %v2937_v35, %v2921_v22  ;;  %v5878_v16 = vadd.f32 %v2937_v35, %v2922_v31  ;;  %v5880_v44 = vadd.f32 %v2937_v35, %v2923_v33 }
 0x888   :  { %v5882_v18 = vadd.f32 %v2937_v35, %v2924_v43  ;;  %v5884_v21 = vadd.f32 %v2937_v35, %v2925_v34  ;;  %v5886_v24 = vadd.f32 %v2937_v35, %v2926_v14  ;;  %v5888_v23 = vadd.f32 %v2937_v35, %v2927_v57 }
 0x889   :  { %v5890_v1 = vadd.f32 %v2937_v35, %v2928_v4  ;;  %v5892_v37 = vadd.f32 %v2937_v35, %v2929_v36  ;;  %v5894_v39 = vadd.f32 %v2937_v35, %v2930_v19  ;;  %v5896_v49 = vadd.f32 %v2937_v35, %v2931_v9 }
 0x88a   :  { %4268 = vmatpush3.bf16.msra.mxu1 %v4267_v48  ;;  %v5898_v3 = vadd.f32 %v2937_v35, %v2932_v56  ;;  %v5900_v52 = vadd.f32 %v2937_v35, %v2933_v59  ;;  %v3182_v48 = vld [vmem:[%s5979_s4 + $0x4] sm:$0x1] }
 0x88b   :  { %4269 = vmatprep.subr.bf16.mxu1 %v4332_v42 }
 0x88e   :  { %4271 = vmatpush3.bf16.msra.mxu1 %v4270_v38  ;;  %v3183_v38 = vld [vmem:[%s5979_s4 + $0x5] sm:$0x1]  ;;  %s4339_s4 = smov [#allocation6]  }
 0x88f   :  { %4272 = vmatprep.subr.bf16.mxu1 %v4332_v42  ;;  %s3460_s28 = sshll.u32 %s4339_s4, 4  ;;  %s3461_s28 = int_to_ptr.vmem [resolvable:$true] %s3460_s28 }
 0x890   :  { %s4299_s29 = scalar_lea.vmem %s3461_s28, 2048  ;;  %p4304_p1 = scmp.lt.s32.totalorder %s3461_s28, %s3461_s28 }
 0x891   :  { %p4300_p0 = scmp.ne.s32.totalorder %s3461_s28, %s4299_s29  ;;  %p4305_p2 = scmp.lt.s32.totalorder %s4299_s29, %s4299_s29 }
 0x892   :  { %4274 = vmatpush3.bf16.msra.mxu1 %v4273_v55 }
 0x893   :  { %p4306_p3 = por %p4305_p2, %p4304_p1 }
 0x895   :  { %4105 = vmatmul.mubr.f32.vlgmr.msra.gmra.mrb[20].mxu1 %v4334_v8  ;;  %p4307_p4 = pnand %p4306_p3, %p4300_p0 }
 0x968   :  { %v3357_v40 = vpop.f32.mrb[20].mxu1 }
 0x969   :  { %v3361_v51 = vmul.f32 0.0078125, %v3357_v40  ;;  %v4106_v53 = vpop.f32.mrb[21].mxu1 }
 0x96b   :  { %v3362_v60 = vadd.f32 1e-05, %v3361_v51 }
 0x96d   :  { %4297 = vrsqrt.f32 %v3362_v60 }
 0x977   :  { %v4298_v29 = vpop.eup %4297 }
 0x978   :  { %v3364_v54 = vmul.f32 %v4298_v29, %v3182_v48 }
 0x97a   :  { %v3365_v42 = vmul.f32 %v3364_v54, %v5820_v6  ;;  %v3370_v55 = vrot.slane %v3364_v54, %v5068_v11 }
 0x97c   :  { %v3366_v8 = vsub.f32 %v3183_v38, %v3365_v42  ;;  %v3371_v27 = vmul.f32 %v3370_v55, %v5739_v20  ;;  %v3372_v2 = vmul.f32 %v5737_v13, %v3370_v55  ;;  %v3373_v28 = vmul.f32 %v3370_v55, %v5753_v62 }
 0x97d   :  { %v3374_v5 = vmul.f32 %v5750_v61, %v3370_v55  ;;  %v3375_v30 = vmul.f32 %v3370_v55, %v5767_v45  ;;  %v3376_v22 = vmul.f32 %v5763_v32, %v3370_v55  ;;  %v3377_v31 = vmul.f32 %v3370_v55, %v5777_v50 }
 0x97e   :  { %v3390_v33 = vrot.slane %v3366_v8, %v5068_v11  ;;  %v3378_v6 = vmul.f32 %v5774_v47, %v3370_v55  ;;  %v3379_v43 = vmul.f32 %v3370_v55, %v5785_v58  ;;  %v3380_v20 = vmul.f32 %v5782_v15, %v3370_v55 }
 0x97f   :  { %v3381_v13 = vmul.f32 %v3370_v55, %v5793_v7  ;;  %v3382_v62 = vmul.f32 %v5790_v0, %v3370_v55  ;;  %v3383_v61 = vmul.f32 %v3370_v55, %v5801_v17  ;;  %v3384_v45 = vmul.f32 %v5798_v12, %v3370_v55 }
 0x980   :  { %v3385_v32 = vmul.f32 %v3370_v55, %v5809_v26  ;;  %v3386_v50 = vmul.f32 %v5806_v25, %v3370_v55  ;;  %v3391_v35 = vadd.f32 %v3390_v33, %v3371_v27  ;;  %v3392_v11 = vadd.f32 %v3390_v33, %v3372_v2 }
 0x981   :  { %v3393_v34 = vadd.f32 %v3390_v33, %v3373_v28  ;;  %v3394_v47 = vadd.f32 %v3390_v33, %v3374_v5  ;;  %v3395_v14 = vadd.f32 %v3390_v33, %v3375_v30  ;;  %v3396_v58 = vadd.f32 %v3390_v33, %v3376_v22 }
 0x982   :  { %v3397_v57 = vadd.f32 %v3390_v33, %v3377_v31  ;;  %v3398_v15 = vadd.f32 %v3390_v33, %v3378_v6  ;;  %v3399_v4 = vadd.f32 %v3390_v33, %v3379_v43  ;;  %v3400_v7 = vadd.f32 %v3390_v33, %v3380_v20 }
 0x983   :  { %v3401_v36 = vadd.f32 %v3390_v33, %v3381_v13  ;;  %v3402_v0 = vadd.f32 %v3390_v33, %v3382_v62  ;;  %v3403_v19 = vadd.f32 %v3390_v33, %v3383_v61  ;;  %v3404_v17 = vadd.f32 %v3390_v33, %v3384_v45 }
 0x984   :  { %v3405_v9 = vadd.f32 %v3390_v33, %v3385_v32  ;;  %v3406_v12 = vadd.f32 %v3390_v33, %v3386_v50  ;;  %v3407_v26 = vadd.f32 %v3391_v35, %v5869_v46  ;;  %v3408_v25 = vadd.f32 %v3392_v11, %v5871_v10 }
 0x985   :  { %v3409_v56 = vadd.f32 %v3393_v34, %v5874_v63  ;;  %v3410_v59 = vadd.f32 %v3394_v47, %v5876_v41  ;;  %v3411_v40 = vadd.f32 %v3395_v14, %v5878_v16  ;;  %v3412_v51 = vadd.f32 %v3396_v58, %v5880_v44 }
 0x986   :  { %v3413_v53 = vadd.f32 %v3397_v57, %v5882_v18  ;;  %v3414_v60 = vadd.f32 %v3398_v15, %v5884_v21  ;;  %v3415_v48 = vadd.f32 %v3399_v4, %v5886_v24  ;;  %v3416_v29 = vadd.f32 %v3400_v7, %v5888_v23 }
 0x987   :  { %v3417_v46 = vadd.f32 %v3401_v36, %v5890_v1  ;;  %v3418_v10 = vadd.f32 %v3402_v0, %v5892_v37  ;;  %v3419_v63 = vadd.f32 %v3403_v19, %v5894_v39  ;;  %v3420_v41 = vadd.f32 %v3404_v17, %v5896_v49 }
 0x988   :  { %v3421_v16 = vadd.f32 %v3405_v9, %v5898_v3  ;;  %v3422_v44 = vadd.f32 %v3406_v12, %v5900_v52  ;;  %v3423_v54 = vmax.f32 %v3407_v26, 0.0  ;;  %v3424_v18 = vmax.f32 %v3408_v25, 0.0 }
 0x989   :  { %v3425_v38 = vmax.f32 %v3409_v56, 0.0  ;;  %v3426_v21 = vmax.f32 %v3410_v59, 0.0  ;;  %v3427_v42 = vmax.f32 %v3411_v40, 0.0  ;;  %v3428_v24 = vmax.f32 %v3412_v51, 0.0 }
 0x98a   :  { %v3429_v23 = vmax.f32 %v3413_v53, 0.0  ;;  %v3430_v1 = vmax.f32 %v3414_v60, 0.0  ;;  %v3431_v55 = vmax.f32 %v3415_v48, 0.0  ;;  %v3432_v37 = vmax.f32 %v3416_v29, 0.0  ;;  %3439 = vst.msk [vmem:[#allocation6] sm:$0xff] %vm1640_vm14, %v3423_v54  ;;  %3440 = vst.msk [vmem:[#allocation6 + $0x8] sm:$0xff] %vm1640_vm14, %v3424_v18 }
 0x98b   :  { %v3433_v39 = vmax.f32 %v3417_v46, 0.0  ;;  %v3434_v49 = vmax.f32 %v3418_v10, 0.0  ;;  %v3435_v3 = vmax.f32 %v3419_v63, 0.0  ;;  %v3436_v52 = vmax.f32 %v3420_v41, 0.0  ;;  %3441 = vst.msk [vmem:[#allocation6 + $0x10] sm:$0xff] %vm1640_vm14, %v3425_v38  ;;  %3442 = vst.msk [vmem:[#allocation6 + $0x18] sm:$0xff] %vm1640_vm14, %v3426_v21 }
 0x98c   :  { %3443 = vst.msk [vmem:[#allocation6 + $0x20] sm:$0xff] %vm1640_vm14, %v3427_v42  ;;  %3444 = vst.msk [vmem:[#allocation6 + $0x28] sm:$0xff] %vm1640_vm14, %v3428_v24  ;;  %v3437_v8 = vmax.f32 %v3421_v16, 0.0  ;;  %v3438_v27 = vmax.f32 %v3422_v44, 0.0 }
 0x98d   :  { %3445 = vst.msk [vmem:[#allocation6 + $0x30] sm:$0xff] %vm1640_vm14, %v3429_v23  ;;  %3446 = vst.msk [vmem:[#allocation6 + $0x38] sm:$0xff] %vm1640_vm14, %v3430_v1 }
 0x98e   :  { %3447 = vst.msk [vmem:[#allocation6 + $0x40] sm:$0xff] %vm1640_vm14, %v3431_v55  ;;  %3448 = vst.msk [vmem:[#allocation6 + $0x48] sm:$0xff] %vm1640_vm14, %v3432_v37 }
 0x98f   :  { %3449 = vst.msk [vmem:[#allocation6 + $0x50] sm:$0xff] %vm1640_vm14, %v3433_v39  ;;  %3450 = vst.msk [vmem:[#allocation6 + $0x58] sm:$0xff] %vm1640_vm14, %v3434_v49 }
 0x990   :  { %3451 = vst.msk [vmem:[#allocation6 + $0x60] sm:$0xff] %vm1640_vm14, %v3435_v3  ;;  %3452 = vst.msk [vmem:[#allocation6 + $0x68] sm:$0xff] %vm1640_vm14, %v3436_v52 }
 0x991   :  { %3453 = vst.msk [vmem:[#allocation6 + $0x70] sm:$0xff] %vm1640_vm14, %v3437_v8  ;;  %3454 = vst.msk [vmem:[#allocation6 + $0x78] sm:$0xff] %vm1640_vm14, %v3438_v27 }
 0x992   :  { %4310 = shalt.err (!%p4307_p4)
}
 0x993   :  { %s4311_s8 = scalar_lea.hbm %s5980_s5, 2048 }
 0x994   :  { %p4312_p5 = scmp.ne.s32.totalorder %s5980_s5, %s4311_s8  ;;  %p4315_p6 = scmp.lt.u32.totalorder %s4311_s8, %s5980_s5 }
 0x996   :  { %p4317_p7 = pnand %p4315_p6, %p4312_p5 }
 0x998   :  { %4320 = shalt.err (!%p4317_p7)
}
 0x999   :  { %s4340_s26 = smov 128  }
 0x99a   :  { %3466 = dma.vmem_to_hbm [thread:$0]  %s3461_s28, 2048, %s5980_s5, [#allocation7], %s4340_s26, %s4340_s26, %s4324_s14  }
 0x99b   :  { %4321 = dma.done.wait [#allocation7], 2048  }
 0x99c   :  { %4322 = vsyncadd [#allocation7], 4294965248 }
 0x99d   :  { %3470 = vsyncpa [#allocation7], 1 }

</bundles_post_ra>
